<compile_context>
chip_gen: v6e
topology: v6e:2x2x1
jax: 0.10.0
libtpu: 0.0.40
codegen_flags: <defaults>
</compile_context>

<pallas_src>
import functools

import jax
import jax.numpy as jnp
from jax.experimental import pallas as pl
from jax.experimental.pallas import tpu as pltpu


def _round_up(x, m):
    return (x + m - 1) // m * m


def _vq_kernel(n_total, tile_m, needs_mask, x_ref, e_ref, et_ref,
               idx_ref, q_ref, cnt_ref):
    i = pl.program_id(0)

    x = x_ref[...]       # (D, tile_m) f32 — channels on sublanes, pixels on lanes
    e = e_ref[...]       # (K, D)      f32 — codebook
    e_t = et_ref[...]    # (D, K)      f32 — codebook, transposed (tiny)
    D = x.shape[0]
    K = e.shape[0]

    # Transposed squared-distance matrix:
    #   dist[k, n] = ||x_n||^2 + ||e_k||^2 - 2 * x_n . e_k
    e_sqr = jnp.sum(e * e, axis=1, keepdims=True)        # (K, 1)
    x_sqr = jnp.sum(x * x, axis=0, keepdims=True)        # (1, tile_m)

    if D <= 16:
        # Contraction dim too small to feed the MXU usefully -> unrolled VPU
        # outer products ((K,1) x (1,tile_m) broadcasts), -2 folded in.
        acc = (-2.0 * e[:, 0:1]) * x[0:1, :]
        for d in range(1, D):
            acc = acc + (-2.0 * e[:, d:d + 1]) * x[d:d + 1, :]
    else:
        # MXU path for realistic embedding dims, -2 folded into the codebook.
        acc = jnp.dot(e * -2.0, x, preferred_element_type=jnp.float32)
    dist = acc + e_sqr + x_sqr                            # (K, tile_m)

    # argmin over the codebook (sublane) axis, first-min tie-break
    # (matches torch.argmin / jnp.argmin).
    k_iota = jax.lax.broadcasted_iota(jnp.int32, dist.shape, 0).astype(jnp.float32)
    min_val = jnp.min(dist, axis=0, keepdims=True)        # (1, tile_m)
    idx_f = jnp.min(jnp.where(dist == min_val, k_iota, jnp.float32(K)),
                    axis=0, keepdims=True)                # (1, tile_m)

    onehot = (k_iota == idx_f).astype(jnp.float32)        # (K, tile_m)

    # Quantized, transposed: (D, K) @ (K, tile_m) -> (D, tile_m); contraction
    # over K=128 feeds the MXU; output and HBM store are 128-lane dense.
    q_t = jnp.dot(e_t, onehot, preferred_element_type=jnp.float32)

    idx_ref[...] = idx_f.astype(jnp.int32)                # (1, tile_m) lane-dense
    q_ref[...] = q_t                                      # (D, tile_m) lane-dense

    # Per-tile code counts (padded pixels masked out); summed + turned into
    # perplexity in the wrapper so the grid axis can stay fully "parallel".
    if needs_mask:
        col = jax.lax.broadcasted_iota(jnp.int32, (1, x.shape[1]), 1) + i * tile_m
        onehot = onehot * (col < n_total).astype(jnp.float32)
    cnt_ref[...] = jnp.sum(onehot, axis=1)[None, :]       # (1, K)


def vector_quantizer_ema_forward(inputs_nchw, embedding_weight, *, tile_m=None):
    """Eval-mode forward of VectorQuantizerEMA.

    inputs_nchw:      (B, C, H, W) float32   (C == embedding_dim)
    embedding_weight: (K, C)       float32   (num_embeddings x embedding_dim)

    Returns (indices[B,H,W] int32, quantized[B,C,H,W] f32, perplexity scalar f32).
    """
    B, C, H, W = inputs_nchw.shape
    K, D = embedding_weight.shape
    assert D == C
    N = B * H * W

    # Single grid step for small N; otherwise large lane-dense tiles
    # (dist + onehot at tile_m=4096, K=128 is ~4 MiB of VMEM — comfortable).
    if tile_m is None:
        tile_m = min(_round_up(N, 128), 4096)
    else:
        tile_m = _round_up(tile_m, 128)
    n_pad = _round_up(N, tile_m)
    num_tiles = n_pad // tile_m
    needs_mask = n_pad != N

    e = embedding_weight.astype(jnp.float32)       # (K, D)
    e_t = e.T                                      # (D, K), tiny one-off

    # Layout glue: NCHW -> (C, B*H*W) = (D, N). Only a leading-dim transpose;
    # column n = b*H*W + h*W + w matches the NHWC flatten order of the module.
    x_t = jnp.transpose(inputs_nchw.astype(jnp.float32), (1, 0, 2, 3)).reshape(D, N)
    if needs_mask:
        x_t = jnp.pad(x_t, ((0, 0), (0, n_pad - N)))

    kernel = functools.partial(_vq_kernel, N, tile_m, needs_mask)

    idx_row, q_t, cnt_tiles = pl.pallas_call(
        kernel,
        out_shape=(
            jax.ShapeDtypeStruct((1, n_pad), jnp.int32),            # indices row
            jax.ShapeDtypeStruct((D, n_pad), jnp.float32),          # quantized^T
            jax.ShapeDtypeStruct((num_tiles, K), jnp.float32),      # per-tile counts
        ),
        grid_spec=pltpu.PrefetchScalarGridSpec(
            num_scalar_prefetch=0,
            grid=(num_tiles,),
            in_specs=[
                pl.BlockSpec((D, tile_m), lambda i: (0, i)),        # x tile (D, tm)
                pl.BlockSpec((K, D), lambda i: (0, 0)),             # codebook
                pl.BlockSpec((D, K), lambda i: (0, 0)),             # codebook^T
            ],
            out_specs=[
                pl.BlockSpec((1, tile_m), lambda i: (0, i)),        # indices tile
                pl.BlockSpec((D, tile_m), lambda i: (0, i)),        # quantized^T tile
                pl.BlockSpec((1, K), lambda i: (i, 0)),             # counts row
            ],
        ),
        compiler_params=pltpu.CompilerParams(
            dimension_semantics=("parallel",),                      # megacore-friendly
        ),
    )(x_t, e, e_t)

    # Wrapper glue: reshape back (cheap leading-dim transpose only).
    indices = idx_row[0, :N].reshape(B, H, W)
    quantized = jnp.transpose(q_t[:, :N].reshape(C, B, H, W), (1, 0, 2, 3))

    # Perplexity from the per-tile counts (K-length reduction, negligible).
    counts = jnp.sum(cnt_tiles, axis=0)                             # (K,)
    avg_probs = counts / jnp.float32(N)
    perplexity = jnp.exp(-jnp.sum(avg_probs * jnp.log(avg_probs + 1e-10)))

    # Straight-through estimator: forward value == quantized.
    return indices, quantized, perplexity


def _reference(inputs_nchw, embedding_weight):
    """Pure-JAX reference mirroring the PyTorch forward (eval mode)."""
    B, C, H, W = inputs_nchw.shape
    K, D = embedding_weight.shape
    x = jnp.transpose(inputs_nchw, (0, 2, 3, 1)).reshape(-1, D)
    dist = (jnp.sum(x ** 2, axis=1, keepdims=True)
            + jnp.sum(embedding_weight ** 2, axis=1)[None, :]
            - 2.0 * x @ embedding_weight.T)
    idx = jnp.argmin(dist, axis=1)
    onehot = jax.nn.one_hot(idx, K, dtype=jnp.float32)
    q = (onehot @ embedding_weight).reshape(B, H, W, C)
    q = jnp.transpose(q, (0, 3, 1, 2))
    avg = jnp.mean(onehot, axis=0)
    perp = jnp.exp(-jnp.sum(avg * jnp.log(avg + 1e-10)))
    return idx.reshape(B, H, W).astype(jnp.int32), q, perp


if __name__ == "__main__":
    # Module config: num_embeddings=128, embedding_dim=4 (== input channels).
    num_embeddings = 128
    embedding_dim = 4
    B, H, W = 2, 16, 16

    key = jax.random.PRNGKey(0)
    k_x, k_e = jax.random.split(key)
    x = jax.random.normal(k_x, (B, embedding_dim, H, W), dtype=jnp.float32)
    # nn.Embedding weight initialized with .normal_() -> standard normal.
    emb_w = jax.random.normal(k_e, (num_embeddings, embedding_dim),
                              dtype=jnp.float32)

    indices, quantized, perplexity = vector_quantizer_ema_forward(x, emb_w)
    jax.block_until_ready((indices, quantized, perplexity))

    # Sanity-check against the pure-JAX reference.
    ref_idx, ref_q, ref_p = _reference(x, emb_w)
    assert indices.shape == (B, H, W)
    assert quantized.shape == (B, embedding_dim, H, W)
    assert bool(jnp.all(indices == ref_idx))
    assert bool(jnp.allclose(quantized, ref_q, atol=1e-5))
    assert bool(jnp.allclose(perplexity, ref_p, atol=1e-5))

    print("KERNEL_OK")
</pallas_src>

<mosaic_0001>
module attributes {stable_mosaic.version = 11 : i64} {
  func.func @_vq_kernel(%arg0: i32, %arg1: memref<4x512xf32, #tpu.memory_space<vmem>>, %arg2: memref<128x4xf32, #tpu.memory_space<vmem>>, %arg3: memref<4x128xf32, #tpu.memory_space<vmem>>, %arg4: memref<1x512xi32, #tpu.memory_space<vmem>>, %arg5: memref<4x512xf32, #tpu.memory_space<vmem>>, %arg6: memref<1x128xf32, #tpu.memory_space<vmem>>) attributes {dimension_semantics = [#tpu.dimension_semantics<parallel>], iteration_bounds = array<i64: 1>, scalar_prefetch = 0 : i64, scratch_operands = 0 : i64, tpu.core_type = #tpu.core_type<tc>, window_params = [{transform_indices = @transform_0, window_bounds = array<i64: 4, 512>}, {pipeline_mode = #tpu.pipeline_mode<synchronous>, transform_indices = @transform_1, window_bounds = array<i64: 128, 4>}, {pipeline_mode = #tpu.pipeline_mode<synchronous>, transform_indices = @transform_2, window_bounds = array<i64: 4, 128>}, {transform_indices = @transform_3, window_bounds = array<i64: 1, 512>}, {transform_indices = @transform_4, window_bounds = array<i64: 4, 512>}, {transform_indices = @transform_5, window_bounds = array<i64: 1, 128>}]} {
    %c0 = arith.constant 0 : index
    %c0_0 = arith.constant 0 : index
    %0 = vector.load %arg1[%c0, %c0_0] : memref<4x512xf32, #tpu.memory_space<vmem>>, vector<4x512xf32>
    %c0_1 = arith.constant 0 : index
    %c0_2 = arith.constant 0 : index
    %1 = vector.load %arg2[%c0_1, %c0_2] : memref<128x4xf32, #tpu.memory_space<vmem>>, vector<128x4xf32>
    %c0_3 = arith.constant 0 : index
    %c0_4 = arith.constant 0 : index
    %2 = vector.load %arg3[%c0_3, %c0_4] : memref<4x128xf32, #tpu.memory_space<vmem>>, vector<4x128xf32>
    %3 = arith.mulf %1, %1 : vector<128x4xf32>
    %cst = arith.constant dense<0.000000e+00> : vector<128xf32>
    %4 = vector.multi_reduction <add>, %3, %cst [1] : vector<128x4xf32> to vector<128xf32>
    %5 = vector.shape_cast %4 : vector<128xf32> to vector<128x1xf32>
    %6 = arith.mulf %0, %0 : vector<4x512xf32>
    %cst_5 = arith.constant dense<0.000000e+00> : vector<512xf32>
    %7 = vector.multi_reduction <add>, %6, %cst_5 [0] : vector<4x512xf32> to vector<512xf32>
    %8 = vector.shape_cast %7 : vector<512xf32> to vector<1x512xf32>
    %9 = vector.extract_strided_slice %1 {offsets = [0, 0], sizes = [128, 1], strides = [1, 1]} : vector<128x4xf32> to vector<128x1xf32>
    %cst_6 = arith.constant -2.000000e+00 : f32
    %10 = vector.broadcast %cst_6 : f32 to vector<128x1xf32>
    %11 = arith.mulf %10, %9 : vector<128x1xf32>
    %12 = vector.extract_strided_slice %0 {offsets = [0, 0], sizes = [1, 512], strides = [1, 1]} : vector<4x512xf32> to vector<1x512xf32>
    %13 = vector.broadcast %11 : vector<128x1xf32> to vector<128x512xf32>
    %14 = vector.broadcast %12 : vector<1x512xf32> to vector<128x512xf32>
    %15 = arith.mulf %13, %14 : vector<128x512xf32>
    %16 = vector.extract_strided_slice %1 {offsets = [0, 1], sizes = [128, 1], strides = [1, 1]} : vector<128x4xf32> to vector<128x1xf32>
    %cst_7 = arith.constant -2.000000e+00 : f32
    %17 = vector.broadcast %cst_7 : f32 to vector<128x1xf32>
    %18 = arith.mulf %17, %16 : vector<128x1xf32>
    %19 = vector.extract_strided_slice %0 {offsets = [1, 0], sizes = [1, 512], strides = [1, 1]} : vector<4x512xf32> to vector<1x512xf32>
    %20 = vector.broadcast %18 : vector<128x1xf32> to vector<128x512xf32>
    %21 = vector.broadcast %19 : vector<1x512xf32> to vector<128x512xf32>
    %22 = arith.mulf %20, %21 : vector<128x512xf32>
    %23 = arith.addf %15, %22 : vector<128x512xf32>
    %24 = vector.extract_strided_slice %1 {offsets = [0, 2], sizes = [128, 1], strides = [1, 1]} : vector<128x4xf32> to vector<128x1xf32>
    %cst_8 = arith.constant -2.000000e+00 : f32
    %25 = vector.broadcast %cst_8 : f32 to vector<128x1xf32>
    %26 = arith.mulf %25, %24 : vector<128x1xf32>
    %27 = vector.extract_strided_slice %0 {offsets = [2, 0], sizes = [1, 512], strides = [1, 1]} : vector<4x512xf32> to vector<1x512xf32>
    %28 = vector.broadcast %26 : vector<128x1xf32> to vector<128x512xf32>
    %29 = vector.broadcast %27 : vector<1x512xf32> to vector<128x512xf32>
    %30 = arith.mulf %28, %29 : vector<128x512xf32>
    %31 = arith.addf %23, %30 : vector<128x512xf32>
    %32 = vector.extract_strided_slice %1 {offsets = [0, 3], sizes = [128, 1], strides = [1, 1]} : vector<128x4xf32> to vector<128x1xf32>
    %cst_9 = arith.constant -2.000000e+00 : f32
    %33 = vector.broadcast %cst_9 : f32 to vector<128x1xf32>
    %34 = arith.mulf %33, %32 : vector<128x1xf32>
    %35 = vector.extract_strided_slice %0 {offsets = [3, 0], sizes = [1, 512], strides = [1, 1]} : vector<4x512xf32> to vector<1x512xf32>
    %36 = vector.broadcast %34 : vector<128x1xf32> to vector<128x512xf32>
    %37 = vector.broadcast %35 : vector<1x512xf32> to vector<128x512xf32>
    %38 = arith.mulf %36, %37 : vector<128x512xf32>
    %39 = arith.addf %31, %38 : vector<128x512xf32>
    %40 = vector.broadcast %5 : vector<128x1xf32> to vector<128x512xf32>
    %41 = arith.addf %39, %40 : vector<128x512xf32>
    %42 = vector.broadcast %8 : vector<1x512xf32> to vector<128x512xf32>
    %43 = arith.addf %41, %42 : vector<128x512xf32>
    %44 = tpu.iota {dimensions = array<i32: 0>} : vector<128x512xi32>
    %45 = arith.sitofp %44 : vector<128x512xi32> to vector<128x512xf32>
    %cst_10 = arith.constant dense<0x7F800000> : vector<512xf32>
    %46 = vector.multi_reduction <minimumf>, %43, %cst_10 [0] : vector<128x512xf32> to vector<512xf32>
    %47 = vector.shape_cast %46 : vector<512xf32> to vector<1x512xf32>
    %48 = vector.broadcast %47 : vector<1x512xf32> to vector<128x512xf32>
    %49 = arith.cmpf oeq, %43, %48 : vector<128x512xf32>
    %cst_11 = arith.constant 1.280000e+02 : f32
    %50 = vector.broadcast %cst_11 : f32 to vector<128x512xf32>
    %51 = arith.select %49, %45, %50 : vector<128x512xi1>, vector<128x512xf32>
    %cst_12 = arith.constant dense<0x7F800000> : vector<512xf32>
    %52 = vector.multi_reduction <minimumf>, %51, %cst_12 [0] : vector<128x512xf32> to vector<512xf32>
    %53 = vector.shape_cast %52 : vector<512xf32> to vector<1x512xf32>
    %54 = vector.broadcast %53 : vector<1x512xf32> to vector<128x512xf32>
    %55 = arith.cmpf oeq, %45, %54 : vector<128x512xf32>
    %56 = arith.extui %55 : vector<128x512xi1> to vector<128x512xi32>
    %57 = arith.sitofp %56 : vector<128x512xi32> to vector<128x512xf32>
    %cst_13 = arith.constant dense<0.000000e+00> : vector<4x512xf32>
    %58 = tpu.matmul %2, %57, %cst_13 {dimension_numbers = #tpu.dot_dimension_numbers<[1], [0], [0], [1], [0, 0, 1, 1], [], []>} : vector<4x128xf32>, vector<128x512xf32>, vector<4x512xf32> -> vector<4x512xf32>
    %59 = arith.fptosi %53 : vector<1x512xf32> to vector<1x512xi32>
    %c0_14 = arith.constant 0 : index
    %c0_15 = arith.constant 0 : index
    %60 = vector.load %arg4[%c0_14, %c0_15] : memref<1x512xi32, #tpu.memory_space<vmem>>, vector<1x512xi32>
    tpu.vector_store %arg4[%c0_14, %c0_15], %59 {strides = array<i32>} : memref<1x512xi32, #tpu.memory_space<vmem>>, vector<1x512xi32>,
    %c0_16 = arith.constant 0 : index
    %c0_17 = arith.constant 0 : index
    %61 = vector.load %arg5[%c0_16, %c0_17] : memref<4x512xf32, #tpu.memory_space<vmem>>, vector<4x512xf32>
    tpu.vector_store %arg5[%c0_16, %c0_17], %58 {strides = array<i32>} : memref<4x512xf32, #tpu.memory_space<vmem>>, vector<4x512xf32>,
    %cst_18 = arith.constant dense<0.000000e+00> : vector<128xf32>
    %62 = vector.multi_reduction <add>, %57, %cst_18 [1] : vector<128x512xf32> to vector<128xf32>
    %63 = vector.shape_cast %62 : vector<128xf32> to vector<1x128xf32>
    %c0_19 = arith.constant 0 : index
    %c0_20 = arith.constant 0 : index
    %64 = vector.load %arg6[%c0_19, %c0_20] : memref<1x128xf32, #tpu.memory_space<vmem>>, vector<1x128xf32>
    tpu.vector_store %arg6[%c0_19, %c0_20], %63 {strides = array<i32>} : memref<1x128xf32, #tpu.memory_space<vmem>>, vector<1x128xf32>,
    return
  }
  func.func @transform_0(%arg0: i32) -> (i32, i32) {
    %c0_i32 = arith.constant 0 : i32
    %c0_i32_0 = arith.constant 0 : i32
    return %c0_i32, %arg0 : i32, i32
  }
  func.func @transform_1(%arg0: i32) -> (i32, i32) {
    %c0_i32 = arith.constant 0 : i32
    %c0_i32_0 = arith.constant 0 : i32
    %c0_i32_1 = arith.constant 0 : i32
    return %c0_i32, %c0_i32_0 : i32, i32
  }
  func.func @transform_2(%arg0: i32) -> (i32, i32) {
    %c0_i32 = arith.constant 0 : i32
    %c0_i32_0 = arith.constant 0 : i32
    %c0_i32_1 = arith.constant 0 : i32
    return %c0_i32, %c0_i32_0 : i32, i32
  }
  func.func @transform_3(%arg0: i32) -> (i32, i32) {
    %c0_i32 = arith.constant 0 : i32
    %c0_i32_0 = arith.constant 0 : i32
    return %c0_i32, %arg0 : i32, i32
  }
  func.func @transform_4(%arg0: i32) -> (i32, i32) {
    %c0_i32 = arith.constant 0 : i32
    %c0_i32_0 = arith.constant 0 : i32
    return %c0_i32, %arg0 : i32, i32
  }
  func.func @transform_5(%arg0: i32) -> (i32, i32) {
    %c0_i32 = arith.constant 0 : i32
    %c0_i32_0 = arith.constant 0 : i32
    return %arg0, %c0_i32 : i32, i32
  }
}

</mosaic_0001>

<bundles_post_ra>
// kernel: tpu_custom_call.1
= control target key start
LH: loop header
LB: loop body
LE: loop exit
PB: predicated region body
PF: predicated region fallthrough
CT: control target
= control target key end

     0   :  { %11 = vsyncpa [#allocation3], 0  ;;  %vm54_vm0 = vcmask 31744   ;;  %v5021_v4 = vmov 2   ;;  %v2330_v5 = vmov 1   ;;  %s5013_s0 = inlined_call_operand.vmem [shape: f32[4,512], index: 0, kind: input, shape index: {}]   ;;  %s5014_s1 = inlined_call_operand.vmem [shape: f32[128,4], index: 1, kind: input, shape index: {}]   ;;  %s5015_s2 = inlined_call_operand.vmem [shape: f32[4,128], index: 2, kind: input, shape index: {}]   ;;  %s5016_s3 = inlined_call_operand.hbm [shape: s32[1,512], index: 3, kind: output, shape index: {0}]   ;;  %s5017_s4 = inlined_call_operand.hbm [shape: f32[4,512], index: 4, kind: output, shape index: {1}]   ;;  %s5018_s5 = inlined_call_operand.hbm [shape: f32[1,128], index: 5, kind: output, shape index: {2}]  }
   0x1   :  { %v22_v0 = vld [vmem:[%s5014_s1 + $0x8] sm:$0xff]  ;;  %v2375_v1 = vld [vmem:[%s5014_s1] sm:$0xff]  ;;  %2252 = vset.pattern.permute.xlu1 %v5021_v4  ;;  %2253 = vset.pattern.permute.xlu0 %v2330_v5 }
   0x2   :  { %v39_v2 = vmul.f32 %v22_v0, %v22_v0  ;;  %v38_v3 = vmul.f32 %v2375_v1, %v2375_v1 }
   0x4   :  { %v58_v6 = vsel %vm54_vm0, %v39_v2, 0.0  ;;  %v55_v7 = vsel %vm54_vm0, %v38_v3, 0.0 }
   0x5   :  { %59 = vadd.xlane.f32.xlu1 %v58_v6  ;;  %56 = vadd.xlane.f32.xlu0 %v55_v7 }
   0x6   :  { %12 = vsyncpa [#allocation5], 0  ;;  %v2383_v8 = vmul.f32 -2.0, %v22_v0  ;;  %v24_v9 = vld [vmem:[%s5014_s1 + $0x18] sm:$0xff]  ;;  %v26_v11 = vld [vmem:[%s5014_s1 + $0x28] sm:$0xff]  ;;  %v2331_v12 = vmov 0  }
   0x7   :  { %v2389_v10 = vmul.f32 -2.0, %v24_v9  ;;  %v2396_v13 = vmul.f32 -2.0, %v26_v11  ;;  %v28_v14 = vld [vmem:[%s5014_s1 + $0x38] sm:$0xff]  ;;  %v30_v16 = vld [vmem:[%s5014_s1 + $0x48] sm:$0xff]  ;;  %v23_v20 = vld [vmem:[%s5014_s1 + $0x10] sm:$0xff]  ;;  %v41_v23 = vmul.f32 %v24_v9, %v24_v9  ;;  %v43_v28 = vmul.f32 %v26_v11, %v26_v11 }
   0x8   :  { %v2402_v15 = vmul.f32 -2.0, %v28_v14  ;;  %v2408_v17 = vmul.f32 -2.0, %v30_v16  ;;  %v32_v18 = vld [vmem:[%s5014_s1 + $0x58] sm:$0xff]  ;;  %v40_v21 = vmul.f32 %v23_v20, %v23_v20  ;;  %v25_v24 = vld [vmem:[%s5014_s1 + $0x20] sm:$0xff]  ;;  %v27_v29 = vld [vmem:[%s5014_s1 + $0x30] sm:$0xff]  ;;  %v45_v36 = vmul.f32 %v28_v14, %v28_v14 }
   0x9   :  { %v2414_v19 = vmul.f32 -2.0, %v32_v18  ;;  %v64_v25 = vsel %vm54_vm0, %v41_v23, 0.0  ;;  %v42_v26 = vmul.f32 %v25_v24, %v25_v24  ;;  %v70_v30 = vsel %vm54_vm0, %v43_v28, 0.0  ;;  %v34_v33 = vld [vmem:[%s5014_s1 + $0x68] sm:$0xff]  ;;  %v29_v38 = vld [vmem:[%s5014_s1 + $0x40] sm:$0xff]  ;;  %v31_v44 = vld [vmem:[%s5014_s1 + $0x50] sm:$0xff] }
   0xa   :  { %v61_v22 = vsel %vm54_vm0, %v40_v21, 0.0  ;;  %v44_v31 = vmul.f32 %v27_v29, %v27_v29  ;;  %v49_v32 = vmul.f32 %v32_v18, %v32_v18  ;;  %v51_v37 = vmul.f32 %v34_v33, %v34_v33  ;;  %v33_v49 = vld [vmem:[%s5014_s1 + $0x60] sm:$0xff]  ;;  %v2486_v60 = vld [vmem:[%s5014_s1 + $0x78] sm:$0xff]  ;;  %v35_v62 = vld [vmem:[%s5014_s1 + $0x70] sm:$0xff] }
   0xb   :  { %v67_v27 = vsel %vm54_vm0, %v42_v26, 0.0  ;;  %v76_v39 = vsel %vm54_vm0, %v45_v36, 0.0  ;;  %v46_v41 = vmul.f32 %v29_v38, %v29_v38  ;;  %v47_v43 = vmul.f32 %v30_v16, %v30_v16 }
   0xc   :  { %v73_v34 = vsel %vm54_vm0, %v44_v31, 0.0  ;;  %v88_v35 = vsel %vm54_vm0, %v49_v32, 0.0  ;;  %v94_v40 = vsel %vm54_vm0, %v51_v37, 0.0  ;;  %v48_v46 = vmul.f32 %v31_v44, %v31_v44 }
   0xd   :  { %v79_v42 = vsel %vm54_vm0, %v46_v41, 0.0  ;;  %v82_v45 = vsel %vm54_vm0, %v47_v43, 0.0  ;;  %v2448_v48 = vmul.f32 -2.0, %v2375_v1  ;;  %v2454_v50 = vmul.f32 -2.0, %v33_v49 }
   0xe   :  { %v85_v47 = vsel %vm54_vm0, %v48_v46, 0.0  ;;  %v2456_v51 = vmul.f32 -2.0, %v23_v20  ;;  %v2462_v52 = vmul.f32 -2.0, %v25_v24  ;;  %v2332_v53 = vmov 3  }
   0xf   :  { %v2467_v54 = vmul.f32 -2.0, %v27_v29  ;;  %v2471_v55 = vmul.f32 -2.0, %v29_v38  ;;  %v2475_v56 = vmul.f32 -2.0, %v31_v44  ;;  %v50_v57 = vmul.f32 %v33_v49, %v33_v49 }
  0x10   :  { %v2479_v58 = vmul.f32 -2.0, %v34_v33  ;;  %v2490_v61 = vmul.f32 -2.0, %v2486_v60  ;;  %v2503_v63 = vmul.f32 -2.0, %v35_v62  ;;  %v52_v14 = vmul.f32 %v35_v62, %v35_v62 }
  0x11   :  { %v91_v59 = vsel %vm54_vm0, %v50_v57, 0.0  ;;  %vm111_vm1 = vcmask 1043456  }
  0x16   :  { %571 = vperm.xlu1 %2252, %v2383_v8  }
  0x1a   :  { %2254 = vset.pattern.permute.xlu1 %v2331_v12 }
  0x1b   :  { %351 = vperm.xlu0 %2253, %v2389_v10  }
  0x1f   :  { %359 = vperm.xlu0 %2253, %v2396_v13  }
  0x23   :  { %367 = vperm.xlu0 %2253, %v2402_v15  }
  0x27   :  { %375 = vperm.xlu0 %2253, %v2408_v17  }
  0x2b   :  { %383 = vperm.xlu0 %2253, %v2414_v19  }
  0x2f   :  { %2257 = vset.pattern.permute.xlu0 %v2331_v12 }
  0x3a   :  { %62 = vadd.xlane.f32.xlu1 %v61_v22 }
  0x3e   :  { %65 = vadd.xlane.f32.xlu1 %v64_v25 }
  0x42   :  { %68 = vadd.xlane.f32.xlu1 %v67_v27 }
  0x46   :  { %71 = vadd.xlane.f32.xlu1 %v70_v30 }
  0x4a   :  { %74 = vadd.xlane.f32.xlu1 %v73_v34  ;;  %89 = vadd.xlane.f32.xlu0 %v88_v35 }
  0x4e   :  { %77 = vadd.xlane.f32.xlu1 %v76_v39  ;;  %95 = vadd.xlane.f32.xlu0 %v94_v40 }
  0x52   :  { %80 = vadd.xlane.f32.xlu1 %v79_v42 }
  0x56   :  { %83 = vadd.xlane.f32.xlu1 %v82_v45 }
  0x5a   :  { %86 = vadd.xlane.f32.xlu1 %v85_v47 }
  0x64   :  { %158 = vperm.xlu0 %2257, %v2448_v48  }
  0x68   :  { %163 = vperm.xlu0 %2257, %v2383_v8  }
  0x6b   :  { %218 = vperm.xlu1 %2254, %v2454_v50  }
  0x6c   :  { %168 = vperm.xlu0 %2257, %v2456_v51  }
  0x6f   :  { %2255 = vset.pattern.permute.xlu1 %v5021_v4 }
  0x70   :  { %611 = vperm.xlu1 %2255, %v2414_v19   ;;  %173 = vperm.xlu0 %2257, %v2389_v10  }
  0x74   :  { %178 = vperm.xlu0 %2257, %v2462_v52   ;;  %2256 = vset.pattern.permute.xlu1 %v2332_v53 }
  0x78   :  { %183 = vperm.xlu0 %2257, %v2396_v13  }
  0x7c   :  { %188 = vperm.xlu0 %2257, %v2467_v54  }
  0x80   :  { %193 = vperm.xlu0 %2257, %v2402_v15  }
  0x84   :  { %198 = vperm.xlu0 %2257, %v2471_v55  }
  0x88   :  { %203 = vperm.xlu0 %2257, %v2408_v17  }
  0x8c   :  { %208 = vperm.xlu0 %2257, %v2475_v56  }
  0x8e   :  { %v2508_v0 = vpop.xlane.xlu0 %56  ;;  %v2526_v6 = vpop.xlane.xlu1 %59 }
  0x8f   :  { %5183 = vst [vmem:[#allocation9_spill] sm:$0xff] %v2508_v0  ;;  %5184 = vst [vmem:[#allocation10_spill] sm:$0xff] %v2526_v6 }
  0x90   :  { %213 = vperm.xlu0 %2257, %v2414_v19  }
  0x92   :  { %v2531_v9 = vpop.permute.xlu1 %571 }
  0x94   :  { %92 = vadd.xlane.f32.xlu1 %v91_v59  ;;  %223 = vperm.xlu0 %2257, %v2479_v58  }
  0x96   :  { %v2514_v1 = vpop.permute.xlu0 %351 }
  0x98   :  { %233 = vperm.xlu0 %2257, %v2490_v61  }
  0x9a   :  { %v2518_v2 = vpop.permute.xlu0 %359 }
  0x9c   :  { %2262 = vset.pattern.permute.xlu0 %v5021_v4 }
  0x9d   :  { %567 = vperm.xlu0 %2262, %v2448_v48  }
  0x9e   :  { %v2523_v3 = vpop.permute.xlu0 %367 }
  0xa1   :  { %575 = vperm.xlu0 %2262, %v2456_v51  }
  0xa2   :  { %v2528_v7 = vpop.permute.xlu0 %375 }
  0xa5   :  { %835 = vperm.xlu1 %2256, %v2475_v56   ;;  %579 = vperm.xlu0 %2262, %v2389_v10  }
  0xa6   :  { %v2533_v11 = vpop.permute.xlu0 %383 }
  0xa9   :  { %839 = vperm.xlu1 %2256, %v2414_v19   ;;  %583 = vperm.xlu0 %2262, %v2462_v52   ;;  %v97_v19 = vsel %vm54_vm0, %v52_v14, 0.0 }
  0xad   :  { %2258 = vset.pattern.permute.xlu1 %v2331_v12  ;;  %587 = vperm.xlu0 %2262, %v2396_v13  }
  0xae   :  { %228 = vperm.xlu1 %2258, %v2503_v63  }
  0xb1   :  { %591 = vperm.xlu0 %2262, %v2467_v54  }
  0xb2   :  { %2259 = vset.pattern.permute.xlu1 %v5021_v4 }
  0xb3   :  { %619 = vperm.xlu1 %2259, %v2479_v58  }
  0xb5   :  { %595 = vperm.xlu0 %2262, %v2402_v15  }
  0xb7   :  { %2260 = vset.pattern.permute.xlu1 %v2332_v53 }
  0xb8   :  { %843 = vperm.xlu1 %2260, %v2454_v50  }
  0xb9   :  { %599 = vperm.xlu0 %2262, %v2471_v55  }
  0xbc   :  { %2261 = vset.pattern.permute.xlu1 %v2330_v5 }
  0xbd   :  { %603 = vperm.xlu0 %2262, %v2408_v17  }
  0xc1   :  { %607 = vperm.xlu0 %2262, %v2475_v56  }
  0xc3   :  { %v2536_v5 = vpop.xlane.xlu1 %62 }
  0xc4   :  { %5185 = vst [vmem:[#allocation11_spill] sm:$0xff] %v2536_v5 }
  0xc5   :  { %615 = vperm.xlu0 %2262, %v2454_v50  }
  0xc7   :  { %v2541_v16 = vpop.xlane.xlu1 %65 }
  0xc8   :  { %5187 = vst [vmem:[#allocation13_spill] sm:$0xff] %v2541_v16 }
  0xc9   :  { %627 = vperm.xlu0 %2262, %v2490_v61  }
  0xcb   :  { %v2548_v20 = vpop.xlane.xlu1 %68 }
  0xcc   :  { %5189 = vst [vmem:[#allocation15_spill] sm:$0xff] %v2548_v20 }
  0xcd   :  { %2264 = vset.pattern.permute.xlu0 %v2332_v53 }
  0xce   :  { %795 = vperm.xlu0 %2264, %v2448_v48  }
  0xcf   :  { %v2553_v22 = vpop.xlane.xlu1 %71 }
  0xd0   :  { %5190 = vst [vmem:[#allocation16_spill] sm:$0xff] %v2553_v22 }
  0xd2   :  { %799 = vperm.xlu0 %2264, %v2383_v8  }
  0xd3   :  { %v2539_v12 = vpop.xlane.xlu0 %89  ;;  %v2561_v25 = vpop.xlane.xlu1 %74 }
  0xd4   :  { %5186 = vst [vmem:[#allocation12_spill] sm:$0xff] %v2539_v12  ;;  %5191 = vst [vmem:[#allocation17_spill] sm:$0xff] %v2561_v25 }
  0xd6   :  { %803 = vperm.xlu0 %2264, %v2456_v51  }
  0xd7   :  { %v2544_v18 = vpop.xlane.xlu0 %95  ;;  %v2567_v26 = vpop.xlane.xlu1 %77 }
  0xd8   :  { %5188 = vst [vmem:[#allocation14_spill] sm:$0xff] %v2544_v18  ;;  %5192 = vst [vmem:[#allocation18_spill] sm:$0xff] %v2567_v26 }
  0xda   :  { %807 = vperm.xlu0 %2264, %v2389_v10  }
  0xdb   :  { %v2576_v29 = vpop.xlane.xlu1 %80 }
  0xdc   :  { %98 = vadd.xlane.f32.xlu1 %v97_v19  ;;  %5193 = vst [vmem:[#allocation19_spill] sm:$0xff] %v2576_v29 }
  0xde   :  { %811 = vperm.xlu0 %2264, %v2462_v52  }
  0xdf   :  { %v2551_v21 = vpop.permute.xlu0 %158  ;;  %v2598_v33 = vpop.xlane.xlu1 %83 }
  0xe0   :  { %5195 = vst [vmem:[#allocation21_spill] sm:$0xff] %v2598_v33 }
  0xe2   :  { %815 = vperm.xlu0 %2264, %v2396_v13   ;;  %v5019_v13 = vlaneseq }
  0xe3   :  { %v2556_v23 = vpop.permute.xlu0 %163 }
  0xe6   :  { %819 = vperm.xlu0 %2264, %v2467_v54  }
  0xe7   :  { %v2559_v24 = vpop.permute.xlu0 %168 }
  0xea   :  { %823 = vperm.xlu0 %2264, %v2402_v15   ;;  %v2579_v15 = vshrl.u32 %v5019_v13, 7 }
  0xeb   :  { %v2564_v10 = vpop.permute.xlu0 %173 }
  0xec   :  { %5194 = vst [vmem:[#allocation20_spill] sm:$0xff] %v2579_v15  ;;  %v404_v30 = vsub.s32 1, %v2579_v15  ;;  %v408_v31 = vsub.s32 5, %v2579_v15  ;;  %v240_v34 = vsub.s32 0, %v2579_v15  ;;  %v244_v35 = vsub.s32 4, %v2579_v15 }
  0xed   :  { %339 = vperm.xlu1 %2261, %v2448_v48  }
  0xee   :  { %827 = vperm.xlu0 %2264, %v2471_v55  }
  0xef   :  { %v2570_v27 = vpop.permute.xlu0 %178 }
  0xf1   :  { %343 = vperm.xlu1 %2261, %v2383_v8   ;;  %v2591_v8 = vld [vmem:[%s5013_s0] sm:$0xff] }
  0xf2   :  { %831 = vperm.xlu0 %2264, %v2408_v17   ;;  %v2596_v17 = vld [vmem:[%s5013_s0 + $0x8] sm:$0xff]  ;;  %v405_v36 = vrot.slane %v2591_v8, %v404_v30  ;;  %v409_v37 = vrot.slane %v2591_v8, %v408_v31  ;;  %v241_v41 = vrot.slane %v2591_v8, %v240_v34  ;;  %v245_v42 = vrot.slane %v2591_v8, %v244_v35 }
  0xf3   :  { %v2574_v28 = vpop.permute.xlu0 %183  ;;  %v413_v38 = vrot.slane %v2596_v17, %v404_v30  ;;  %v417_v39 = vrot.slane %v2596_v17, %v408_v31  ;;  %v249_v43 = vrot.slane %v2596_v17, %v240_v34  ;;  %v253_v44 = vrot.slane %v2596_v17, %v244_v35 }
  0xf4   :  { %v2615_v45 = vrot.slane %v405_v36, %v404_v30  ;;  %v2617_v46 = vrot.slane %v409_v37, %v404_v30  ;;  %v2630_v53 = vrot.slane %v245_v42, %v240_v34  ;;  %v632_v36 = vsub.s32 2, %v2579_v15 }
  0xf5   :  { %347 = vperm.xlu1 %2261, %v2456_v51   ;;  %v2619_v47 = vrot.slane %v413_v38, %v404_v30  ;;  %v2621_v48 = vrot.slane %v417_v39, %v404_v30  ;;  %v2625_v51 = vpop.xlane.xlu1 %86  ;;  %v2634_v57 = vrot.slane %v253_v44, %v240_v34  ;;  %v636_v37 = vsub.s32 6, %v2579_v15 }
  0xf6   :  { %847 = vperm.xlu0 %2264, %v2479_v58   ;;  %5196 = vst [vmem:[#allocation22_spill] sm:$0xff] %v2615_v45  ;;  %5197 = vst [vmem:[#allocation23_spill] sm:$0xff] %v2617_v46  ;;  %v474_v59 = vmul.f32 %v2615_v45, %v2528_v7  ;;  %v475_v62 = vmul.f32 %v2617_v46, %v2528_v7  ;;  %v633_v44 = vrot.slane %v2591_v8, %v632_v36 }
  0xf7   :  { %v2585_v32 = vpop.permute.xlu0 %188  ;;  %5198 = vst [vmem:[#allocation24_spill] sm:$0xff] %v2625_v51  ;;  %5200 = vst [vmem:[#allocation26_spill] sm:$0xff] %v2630_v53  ;;  %v476_v14 = vmul.f32 %v2619_v47, %v2528_v7  ;;  %v641_v13 = vrot.slane %v2596_v17, %v632_v36 }
  0xf8   :  { %5202 = vst [vmem:[#allocation28_spill] sm:$0xff] %v2634_v57  ;;  %v2680_v4 = vrot.slane %v633_v44, %v632_v36 }
  0xf9   :  { %355 = vperm.xlu1 %2261, %v2462_v52   ;;  %v2628_v52 = vrot.slane %v241_v41, %v240_v34  ;;  %v2651_v38 = vpop.permute.xlu1 %218  ;;  %v2684_v51 = vrot.slane %v641_v13, %v632_v36 }
  0xfa   :  { %851 = vperm.xlu0 %2264, %v2503_v63   ;;  %5205 = vst [vmem:[#allocation31_spill] sm:$0xff] %v2680_v4 }
  0xfb   :  { %v2607_v40 = vpop.permute.xlu0 %193  ;;  %5199 = vst [vmem:[#allocation25_spill] sm:$0xff] %v2628_v52  ;;  %5207 = vst [vmem:[#allocation33_spill] sm:$0xff] %v2684_v51 }
  0xfd   :  { %363 = vperm.xlu1 %2261, %v2467_v54   ;;  %v2632_v54 = vrot.slane %v249_v43, %v240_v34 }
  0xfe   :  { %855 = vperm.xlu0 %2264, %v2490_v61  }
  0xff   :  { %v2623_v49 = vpop.permute.xlu0 %198  ;;  %5201 = vst [vmem:[#allocation27_spill] sm:$0xff] %v2632_v54 }
 0x101   :  { %371 = vperm.xlu1 %2261, %v2471_v55   ;;  %v477_v55 = vmul.f32 %v2621_v48, %v2528_v7 }
 0x103   :  { %v204_v19 = vpop.permute.xlu0 %203 }
 0x104   :  { %v310_v30 = vmul.f32 %v2628_v52, %v204_v19  ;;  %v311_v31 = vmul.f32 %v2630_v53, %v204_v19  ;;  %v312_v34 = vmul.f32 %v2632_v54, %v204_v19  ;;  %v313_v35 = vmul.f32 %v2634_v57, %v204_v19 }
 0x105   :  { %379 = vperm.xlu1 %2261, %v2475_v56   ;;  %v637_v19 = vrot.slane %v2591_v8, %v636_v37  ;;  %v645_v56 = vrot.slane %v2596_v17, %v636_v37 }
 0x106   :  { %v2653_v39 = vadd.f32 %v474_v59, %v310_v30  ;;  %v2655_v7 = vadd.f32 %v475_v62, %v311_v31  ;;  %v2657_v41 = vadd.f32 %v476_v14, %v312_v34  ;;  %v2659_v42 = vadd.f32 %v477_v55, %v313_v35  ;;  %v612_v31 = vpop.permute.xlu1 %611 }
 0x107   :  { %v2661_v43 = vpop.permute.xlu0 %208  ;;  %v482_v59 = vmul.f32 %v2615_v45, %v2533_v11  ;;  %v483_v62 = vmul.f32 %v2617_v46, %v2533_v11  ;;  %v484_v14 = vmul.f32 %v2619_v47, %v2533_v11  ;;  %v485_v55 = vmul.f32 %v2621_v48, %v2533_v11 }
 0x108   :  { %5203 = vst [vmem:[#allocation29_spill] sm:$0xff] %v2657_v41  ;;  %5204 = vst [vmem:[#allocation30_spill] sm:$0xff] %v2659_v42  ;;  %v2682_v18 = vrot.slane %v637_v19, %v632_v36  ;;  %v2686_v29 = vrot.slane %v645_v56, %v632_v36  ;;  %v710_v33 = vmul.f32 %v2680_v4, %v612_v31 }
 0x109   :  { %387 = vperm.xlu1 %2261, %v2454_v50  }
 0x10a   :  { %5206 = vst [vmem:[#allocation32_spill] sm:$0xff] %v2682_v18  ;;  %5208 = vst [vmem:[#allocation34_spill] sm:$0xff] %v2686_v29  ;;  %v711_v6 = vmul.f32 %v2682_v18, %v612_v31  ;;  %v713_v44 = vmul.f32 %v2686_v29, %v612_v31 }
 0x10b   :  { %v214_v30 = vpop.permute.xlu0 %213 }
 0x10c   :  { %v318_v34 = vmul.f32 %v2628_v52, %v214_v30  ;;  %v319_v35 = vmul.f32 %v2630_v53, %v214_v30  ;;  %v320_v50 = vmul.f32 %v2632_v54, %v214_v30  ;;  %v321_v37 = vmul.f32 %v2634_v57, %v214_v30 }
 0x10d   :  { %391 = vperm.xlu1 %2261, %v2479_v58   ;;  %v712_v30 = vmul.f32 %v2684_v51, %v612_v31 }
 0x10e   :  { %v546_v11 = vadd.f32 %v482_v59, %v318_v34  ;;  %v547_v25 = vadd.f32 %v483_v62, %v319_v35  ;;  %v548_v20 = vadd.f32 %v484_v14, %v320_v50  ;;  %v549_v5 = vadd.f32 %v485_v55, %v321_v37 }
 0x10f   :  { %v2693_v19 = vpop.permute.xlu0 %223  ;;  %v5211_v14 = vmov 2   ;;  %v103_v55 = vmul.f32 %v2591_v8, %v2591_v8  ;;  %v451_v34 = vmul.f32 %v2617_v46, %v2514_v1 }
 0x110   :  { %v774_v13 = vadd.f32 %v710_v33, %v546_v11  ;;  %v775_v36 = vadd.f32 %v711_v6, %v547_v25  ;;  %v2696_v56 = vadd.f32 %v712_v30, %v548_v20  ;;  %v2698_v58 = vadd.f32 %v713_v44, %v549_v5 }
 0x111   :  { %395 = vperm.xlu1 %2261, %v2503_v63   ;;  %v2712_v6 = vsub.s32 3, %v2579_v15  ;;  %v5035_v5 = vsub.s32 7, %v2579_v15  ;;  %v104_v20 = vmul.f32 %v2596_v17, %v2596_v17  ;;  %v287_v25 = vmul.f32 %v2630_v53, %v2564_v10 }
 0x112   :  { %5209 = vst [vmem:[#allocation35_spill] sm:$0xff] %v2696_v56  ;;  %5210 = vst [vmem:[#allocation36_spill] sm:$0xff] %v2698_v58  ;;  %v450_v33 = vmul.f32 %v2615_v45, %v2514_v1  ;;  %v107_v35 = vcombine.high %v103_v55, %v103_v55 }
 0x113   :  { %v2700_v59 = vpop.permute.xlu0 %233  ;;  %v861_v37 = vrot.slane %v2591_v8, %v2712_v6  ;;  %v865_v11 = vrot.slane %v2591_v8, %v5035_v5  ;;  %v108_v30 = vcombine.high %v104_v20, %v104_v20 }
 0x115   :  { %399 = vperm.xlu1 %2261, %v2490_v61   ;;  %v286_v61 = vmul.f32 %v2628_v52, %v2564_v10  ;;  %v2745_v42 = vrot.slane %v861_v37, %v2712_v6  ;;  %v2748_v8 = vrot.slane %v865_v11, %v2712_v6  ;;  %v126_v37 = vsel %vm111_vm1, %v104_v20, 0.0 }
 0x117   :  { %v514_v44 = vadd.f32 %v450_v33, %v286_v61  ;;  %5218 = vst [vmem:[#allocation43_spill] sm:$0xff] %v2745_v42  ;;  %5219 = vst [vmem:[#allocation44_spill] sm:$0xff] %v2748_v8  ;;  %v119_v33 = vsel %vm111_vm1, %v107_v35, 0.0  ;;  %v458_v35 = vmul.f32 %v2615_v45, %v2518_v2 }
 0x118   :  { %v2703_v62 = vpop.permute.xlu0 %567 }
 0x119   :  { %2263 = vset.pattern.permute.xlu1 %v5211_v14  ;;  %v515_v14 = vadd.f32 %v451_v34, %v287_v25  ;;  %v112_v25 = vsel %vm111_vm1, %v103_v55, 0.0  ;;  %v294_v34 = vmul.f32 %v2628_v52, %v2574_v28 }
 0x11a   :  { %623 = vperm.xlu1 %2263, %v2503_v63   ;;  %v113_v5 = vrot.slane %v112_v25, 4 }
 0x11b   :  { %v522_v12 = vadd.f32 %v458_v35, %v294_v34  ;;  %v302_v34 = vmul.f32 %v2628_v52, %v2607_v40 }
 0x11c   :  { %v2709_v31 = vpop.permute.xlu0 %575  ;;  %v114_v58 = vadd.f32 %v113_v5, %v112_v25 }
 0x11d   :  { %5212 = vst [vmem:[#allocation37_spill] sm:$0xff] %v2709_v31  ;;  %v2721_v63 = vpop.xlane.xlu1 %92 }
 0x11e   :  { %5213 = vst [vmem:[#allocation38_spill] sm:$0xff] %v2721_v63 }
 0x120   :  { %v2727_v50 = vpop.permute.xlu0 %579 }
 0x121   :  { %5214 = vst [vmem:[#allocation39_spill] sm:$0xff] %v2727_v50  ;;  %v678_v63 = vmul.f32 %v2680_v4, %v2727_v50  ;;  %v679_v0 = vmul.f32 %v2682_v18, %v2727_v50  ;;  %v2738_v26 = vpop.permute.xlu1 %835 }
 0x122   :  { %5215 = vst [vmem:[#allocation40_spill] sm:$0xff] %v2738_v26 }
 0x123   :  { %v2740_v22 = vadd.f32 %v678_v63, %v514_v44  ;;  %v2742_v16 = vadd.f32 %v679_v0, %v515_v14  ;;  %v295_v63 = vmul.f32 %v2630_v53, %v2574_v28  ;;  %v133_v44 = vsel %vm111_vm1, %v108_v30, 0.0 }
 0x124   :  { %v2750_v61 = vpop.permute.xlu0 %583  ;;  %v459_v14 = vmul.f32 %v2617_v46, %v2518_v2  ;;  %v134_v41 = vrot.slane %v133_v44, 4 }
 0x125   :  { %5216 = vst [vmem:[#allocation41_spill] sm:$0xff] %v2740_v22  ;;  %5217 = vst [vmem:[#allocation42_spill] sm:$0xff] %v2742_v16  ;;  %v2758_v0 = vpop.permute.xlu1 %839  ;;  %v120_v16 = vrot.slane %v119_v33, 4  ;;  %v127_v22 = vrot.slane %v126_v37, 4 }
 0x126   :  { %5220 = vst [vmem:[#allocation45_spill] sm:$0xff] %v2750_v61  ;;  %v938_v11 = vmul.f32 %v2745_v42, %v2758_v0  ;;  %v939_v55 = vmul.f32 %v2748_v8, %v2758_v0  ;;  %v523_v42 = vadd.f32 %v459_v14, %v295_v63  ;;  %v303_v63 = vmul.f32 %v2630_v53, %v2607_v40 }
 0x127   :  { %v121_v56 = vadd.f32 %v120_v16, %v119_v33 }
 0x128   :  { %v2770_v61 = vadd.f32 %v938_v11, %v774_v13  ;;  %v2772_v20 = vadd.f32 %v939_v55, %v775_v36  ;;  %v2774_v30 = vpop.permute.xlu0 %587  ;;  %v128_v13 = vadd.f32 %v127_v22, %v126_v37  ;;  %v135_v11 = vadd.f32 %v134_v41, %v133_v44 }
 0x129   :  { %v686_v8 = vmul.f32 %v2680_v4, %v2774_v30  ;;  %v687_v26 = vmul.f32 %v2682_v18, %v2774_v30  ;;  %v466_v55 = vmul.f32 %v2615_v45, %v2523_v3 }
 0x12a   :  { %v129_v5 = vrot.slane %v128_v13, 2  ;;  %v136_v16 = vrot.slane %v135_v11, 2 }
 0x12b   :  { %v2780_v50 = vadd.f32 %v686_v8, %v522_v12  ;;  %v2782_v31 = vadd.f32 %v687_v26, %v523_v42  ;;  %v467_v12 = vmul.f32 %v2617_v46, %v2523_v3  ;;  %v115_v26 = vrot.slane %v114_v58, 2 }
 0x12c   :  { %v2784_v36 = vpop.permute.xlu0 %591  ;;  %v122_v42 = vrot.slane %v121_v56, 2  ;;  %v530_v41 = vadd.f32 %v466_v55, %v302_v34  ;;  %v130_v45 = vadd.f32 %v129_v5, %v128_v13  ;;  %v2808_v34 = vmul.f32 %v2680_v4, %v2531_v9 }
 0x12d   :  { %5221 = vst [vmem:[#allocation46_spill] sm:$0xff] %v2782_v31  ;;  %v531_v8 = vadd.f32 %v467_v12, %v303_v63  ;;  %v116_v35 = vadd.f32 %v115_v26, %v114_v58  ;;  %v137_v31 = vadd.f32 %v136_v16, %v135_v11  ;;  %v2812_v63 = vmul.f32 %v2682_v18, %v2531_v9 }
 0x12e   :  { %v123_v14 = vadd.f32 %v122_v42, %v121_v56  ;;  %5222 = vst [vmem:[#allocation47_spill] sm:$0xff] %v2808_v34  ;;  %v2816_v55 = vmul.f32 %v2684_v51, %v2531_v9  ;;  %v53_v58 = vmul.f32 %v2486_v60, %v2486_v60  ;;  %v869_v56 = vrot.slane %v2596_v17, %v2712_v6 }
 0x12f   :  { %5223 = vst [vmem:[#allocation48_spill] sm:$0xff] %v2812_v63  ;;  %v5225_v13 = vsub.s32 7, %v2579_v15  ;;  %v117_v12 = vrot.slane %v116_v35, 1  ;;  %v131_v5 = vrot.slane %v130_v45, 1  ;;  %v138_v16 = vrot.slane %v137_v31, 1 }
 0x130   :  { %v2794_v22 = vpop.permute.xlu0 %595  ;;  %5224 = vst [vmem:[#allocation49_spill] sm:$0xff] %v2816_v55  ;;  %v124_v26 = vrot.slane %v123_v14, 1  ;;  %v2833_v60 = vmul.f32 %v2686_v29, %v2531_v9  ;;  %v100_v9 = vsel %vm54_vm0, %v53_v58, 0.0  ;;  %v2855_v63 = vrot.slane %v869_v56, %v2712_v6 }
 0x131   :  { %v694_v25 = vmul.f32 %v2680_v4, %v2794_v22  ;;  %v695_v33 = vmul.f32 %v2682_v18, %v2794_v22  ;;  %v873_v11 = vrot.slane %v2596_v17, %v5225_v13  ;;  %v453_v17 = vmul.f32 %v2621_v48, %v2514_v1 }
 0x132   :  { %5226 = vst [vmem:[#allocation50_spill] sm:$0xff] %v2833_v60  ;;  %v461_v13 = vmul.f32 %v2621_v48, %v2518_v2  ;;  %v468_v60 = vmul.f32 %v2619_v47, %v2523_v3  ;;  %5229 = vst [vmem:[#allocation53_spill] sm:$0xff] %v2855_v63  ;;  %v2868_v58 = vadd.f32 %v138_v16, %v137_v31 }
 0x133   :  { %v2800_v37 = vadd.f32 %v694_v25, %v530_v41  ;;  %v2802_v44 = vadd.f32 %v695_v33, %v531_v8  ;;  %v452_v25 = vmul.f32 %v2619_v47, %v2514_v1  ;;  %v460_v33 = vmul.f32 %v2619_v47, %v2518_v2 }
 0x134   :  { %v2804_v46 = vpop.permute.xlu0 %599  ;;  %v469_v1 = vmul.f32 %v2621_v48, %v2523_v3  ;;  %v2858_v34 = vrot.slane %v873_v11, %v2712_v6  ;;  %v2876_v3 = vmul.f32 %v2630_v53, %v2551_v21  ;;  %v2880_v6 = vmul.f32 %v2632_v54, %v2551_v21 }
 0x135   :  { %v2892_v31 = vmul.f32 %v2630_v53, %v2556_v23  ;;  %v289_v56 = vmul.f32 %v2634_v57, %v2564_v10  ;;  %v2900_v11 = vmul.f32 %v2632_v54, %v2556_v23  ;;  %v2922_v16 = vmul.f32 %v2634_v57, %v2651_v38 }
 0x136   :  { %5230 = vst [vmem:[#allocation54_spill] sm:$0xff] %v2858_v34 }
 0x137   :  { %5234 = vst [vmem:[#allocation58_spill] sm:$0xff] %v2922_v16  ;;  %v2942_v16 = vmul.f32 %v2632_v54, %v2559_v24 }
 0x138   :  { %v2825_v42 = vpop.permute.xlu0 %603 }
 0x139   :  { %v702_v41 = vmul.f32 %v2680_v4, %v2825_v42  ;;  %v703_v8 = vmul.f32 %v2682_v18, %v2825_v42  ;;  %5237 = vst [vmem:[#allocation61_spill] sm:$0xff] %v2942_v16  ;;  %v2962_v16 = vmul.f32 %v2634_v57, %v2570_v27 }
 0x13b   :  { %v2844_v15 = vadd.f32 %v702_v41, %v2653_v39  ;;  %v2847_v55 = vadd.f32 %v703_v8, %v2655_v7  ;;  %v2862_v39 = vadd.f32 %v117_v12, %v116_v35  ;;  %v2864_v7 = vadd.f32 %v124_v26, %v123_v14  ;;  %5242 = vst [vmem:[#allocation66_spill] sm:$0xff] %v2962_v16 }
 0x13c   :  { %v2860_v2 = vpop.permute.xlu0 %607  ;;  %v2866_v41 = vadd.f32 %v131_v5, %v130_v45  ;;  %v2872_v8 = vmul.f32 %v2628_v52, %v2551_v21  ;;  %v2884_v35 = vmul.f32 %v2634_v57, %v2551_v21  ;;  %v2888_v45 = vmul.f32 %v2628_v52, %v2556_v23 }
 0x13d   :  { %5227 = vst [vmem:[#allocation51_spill] sm:$0xff] %v2844_v15  ;;  %5228 = vst [vmem:[#allocation52_spill] sm:$0xff] %v2847_v55  ;;  %v288_v14 = vmul.f32 %v2632_v54, %v2564_v10  ;;  %v2904_v21 = vmul.f32 %v2634_v57, %v2556_v23  ;;  %v2908_v12 = vmul.f32 %v2628_v52, %v2651_v38 }
 0x13e   :  { %101 = vadd.xlane.f32.xlu1 %v100_v9  ;;  %v2912_v26 = vmul.f32 %v2630_v53, %v2651_v38  ;;  %v2918_v10 = vmul.f32 %v2632_v54, %v2651_v38  ;;  %v296_v23 = vmul.f32 %v2632_v54, %v2574_v28  ;;  %v297_v9 = vmul.f32 %v2634_v57, %v2574_v28 }
 0x13f   :  { %5231 = vst [vmem:[#allocation55_spill] sm:$0xff] %v2908_v12  ;;  %v2930_v12 = vmul.f32 %v2628_v52, %v2559_v24  ;;  %v305_v38 = vmul.f32 %v2634_v57, %v2607_v40  ;;  %v2946_v28 = vmul.f32 %v2634_v57, %v2559_v24  ;;  %v516_v55 = vadd.f32 %v452_v25, %v288_v14 }
 0x140   :  { %5232 = vst [vmem:[#allocation56_spill] sm:$0xff] %v2912_v26  ;;  %v2914_v5 = vpop.permute.xlu0 %615  ;;  %5233 = vst [vmem:[#allocation57_spill] sm:$0xff] %v2918_v10  ;;  %v2934_v26 = vmul.f32 %v2630_v53, %v2559_v24  ;;  %v304_v10 = vmul.f32 %v2632_v54, %v2607_v40  ;;  %v2950_v15 = vmul.f32 %v2628_v52, %v2570_v27 }
 0x141   :  { %5235 = vst [vmem:[#allocation59_spill] sm:$0xff] %v2930_v12  ;;  %5238 = vst [vmem:[#allocation62_spill] sm:$0xff] %v2946_v28  ;;  %v517_v12 = vadd.f32 %v453_v17, %v289_v56  ;;  %v2958_v40 = vmul.f32 %v2632_v54, %v2570_v27  ;;  %v2966_v25 = vadd.f32 %v460_v33, %v296_v23 }
 0x142   :  { %5236 = vst [vmem:[#allocation60_spill] sm:$0xff] %v2934_v26  ;;  %5239 = vst [vmem:[#allocation63_spill] sm:$0xff] %v2950_v15  ;;  %v2954_v26 = vmul.f32 %v2630_v53, %v2570_v27  ;;  %v2968_v17 = vadd.f32 %v461_v13, %v297_v9  ;;  %v2972_v14 = vmul.f32 %v2628_v52, %v2585_v32 }
 0x143   :  { %5241 = vst [vmem:[#allocation65_spill] sm:$0xff] %v2958_v40  ;;  %v2976_v56 = vmul.f32 %v2630_v53, %v2585_v32  ;;  %v2980_v40 = vmul.f32 %v2632_v54, %v2585_v32  ;;  %v2984_v27 = vmul.f32 %v2634_v57, %v2585_v32  ;;  %v2986_v33 = vadd.f32 %v468_v60, %v304_v10 }
 0x144   :  { %5240 = vst [vmem:[#allocation64_spill] sm:$0xff] %v2954_v26  ;;  %v2964_v24 = vpop.permute.xlu0 %627  ;;  %5244 = vst [vmem:[#allocation68_spill] sm:$0xff] %v2972_v14  ;;  %v2988_v13 = vadd.f32 %v469_v1, %v305_v38  ;;  %v2992_v23 = vmul.f32 %v2628_v52, %v2623_v49  ;;  %v2996_v9 = vmul.f32 %v2630_v53, %v2623_v49  ;;  %v5282_v26 = vld [vmem:[#allocation45_spill] sm:$0xff] }
 0x145   :  { %5243 = vst [vmem:[#allocation67_spill] sm:$0xff] %v2964_v24  ;;  %5245 = vst [vmem:[#allocation69_spill] sm:$0xff] %v2976_v56  ;;  %v3000_v24 = vmul.f32 %v2632_v54, %v2623_v49  ;;  %v3004_v32 = vmul.f32 %v2634_v57, %v2623_v49  ;;  %v3008_v60 = vmul.f32 %v2628_v52, %v2661_v43 }
 0x146   :  { %5246 = vst [vmem:[#allocation70_spill] sm:$0xff] %v2980_v40  ;;  %5247 = vst [vmem:[#allocation71_spill] sm:$0xff] %v2984_v27  ;;  %v3012_v1 = vmul.f32 %v2630_v53, %v2661_v43  ;;  %v940_v10 = vmul.f32 %v2855_v63, %v2758_v0  ;;  %v941_v38 = vmul.f32 %v2858_v34, %v2758_v0  ;;  %v5276_v40 = vld [vmem:[#allocation44_spill] sm:$0xff] }
 0x147   :  { %5248 = vst [vmem:[#allocation72_spill] sm:$0xff] %v2992_v23  ;;  %5249 = vst [vmem:[#allocation73_spill] sm:$0xff] %v2996_v9  ;;  %v3018_v9 = vpop.permute.xlu1 %228  ;;  %v3022_v49 = vmul.f32 %v2632_v54, %v2661_v43  ;;  %v3040_v0 = vmul.f32 %v2632_v54, %v2693_v19  ;;  %v3132_v15 = vmul.f32 %v2680_v4, %v5282_v26 }
 0x148   :  { %5250 = vst [vmem:[#allocation74_spill] sm:$0xff] %v3000_v24  ;;  %5251 = vst [vmem:[#allocation75_spill] sm:$0xff] %v3004_v32  ;;  %v3026_v32 = vmul.f32 %v2634_v57, %v2661_v43  ;;  %v3048_v43 = vmul.f32 %v2628_v52, %v2700_v59 }
 0x149   :  { %5252 = vst [vmem:[#allocation76_spill] sm:$0xff] %v3008_v60  ;;  %5253 = vst [vmem:[#allocation77_spill] sm:$0xff] %v3012_v1  ;;  %v3030_v60 = vmul.f32 %v2628_v52, %v2693_v19  ;;  %v3034_v1 = vmul.f32 %v2630_v53, %v2693_v19  ;;  %v3036_v24 = vpop.permute.xlu0 %795  ;;  %v3068_v52 = vmul.f32 %v2682_v18, %v2703_v62 }
 0x14a   :  { %5254 = vst [vmem:[#allocation78_spill] sm:$0xff] %v3018_v9  ;;  %5255 = vst [vmem:[#allocation79_spill] sm:$0xff] %v3022_v49  ;;  %v3044_v9 = vmul.f32 %v2634_v57, %v2693_v19  ;;  %v3064_v19 = vmul.f32 %v2680_v4, %v2703_v62 }
 0x14b   :  { %5256 = vst [vmem:[#allocation80_spill] sm:$0xff] %v3026_v32  ;;  %5257 = vst [vmem:[#allocation81_spill] sm:$0xff] %v3030_v60  ;;  %v3052_v60 = vmul.f32 %v2630_v53, %v2700_v59  ;;  %v3060_v32 = vmul.f32 %v2634_v57, %v2700_v59  ;;  %v5267_v57 = vld [vmem:[#allocation37_spill] sm:$0xff]  ;;  %v3110_v14 = vpop.permute.xlu1 %619 }
 0x14c   :  { %5258 = vst [vmem:[#allocation82_spill] sm:$0xff] %v3034_v1  ;;  %5259 = vst [vmem:[#allocation83_spill] sm:$0xff] %v3040_v0  ;;  %v3056_v1 = vmul.f32 %v2632_v54, %v2700_v59  ;;  %v5266_v59 = vld [vmem:[#allocation36_spill] sm:$0xff]  ;;  %v3082_v53 = vmul.f32 %v2680_v4, %v5267_v57  ;;  %v5270_v0 = vld [vmem:[#allocation39_spill] sm:$0xff] }
 0x14d   :  { %5260 = vst [vmem:[#allocation84_spill] sm:$0xff] %v3044_v9  ;;  %5261 = vst [vmem:[#allocation85_spill] sm:$0xff] %v3048_v43  ;;  %v3072_v43 = vmul.f32 %v2684_v51, %v2703_v62  ;;  %v3086_v9 = vmul.f32 %v2682_v18, %v5267_v57  ;;  %v680_v49 = vmul.f32 %v2684_v51, %v5270_v0 }
 0x14e   :  { %5262 = vst [vmem:[#allocation86_spill] sm:$0xff] %v3052_v60  ;;  %5263 = vst [vmem:[#allocation87_spill] sm:$0xff] %v3056_v1  ;;  %v3076_v60 = vmul.f32 %v2686_v29, %v2703_v62  ;;  %v5265_v1 = vld [vmem:[#allocation35_spill] sm:$0xff]  ;;  %v681_v23 = vmul.f32 %v2686_v29, %v5270_v0  ;;  %v3092_v62 = vpop.permute.xlu0 %799  ;;  %v5279_v0 = vld [vmem:[#allocation12_spill] sm:$0xff] }
 0x14f   :  { %5264 = vst [vmem:[#allocation88_spill] sm:$0xff] %v3060_v32  ;;  %v1004_v54 = vadd.f32 %v940_v10, %v5265_v1  ;;  %v1005_v32 = vadd.f32 %v941_v38, %v5266_v59  ;;  %5268 = vst [vmem:[#allocation35_spill] sm:$0xff] %v3082_v53  ;;  %v3096_v1 = vmul.f32 %v2684_v51, %v5267_v57  ;;  %v5273_v38 = vld [vmem:[#allocation40_spill] sm:$0xff]  ;;  %v5274_v59 = vld [vmem:[#allocation43_spill] sm:$0xff] }
 0x150   :  { %5269 = vst [vmem:[#allocation36_spill] sm:$0xff] %v3086_v9  ;;  %v3100_v10 = vmul.f32 %v2686_v29, %v5267_v57  ;;  %v3104_v27 = vmul.f32 %v5274_v59, %v5273_v38  ;;  %v3108_v56 = vmul.f32 %v5276_v40, %v5273_v38  ;;  %5278 = vst [vmem:[#allocation90_spill] sm:$0xff] %v3110_v14 }
 0x151   :  { %5271 = vst [vmem:[#allocation37_spill] sm:$0xff] %v3096_v1  ;;  %v1066_v9 = vadd.f32 %v2770_v61, %v5279_v0  ;;  %v1067_v1 = vadd.f32 %v2772_v20, %v5279_v0  ;;  %v688_v57 = vmul.f32 %v2684_v51, %v2774_v30  ;;  %v1068_v53 = vadd.f32 %v1004_v54, %v5279_v0 }
 0x152   :  { %5272 = vst [vmem:[#allocation39_spill] sm:$0xff] %v3100_v10  ;;  %5275 = vst [vmem:[#allocation40_spill] sm:$0xff] %v3104_v27  ;;  %v689_v10 = vmul.f32 %v2686_v29, %v2774_v30  ;;  %v3122_v27 = vmul.f32 %v2855_v63, %v5273_v38  ;;  %v1069_v61 = vadd.f32 %v1005_v32, %v5279_v0  ;;  %v3138_v28 = vpop.permute.xlu0 %803 }
 0x153   :  { %5277 = vst [vmem:[#allocation89_spill] sm:$0xff] %v3108_v56  ;;  %v3126_v56 = vmul.f32 %v2858_v34, %v5273_v38  ;;  %v744_v16 = vadd.f32 %v680_v49, %v516_v55  ;;  %v745_v20 = vadd.f32 %v681_v23, %v517_v12  ;;  %v3136_v30 = vmul.f32 %v2682_v18, %v5282_v26 }
 0x154   :  { %5280 = vst [vmem:[#allocation12_spill] sm:$0xff] %v3122_v27  ;;  %v3142_v38 = vmul.f32 %v2684_v51, %v5282_v26  ;;  %v3146_v54 = vmul.f32 %v2686_v29, %v5282_v26  ;;  %v696_v55 = vmul.f32 %v2684_v51, %v2794_v22  ;;  %v697_v12 = vmul.f32 %v2686_v29, %v2794_v22 }
 0x155   :  { %5281 = vst [vmem:[#allocation91_spill] sm:$0xff] %v3126_v56  ;;  %v3153_v23 = vadd.f32 %v1066_v9, %v2862_v39  ;;  %v3156_v32 = vadd.f32 %v1067_v1, %v2864_v7  ;;  %v752_v49 = vadd.f32 %v688_v57, %v2966_v25  ;;  %v753_v0 = vadd.f32 %v689_v10, %v2968_v17  ;;  %v3174_v9 = vpop.permute.xlu1 %843 }
 0x156   :  { %5283 = vst [vmem:[#allocation45_spill] sm:$0xff] %v3142_v38  ;;  %5284 = vst [vmem:[#allocation92_spill] sm:$0xff] %v3146_v54  ;;  %v3161_v56 = vadd.f32 %v1068_v53, %v2866_v41  ;;  %v3164_v26 = vadd.f32 %v1069_v61, %v2868_v58  ;;  %v3168_v27 = vmul.f32 %v2680_v4, %v2784_v36  ;;  %v808_v10 = vpop.permute.xlu0 %807 }
 0x157   :  { %5285 = vst [vmem:[#allocation93_spill] sm:$0xff] %v3153_v23  ;;  %5286 = vst [vmem:[#allocation94_spill] sm:$0xff] %v3156_v32  ;;  %v3172_v22 = vmul.f32 %v2682_v18, %v2784_v36  ;;  %v3178_v25 = vmul.f32 %v2684_v51, %v2784_v36  ;;  %v3182_v53 = vmul.f32 %v2686_v29, %v2784_v36 }
 0x158   :  { %5287 = vst [vmem:[#allocation95_spill] sm:$0xff] %v3161_v56  ;;  %5288 = vst [vmem:[#allocation96_spill] sm:$0xff] %v3164_v26  ;;  %v704_v17 = vmul.f32 %v2684_v51, %v2825_v42  ;;  %v705_v1 = vmul.f32 %v2686_v29, %v2825_v42  ;;  %v3190_v57 = vmul.f32 %v2680_v4, %v3110_v14 }
 0x159   :  { %5289 = vst [vmem:[#allocation97_spill] sm:$0xff] %v3168_v27  ;;  %5290 = vst [vmem:[#allocation98_spill] sm:$0xff] %v3172_v22  ;;  %v3194_v61 = vmul.f32 %v2682_v18, %v3110_v14  ;;  %v3197_v26 = vadd.f32 %v696_v55, %v2986_v33  ;;  %v3200_v36 = vadd.f32 %v697_v12, %v2988_v13  ;;  %v5302_v14 = vld [vmem:[#allocation29_spill] sm:$0xff] }
 0x15a   :  { %5291 = vst [vmem:[#allocation99_spill] sm:$0xff] %v3174_v9  ;;  %5292 = vst [vmem:[#allocation100_spill] sm:$0xff] %v3178_v25  ;;  %v3204_v56 = vmul.f32 %v5274_v59, %v3174_v9  ;;  %v3208_v42 = vmul.f32 %v5276_v40, %v3174_v9  ;;  %v3212_v32 = vmul.f32 %v2680_v4, %v2804_v46 }
 0x15b   :  { %5293 = vst [vmem:[#allocation101_spill] sm:$0xff] %v3182_v53  ;;  %5294 = vst [vmem:[#allocation102_spill] sm:$0xff] %v3190_v57  ;;  %v3216_v23 = vmul.f32 %v2682_v18, %v2804_v46  ;;  %v906_v33 = vmul.f32 %v5274_v59, %v808_v10  ;;  %v907_v13 = vmul.f32 %v5276_v40, %v808_v10  ;;  %v5315_v53 = vld [vmem:[#allocation46_spill] sm:$0xff] }
 0x15c   :  { %5295 = vst [vmem:[#allocation103_spill] sm:$0xff] %v3194_v61  ;;  %5296 = vst [vmem:[#allocation104_spill] sm:$0xff] %v3204_v56  ;;  %v908_v55 = vmul.f32 %v2855_v63, %v808_v10  ;;  %v909_v12 = vmul.f32 %v2858_v34, %v808_v10  ;;  %v3224_v61 = vmul.f32 %v2684_v51, %v2804_v46  ;;  %v5303_v56 = vld [vmem:[#allocation30_spill] sm:$0xff] }
 0x15d   :  { %5297 = vst [vmem:[#allocation105_spill] sm:$0xff] %v3208_v42  ;;  %5298 = vst [vmem:[#allocation106_spill] sm:$0xff] %v3212_v32  ;;  %v3228_v57 = vmul.f32 %v2686_v29, %v2804_v46  ;;  %v3231_v42 = vadd.f32 %v704_v17, %v5302_v14  ;;  %v3234_v9 = vadd.f32 %v705_v1, %v5303_v56 }
 0x15e   :  { %5299 = vst [vmem:[#allocation107_spill] sm:$0xff] %v3216_v23  ;;  %5300 = vst [vmem:[#allocation108_spill] sm:$0xff] %v3224_v61  ;;  %v812_v23 = vpop.permute.xlu0 %811  ;;  %v3238_v32 = vmul.f32 %v2680_v4, %v2860_v2  ;;  %v3242_v10 = vmul.f32 %v2682_v18, %v2860_v2  ;;  %v3246_v61 = vmul.f32 %v2684_v51, %v2860_v2 }
 0x15f   :  { %5301 = vst [vmem:[#allocation109_spill] sm:$0xff] %v3228_v57  ;;  %v3250_v46 = vmul.f32 %v2686_v29, %v2860_v2  ;;  %v3254_v14 = vmul.f32 %v2680_v4, %v2914_v5  ;;  %v3258_v56 = vmul.f32 %v2682_v18, %v2914_v5  ;;  %v3262_v17 = vmul.f32 %v2684_v51, %v2914_v5  ;;  %v5313_v2 = vld [vmem:[#allocation42_spill] sm:$0xff] }
 0x160   :  { %5304 = vst [vmem:[#allocation29_spill] sm:$0xff] %v3238_v32  ;;  %5305 = vst [vmem:[#allocation30_spill] sm:$0xff] %v3242_v10  ;;  %v3266_v1 = vmul.f32 %v2686_v29, %v2914_v5  ;;  %v972_v32 = vadd.f32 %v908_v55, %v744_v16  ;;  %v973_v57 = vadd.f32 %v909_v12, %v745_v20  ;;  %v5314_v29 = vld [vmem:[#allocation13_spill] sm:$0xff] }
 0x161   :  { %5306 = vst [vmem:[#allocation110_spill] sm:$0xff] %v3246_v61  ;;  %5307 = vst [vmem:[#allocation111_spill] sm:$0xff] %v3250_v46  ;;  %v5312_v61 = vld [vmem:[#allocation41_spill] sm:$0xff]  ;;  %v971_v46 = vadd.f32 %v907_v13, %v5313_v2  ;;  %v3272_v4 = vmul.f32 %v5274_v59, %v3036_v24  ;;  %v3276_v18 = vmul.f32 %v5276_v40, %v3036_v24 }
 0x162   :  { %5308 = vst [vmem:[#allocation112_spill] sm:$0xff] %v3254_v14  ;;  %5309 = vst [vmem:[#allocation113_spill] sm:$0xff] %v3258_v56  ;;  %v970_v10 = vadd.f32 %v906_v33, %v5312_v61  ;;  %v3280_v51 = vmul.f32 %v2855_v63, %v3036_v24  ;;  %v3284_v5 = vmul.f32 %v2858_v34, %v3036_v24  ;;  %v816_v61 = vpop.permute.xlu0 %815 }
 0x163   :  { %5310 = vst [vmem:[#allocation114_spill] sm:$0xff] %v3262_v17  ;;  %5311 = vst [vmem:[#allocation115_spill] sm:$0xff] %v3266_v1  ;;  %v914_v16 = vmul.f32 %v5274_v59, %v816_v61  ;;  %v915_v20 = vmul.f32 %v5276_v40, %v816_v61  ;;  %v916_v33 = vmul.f32 %v2855_v63, %v816_v61 }
 0x164   :  { %v917_v13 = vmul.f32 %v2858_v34, %v816_v61  ;;  %v3292_v55 = vmul.f32 %v5274_v59, %v3092_v62  ;;  %v3296_v12 = vmul.f32 %v5276_v40, %v3092_v62  ;;  %v3300_v24 = vmul.f32 %v2855_v63, %v3092_v62 }
 0x165   :  { %v3304_v2 = vmul.f32 %v2858_v34, %v3092_v62  ;;  %v1034_v1 = vadd.f32 %v970_v10, %v5314_v29  ;;  %v1035_v61 = vadd.f32 %v971_v46, %v5314_v29  ;;  %v1036_v17 = vadd.f32 %v972_v32, %v5314_v29 }
 0x166   :  { %v1037_v56 = vadd.f32 %v973_v57, %v5314_v29  ;;  %v978_v14 = vadd.f32 %v914_v16, %v2780_v50  ;;  %v979_v25 = vadd.f32 %v915_v20, %v5315_v53  ;;  %v980_v22 = vadd.f32 %v916_v33, %v752_v49  ;;  %v820_v54 = vpop.permute.xlu0 %819  ;;  %v5320_v16 = vld [vmem:[#allocation16_spill] sm:$0xff] }
 0x167   :  { %v981_v27 = vadd.f32 %v917_v13, %v753_v0  ;;  %v3314_v38 = vmul.f32 %v5274_v59, %v3138_v28  ;;  %v3318_v62 = vmul.f32 %v5276_v40, %v3138_v28  ;;  %v3322_v32 = vmul.f32 %v2855_v63, %v3138_v28 }
 0x168   :  { %v3326_v29 = vmul.f32 %v2858_v34, %v3138_v28  ;;  %v3329_v50 = vmul.f32 %v5274_v59, %v812_v23  ;;  %v3332_v49 = vmul.f32 %v5276_v40, %v812_v23  ;;  %v3335_v0 = vmul.f32 %v2855_v63, %v812_v23 }
 0x169   :  { %v3338_v53 = vmul.f32 %v2858_v34, %v812_v23  ;;  %v3341_v57 = vadd.f32 %v1034_v1, %v2862_v39  ;;  %v3344_v10 = vadd.f32 %v1035_v61, %v2864_v7  ;;  %v3347_v28 = vadd.f32 %v1036_v17, %v2866_v41 }
 0x16a   :  { %v3350_v46 = vadd.f32 %v1037_v56, %v2868_v58  ;;  %v1042_v20 = vadd.f32 %v978_v14, %v5320_v16  ;;  %v1043_v33 = vadd.f32 %v979_v25, %v5320_v16  ;;  %v1044_v13 = vadd.f32 %v980_v22, %v5320_v16  ;;  %v824_v1 = vpop.permute.xlu0 %823 }
 0x16b   :  { %5316 = vst [vmem:[#allocation41_spill] sm:$0xff] %v3338_v53  ;;  %5317 = vst [vmem:[#allocation42_spill] sm:$0xff] %v3344_v10  ;;  %v1045_v23 = vadd.f32 %v981_v27, %v5320_v16  ;;  %v3356_v53 = vpop.xlane.xlu1 %98  ;;  %v922_v61 = vmul.f32 %v5274_v59, %v824_v1  ;;  %v923_v10 = vmul.f32 %v5276_v40, %v824_v1 }
 0x16c   :  { %5318 = vst [vmem:[#allocation13_spill] sm:$0xff] %v3347_v28  ;;  %5319 = vst [vmem:[#allocation46_spill] sm:$0xff] %v3350_v46  ;;  %v924_v17 = vmul.f32 %v2855_v63, %v824_v1  ;;  %v925_v56 = vmul.f32 %v2858_v34, %v824_v1  ;;  %v3363_v46 = vmul.f32 %v5274_v59, %v820_v54 }
 0x16d   :  { %5321 = vst [vmem:[#allocation16_spill] sm:$0xff] %v3356_v53  ;;  %v3366_v25 = vmul.f32 %v5276_v40, %v820_v54  ;;  %v3369_v22 = vmul.f32 %v2855_v63, %v820_v54  ;;  %v3372_v27 = vmul.f32 %v2858_v34, %v820_v54  ;;  %v986_v14 = vadd.f32 %v922_v61, %v2800_v37  ;;  %v5330_v37 = vld [vmem:[#allocation18_spill] sm:$0xff] }
 0x16e   :  { %5322 = vst [vmem:[#allocation116_spill] sm:$0xff] %v3363_v46  ;;  %v987_v16 = vadd.f32 %v923_v10, %v2802_v44  ;;  %v988_v53 = vadd.f32 %v924_v17, %v3197_v26  ;;  %v989_v1 = vadd.f32 %v925_v56, %v3200_v36  ;;  %v3379_v28 = vadd.f32 %v1042_v20, %v2862_v39  ;;  %v5331_v10 = vld [vmem:[#allocation22_spill] sm:$0xff]  ;;  %v5332_v17 = vld [vmem:[#allocation23_spill] sm:$0xff] }
 0x16f   :  { %5323 = vst [vmem:[#allocation117_spill] sm:$0xff] %v3366_v25  ;;  %5324 = vst [vmem:[#allocation118_spill] sm:$0xff] %v3369_v22  ;;  %v3382_v46 = vadd.f32 %v1043_v33, %v2864_v7  ;;  %v3385_v25 = vadd.f32 %v1044_v13, %v2866_v41  ;;  %v3388_v54 = vadd.f32 %v1045_v23, %v2868_v58 }
 0x170   :  { %5325 = vst [vmem:[#allocation119_spill] sm:$0xff] %v3372_v27  ;;  %5326 = vst [vmem:[#allocation120_spill] sm:$0xff] %v3379_v28  ;;  %v340_v27 = vpop.permute.xlu1 %339  ;;  %v1050_v61 = vadd.f32 %v986_v14, %v5330_v37  ;;  %v1051_v44 = vadd.f32 %v987_v16, %v5330_v37  ;;  %v1052_v26 = vadd.f32 %v988_v53, %v5330_v37 }
 0x171   :  { %5327 = vst [vmem:[#allocation121_spill] sm:$0xff] %v3382_v46  ;;  %5328 = vst [vmem:[#allocation122_spill] sm:$0xff] %v3385_v25  ;;  %v1053_v36 = vadd.f32 %v989_v1, %v5330_v37  ;;  %v438_v20 = vmul.f32 %v5331_v10, %v340_v27  ;;  %v439_v33 = vmul.f32 %v5332_v17, %v340_v27 }
 0x172   :  { %5329 = vst [vmem:[#allocation123_spill] sm:$0xff] %v3388_v54  ;;  %v440_v56 = vmul.f32 %v2619_v47, %v340_v27  ;;  %v441_v13 = vmul.f32 %v2621_v48, %v340_v27  ;;  %v3399_v23 = vadd.f32 %v1050_v61, %v2862_v39  ;;  %v3402_v22 = vadd.f32 %v1051_v44, %v2864_v7  ;;  %v828_v54 = vpop.permute.xlu0 %827 }
 0x173   :  { %v3405_v14 = vadd.f32 %v1052_v26, %v2866_v41  ;;  %v3408_v53 = vadd.f32 %v1053_v36, %v2868_v58  ;;  %v502_v16 = vadd.f32 %v438_v20, %v2872_v8  ;;  %v503_v1 = vadd.f32 %v439_v33, %v2876_v3 }
 0x174   :  { %5333 = vst [vmem:[#allocation18_spill] sm:$0xff] %v3399_v23  ;;  %5334 = vst [vmem:[#allocation22_spill] sm:$0xff] %v3402_v22  ;;  %v504_v37 = vadd.f32 %v440_v56, %v2880_v6  ;;  %v505_v27 = vadd.f32 %v441_v13, %v2884_v35  ;;  %v344_v61 = vpop.permute.xlu1 %343  ;;  %v3415_v23 = vmul.f32 %v5274_v59, %v828_v54 }
 0x175   :  { %5335 = vst [vmem:[#allocation23_spill] sm:$0xff] %v3405_v14  ;;  %5336 = vst [vmem:[#allocation124_spill] sm:$0xff] %v3408_v53  ;;  %v3418_v44 = vmul.f32 %v5276_v40, %v828_v54  ;;  %v3421_v26 = vmul.f32 %v2855_v63, %v828_v54  ;;  %v3424_v36 = vmul.f32 %v2858_v34, %v828_v54 }
 0x176   :  { %v730_v8 = vadd.f32 %v3064_v19, %v502_v16  ;;  %v731_v3 = vadd.f32 %v3068_v52, %v503_v1  ;;  %v732_v6 = vadd.f32 %v3072_v43, %v504_v37  ;;  %v733_v35 = vadd.f32 %v3076_v60, %v505_v27  ;;  %v5337_v37 = vld [vmem:[#allocation9_spill] sm:$0xff] }
 0x177   :  { %v442_v20 = vmul.f32 %v5331_v10, %v344_v61  ;;  %v443_v33 = vmul.f32 %v5332_v17, %v344_v61  ;;  %v444_v56 = vmul.f32 %v2619_v47, %v344_v61  ;;  %v445_v13 = vmul.f32 %v2621_v48, %v344_v61 }
 0x178   :  { %v958_v53 = vadd.f32 %v3272_v4, %v730_v8  ;;  %v959_v54 = vadd.f32 %v3276_v18, %v731_v3  ;;  %v960_v19 = vadd.f32 %v3280_v51, %v732_v6  ;;  %v961_v52 = vadd.f32 %v3284_v5, %v733_v35  ;;  %v5338_v8 = vld [vmem:[#allocation47_spill] sm:$0xff]  ;;  %v5339_v3 = vld [vmem:[#allocation48_spill] sm:$0xff]  ;;  %v5340_v6 = vld [vmem:[#allocation49_spill] sm:$0xff] }
 0x179   :  { %v506_v43 = vadd.f32 %v442_v20, %v2888_v45  ;;  %v507_v60 = vadd.f32 %v443_v33, %v2892_v31  ;;  %v508_v16 = vadd.f32 %v444_v56, %v2900_v11  ;;  %v509_v1 = vadd.f32 %v445_v13, %v2904_v21  ;;  %v5341_v35 = vld [vmem:[#allocation50_spill] sm:$0xff]  ;;  %v832_v20 = vpop.permute.xlu0 %831 }
 0x17a   :  { %v1022_v27 = vadd.f32 %v958_v53, %v5337_v37  ;;  %v1023_v61 = vadd.f32 %v959_v54, %v5337_v37  ;;  %v1024_v4 = vadd.f32 %v960_v19, %v5337_v37  ;;  %v1025_v18 = vadd.f32 %v961_v52, %v5337_v37  ;;  %v348_v52 = vpop.permute.xlu1 %347  ;;  %v5346_v37 = vld [vmem:[#allocation10_spill] sm:$0xff] }
 0x17b   :  { %v734_v51 = vadd.f32 %v5338_v8, %v506_v43  ;;  %v735_v5 = vadd.f32 %v5339_v3, %v507_v60  ;;  %v736_v45 = vadd.f32 %v5340_v6, %v508_v16  ;;  %v737_v31 = vadd.f32 %v5341_v35, %v509_v1  ;;  %v5353_v35 = vld [vmem:[#allocation21_spill] sm:$0xff] }
 0x17c   :  { %v3451_v11 = vadd.f32 %v1022_v27, %v2862_v39  ;;  %v3454_v21 = vadd.f32 %v1023_v61, %v2864_v7  ;;  %v3457_v53 = vadd.f32 %v1024_v4, %v2866_v41  ;;  %v3460_v33 = vadd.f32 %v1025_v18, %v2868_v58 }
 0x17d   :  { %v962_v56 = vadd.f32 %v3292_v55, %v734_v51  ;;  %v963_v13 = vadd.f32 %v3296_v12, %v735_v5  ;;  %v964_v54 = vadd.f32 %v3300_v24, %v736_v45  ;;  %v965_v19 = vadd.f32 %v3304_v2, %v737_v31  ;;  %v5347_v24 = vld [vmem:[#allocation51_spill] sm:$0xff]  ;;  %v5348_v2 = vld [vmem:[#allocation52_spill] sm:$0xff] }
 0x17e   :  { %5342 = vst [vmem:[#allocation9_spill] sm:$0xff] %v3451_v11  ;;  %5343 = vst [vmem:[#allocation47_spill] sm:$0xff] %v3454_v21  ;;  %v930_v43 = vmul.f32 %v5274_v59, %v832_v20  ;;  %v931_v60 = vmul.f32 %v5276_v40, %v832_v20  ;;  %v932_v16 = vmul.f32 %v2855_v63, %v832_v20  ;;  %v5366_v40 = vld [vmem:[#allocation35_spill] sm:$0xff]  ;;  %v5368_v63 = vld [vmem:[#allocation37_spill] sm:$0xff] }
 0x17f   :  { %5344 = vst [vmem:[#allocation48_spill] sm:$0xff] %v3457_v53  ;;  %5345 = vst [vmem:[#allocation49_spill] sm:$0xff] %v3460_v33  ;;  %v933_v1 = vmul.f32 %v2858_v34, %v832_v20  ;;  %v1026_v27 = vadd.f32 %v962_v56, %v5346_v37  ;;  %v1027_v61 = vadd.f32 %v963_v13, %v5346_v37  ;;  %v5367_v34 = vld [vmem:[#allocation36_spill] sm:$0xff] }
 0x180   :  { %v1028_v55 = vadd.f32 %v964_v54, %v5346_v37  ;;  %v1029_v12 = vadd.f32 %v965_v19, %v5346_v37  ;;  %v994_v4 = vadd.f32 %v930_v43, %v5347_v24  ;;  %v995_v18 = vadd.f32 %v931_v60, %v5348_v2  ;;  %v356_v43 = vpop.permute.xlu1 %355 }
 0x181   :  { %v996_v8 = vadd.f32 %v932_v16, %v3231_v42  ;;  %v997_v51 = vadd.f32 %v933_v1, %v3234_v9  ;;  %v3479_v3 = vadd.f32 %v1026_v27, %v2862_v39  ;;  %v3482_v5 = vadd.f32 %v1027_v61, %v2864_v7 }
 0x182   :  { %v3485_v6 = vadd.f32 %v1028_v55, %v2866_v41  ;;  %v3488_v45 = vadd.f32 %v1029_v12, %v2868_v58  ;;  %v1058_v31 = vadd.f32 %v994_v4, %v5353_v35  ;;  %v1059_v20 = vadd.f32 %v995_v18, %v5353_v35 }
 0x183   :  { %5349 = vst [vmem:[#allocation50_spill] sm:$0xff] %v3479_v3  ;;  %5350 = vst [vmem:[#allocation10_spill] sm:$0xff] %v3482_v5  ;;  %v1060_v42 = vadd.f32 %v996_v8, %v5353_v35  ;;  %v1061_v9 = vadd.f32 %v997_v51, %v5353_v35  ;;  %v1183_v56 = vmin.f32 %v3451_v11, %v3479_v3  ;;  %v5358_v8 = vld [vmem:[#allocation59_spill] sm:$0xff]  ;;  %v5359_v35 = vld [vmem:[#allocation60_spill] sm:$0xff] }
 0x184   :  { %5351 = vst [vmem:[#allocation51_spill] sm:$0xff] %v3485_v6  ;;  %5352 = vst [vmem:[#allocation52_spill] sm:$0xff] %v3488_v45  ;;  %v1204_v13 = vmin.f32 %v3454_v21, %v3482_v5  ;;  %v1225_v54 = vmin.f32 %v3457_v53, %v3485_v6  ;;  %v1246_v19 = vmin.f32 %v3460_v33, %v3488_v45  ;;  %v5362_v6 = vld [vmem:[#allocation63_spill] sm:$0xff]  ;;  %v5363_v53 = vld [vmem:[#allocation64_spill] sm:$0xff] }
 0x185   :  { %v3503_v60 = vadd.f32 %v1058_v31, %v2862_v39  ;;  %v3506_v16 = vadd.f32 %v1059_v20, %v2864_v7  ;;  %v3509_v1 = vadd.f32 %v1060_v42, %v2866_v41  ;;  %v3512_v37 = vadd.f32 %v1061_v9, %v2868_v58  ;;  %v5360_v20 = vld [vmem:[#allocation61_spill] sm:$0xff]  ;;  %v5361_v9 = vld [vmem:[#allocation62_spill] sm:$0xff] }
 0x186   :  { %v446_v27 = vmul.f32 %v5331_v10, %v348_v52  ;;  %v447_v61 = vmul.f32 %v5332_v17, %v348_v52  ;;  %v448_v55 = vmul.f32 %v2619_v47, %v348_v52  ;;  %v449_v12 = vmul.f32 %v2621_v48, %v348_v52  ;;  %v5364_v5 = vld [vmem:[#allocation65_spill] sm:$0xff]  ;;  %v5365_v21 = vld [vmem:[#allocation66_spill] sm:$0xff] }
 0x187   :  { %5354 = vst [vmem:[#allocation21_spill] sm:$0xff] %v3503_v60  ;;  %5355 = vst [vmem:[#allocation125_spill] sm:$0xff] %v3506_v16  ;;  %v454_v24 = vmul.f32 %v5331_v10, %v356_v43  ;;  %v455_v4 = vmul.f32 %v5332_v17, %v356_v43  ;;  %v456_v2 = vmul.f32 %v2619_v47, %v356_v43 }
 0x188   :  { %5356 = vst [vmem:[#allocation126_spill] sm:$0xff] %v3509_v1  ;;  %5357 = vst [vmem:[#allocation127_spill] sm:$0xff] %v3512_v37  ;;  %v457_v18 = vmul.f32 %v2621_v48, %v356_v43  ;;  %v510_v51 = vadd.f32 %v446_v27, %v5358_v8  ;;  %v511_v31 = vadd.f32 %v447_v61, %v5359_v35  ;;  %v5369_v8 = vld [vmem:[#allocation39_spill] sm:$0xff]  ;;  %v5370_v35 = vld [vmem:[#allocation45_spill] sm:$0xff] }
 0x189   :  { %v512_v42 = vadd.f32 %v448_v55, %v5360_v20  ;;  %v513_v45 = vadd.f32 %v449_v12, %v5361_v9  ;;  %v518_v33 = vadd.f32 %v454_v24, %v5362_v6  ;;  %v519_v52 = vadd.f32 %v455_v4, %v5363_v53  ;;  %v5371_v24 = vld [vmem:[#allocation92_spill] sm:$0xff]  ;;  %v5373_v4 = vld [vmem:[#allocation11_spill] sm:$0xff] }
 0x18a   :  { %v520_v3 = vadd.f32 %v456_v2, %v5364_v5  ;;  %v521_v11 = vadd.f32 %v457_v18, %v5365_v21  ;;  %v738_v59 = vadd.f32 %v5366_v40, %v510_v51  ;;  %v739_v43 = vadd.f32 %v5367_v34, %v511_v31  ;;  %v364_v31 = vpop.permute.xlu1 %363 }
 0x18b   :  { %v740_v27 = vadd.f32 %v5368_v63, %v512_v42  ;;  %v741_v61 = vadd.f32 %v5369_v8, %v513_v45  ;;  %v746_v55 = vadd.f32 %v3132_v15, %v518_v33  ;;  %v747_v12 = vadd.f32 %v3136_v30, %v519_v52  ;;  %v5372_v33 = vld [vmem:[#allocation41_spill] sm:$0xff] }
 0x18c   :  { %v748_v6 = vadd.f32 %v5370_v35, %v520_v3  ;;  %v749_v53 = vadd.f32 %v5371_v24, %v521_v11  ;;  %v966_v5 = vadd.f32 %v3314_v38, %v738_v59  ;;  %v967_v21 = vadd.f32 %v3318_v62, %v739_v43  ;;  %v5374_v62 = vld [vmem:[#allocation15_spill] sm:$0xff] }
 0x18d   :  { %v968_v40 = vadd.f32 %v3322_v32, %v740_v27  ;;  %v969_v34 = vadd.f32 %v3326_v29, %v741_v61  ;;  %v974_v63 = vadd.f32 %v3329_v50, %v746_v55  ;;  %v975_v45 = vadd.f32 %v3332_v49, %v747_v12 }
 0x18e   :  { %v976_v15 = vadd.f32 %v3335_v0, %v748_v6  ;;  %v977_v30 = vadd.f32 %v5372_v33, %v749_v53  ;;  %v1030_v3 = vadd.f32 %v966_v5, %v5373_v4  ;;  %v1031_v11 = vadd.f32 %v967_v21, %v5373_v4  ;;  %v5379_v53 = vld [vmem:[#allocation42_spill] sm:$0xff]  ;;  %v5380_v21 = vld [vmem:[#allocation13_spill] sm:$0xff]  ;;  %v5385_v33 = vld [vmem:[#allocation71_spill] sm:$0xff] }
 0x18f   :  { %v1032_v59 = vadd.f32 %v968_v40, %v5373_v4  ;;  %v1033_v38 = vadd.f32 %v969_v34, %v5373_v4  ;;  %v1038_v32 = vadd.f32 %v974_v63, %v5374_v62  ;;  %v1039_v29 = vadd.f32 %v975_v45, %v5374_v62  ;;  %v5381_v40 = vld [vmem:[#allocation46_spill] sm:$0xff]  ;;  %v5382_v34 = vld [vmem:[#allocation68_spill] sm:$0xff]  ;;  %v5383_v63 = vld [vmem:[#allocation69_spill] sm:$0xff] }
 0x190   :  { %v1040_v50 = vadd.f32 %v976_v15, %v5374_v62  ;;  %v1041_v49 = vadd.f32 %v977_v30, %v5374_v62  ;;  %v3555_v0 = vadd.f32 %v1030_v3, %v2862_v39  ;;  %v3558_v2 = vadd.f32 %v1031_v11, %v2864_v7  ;;  %v5384_v45 = vld [vmem:[#allocation70_spill] sm:$0xff] }
 0x191   :  { %v3561_v18 = vadd.f32 %v1032_v59, %v2866_v41  ;;  %v3564_v51 = vadd.f32 %v1033_v38, %v2868_v58  ;;  %v3567_v20 = vadd.f32 %v1038_v32, %v2862_v39  ;;  %v3570_v42 = vadd.f32 %v1039_v29, %v2864_v7  ;;  %v5386_v38 = vld [vmem:[#allocation97_spill] sm:$0xff]  ;;  %v5387_v32 = vld [vmem:[#allocation98_spill] sm:$0xff] }
 0x192   :  { %v3573_v9 = vadd.f32 %v1040_v50, %v2866_v41  ;;  %v3576_v52 = vadd.f32 %v1041_v49, %v2868_v58  ;;  %v1184_v43 = vmin.f32 %v1183_v56, %v3555_v0  ;;  %v1205_v27 = vmin.f32 %v1204_v13, %v3558_v2  ;;  %v5388_v50 = vld [vmem:[#allocation100_spill] sm:$0xff] }
 0x193   :  { %5375 = vst [vmem:[#allocation59_spill] sm:$0xff] %v3567_v20  ;;  %5376 = vst [vmem:[#allocation60_spill] sm:$0xff] %v3570_v42  ;;  %v1226_v8 = vmin.f32 %v1225_v54, %v3561_v18  ;;  %v1247_v61 = vmin.f32 %v1246_v19, %v3564_v51  ;;  %v462_v55 = vmul.f32 %v5331_v10, %v364_v31 }
 0x194   :  { %5377 = vst [vmem:[#allocation61_spill] sm:$0xff] %v3573_v9  ;;  %5378 = vst [vmem:[#allocation62_spill] sm:$0xff] %v3576_v52  ;;  %v463_v12 = vmul.f32 %v5332_v17, %v364_v31  ;;  %v464_v35 = vmul.f32 %v2619_v47, %v364_v31  ;;  %v465_v6 = vmul.f32 %v2621_v48, %v364_v31  ;;  %v5389_v31 = vld [vmem:[#allocation101_spill] sm:$0xff] }
 0x195   :  { %v1185_v24 = vmin.f32 %v1184_v43, %v3341_v57  ;;  %v1206_v5 = vmin.f32 %v1205_v27, %v5379_v53  ;;  %v1227_v56 = vmin.f32 %v1226_v8, %v5380_v21  ;;  %v1248_v13 = vmin.f32 %v1247_v61, %v5381_v40  ;;  %v372_v27 = vpop.permute.xlu1 %371 }
 0x196   :  { %v526_v54 = vadd.f32 %v462_v55, %v5382_v34  ;;  %v527_v19 = vadd.f32 %v463_v12, %v5383_v63  ;;  %v528_v15 = vadd.f32 %v464_v35, %v5384_v45  ;;  %v529_v30 = vadd.f32 %v465_v6, %v5385_v33  ;;  %v5390_v12 = vld [vmem:[#allocation123_spill] sm:$0xff]  ;;  %v5391_v6 = vld [vmem:[#allocation116_spill] sm:$0xff] }
 0x197   :  { %v1186_v4 = vmin.f32 %v1185_v24, %v3567_v20  ;;  %v1207_v3 = vmin.f32 %v1206_v5, %v3570_v42  ;;  %v1228_v11 = vmin.f32 %v1227_v56, %v3573_v9  ;;  %v1249_v59 = vmin.f32 %v1248_v13, %v3576_v52  ;;  %v5392_v5 = vld [vmem:[#allocation117_spill] sm:$0xff]  ;;  %v5393_v13 = vld [vmem:[#allocation118_spill] sm:$0xff] }
 0x198   :  { %v754_v62 = vadd.f32 %v5386_v38, %v526_v54  ;;  %v755_v29 = vadd.f32 %v5387_v32, %v527_v19  ;;  %v756_v49 = vadd.f32 %v5388_v50, %v528_v15  ;;  %v757_v43 = vadd.f32 %v5389_v31, %v529_v30  ;;  %v5394_v54 = vld [vmem:[#allocation119_spill] sm:$0xff]  ;;  %v5395_v30 = vld [vmem:[#allocation17_spill] sm:$0xff]  ;;  %v5396_v38 = vld [vmem:[#allocation72_spill] sm:$0xff] }
 0x199   :  { %v1187_v8 = vmin.f32 %v1186_v4, %v3379_v28  ;;  %v1208_v61 = vmin.f32 %v1207_v3, %v3382_v46  ;;  %v1229_v55 = vmin.f32 %v1228_v11, %v3385_v25  ;;  %v1250_v35 = vmin.f32 %v1249_v59, %v5390_v12  ;;  %v5397_v32 = vld [vmem:[#allocation73_spill] sm:$0xff]  ;;  %v5398_v50 = vld [vmem:[#allocation74_spill] sm:$0xff]  ;;  %v5399_v31 = vld [vmem:[#allocation75_spill] sm:$0xff] }
 0x19a   :  { %v982_v24 = vadd.f32 %v5391_v6, %v754_v62  ;;  %v983_v56 = vadd.f32 %v5392_v5, %v755_v29  ;;  %v984_v34 = vadd.f32 %v5393_v13, %v756_v49  ;;  %v985_v63 = vadd.f32 %v5394_v54, %v757_v43 }
 0x19b   :  { %v470_v19 = vmul.f32 %v5331_v10, %v372_v27  ;;  %v471_v45 = vmul.f32 %v5332_v17, %v372_v27  ;;  %v472_v15 = vmul.f32 %v2619_v47, %v372_v27  ;;  %v473_v33 = vmul.f32 %v2621_v48, %v372_v27 }
 0x19c   :  { %v1046_v4 = vadd.f32 %v982_v24, %v5395_v30  ;;  %v1047_v3 = vadd.f32 %v983_v56, %v5395_v30  ;;  %v1048_v11 = vadd.f32 %v984_v34, %v5395_v30  ;;  %v1049_v59 = vadd.f32 %v985_v63, %v5395_v30  ;;  %v5404_v56 = vld [vmem:[#allocation106_spill] sm:$0xff]  ;;  %v5405_v34 = vld [vmem:[#allocation107_spill] sm:$0xff]  ;;  %v5406_v63 = vld [vmem:[#allocation108_spill] sm:$0xff] }
 0x19d   :  { %v534_v62 = vadd.f32 %v470_v19, %v5396_v38  ;;  %v535_v29 = vadd.f32 %v471_v45, %v5397_v32  ;;  %v536_v49 = vadd.f32 %v472_v15, %v5398_v50  ;;  %v537_v43 = vadd.f32 %v473_v33, %v5399_v31  ;;  %v5407_v45 = vld [vmem:[#allocation109_spill] sm:$0xff] }
 0x19e   :  { %v3623_v6 = vadd.f32 %v1046_v4, %v2862_v39  ;;  %v3626_v27 = vadd.f32 %v1047_v3, %v2864_v7  ;;  %v3629_v24 = vadd.f32 %v1048_v11, %v2866_v41  ;;  %v3632_v5 = vadd.f32 %v1049_v59, %v2868_v58  ;;  %v380_v11 = vpop.permute.xlu1 %379 }
 0x19f   :  { %v762_v13 = vadd.f32 %v5404_v56, %v534_v62  ;;  %v763_v54 = vadd.f32 %v5405_v34, %v535_v29  ;;  %v764_v19 = vadd.f32 %v5406_v63, %v536_v49  ;;  %v765_v15 = vadd.f32 %v5407_v45, %v537_v43  ;;  %v5408_v29 = vld [vmem:[#allocation18_spill] sm:$0xff]  ;;  %v5415_v45 = vld [vmem:[#allocation76_spill] sm:$0xff] }
 0x1a0   :  { %5400 = vst [vmem:[#allocation63_spill] sm:$0xff] %v3623_v6  ;;  %5401 = vst [vmem:[#allocation64_spill] sm:$0xff] %v3626_v27  ;;  %v1188_v33 = vmin.f32 %v1187_v8, %v3623_v6  ;;  %v1209_v30 = vmin.f32 %v1208_v61, %v3626_v27  ;;  %v1230_v4 = vmin.f32 %v1229_v55, %v3629_v24  ;;  %v5409_v61 = vld [vmem:[#allocation124_spill] sm:$0xff]  ;;  %v5410_v55 = vld [vmem:[#allocation19_spill] sm:$0xff] }
 0x1a1   :  { %5402 = vst [vmem:[#allocation65_spill] sm:$0xff] %v3629_v24  ;;  %5403 = vst [vmem:[#allocation66_spill] sm:$0xff] %v3632_v5  ;;  %v1251_v3 = vmin.f32 %v1250_v35, %v3632_v5  ;;  %v990_v59 = vadd.f32 %v3415_v23, %v762_v13  ;;  %v991_v38 = vadd.f32 %v3418_v44, %v763_v54  ;;  %v5455_v24 = vld [vmem:[#allocation27_spill] sm:$0xff]  ;;  %v5461_v6 = vld [vmem:[#allocation38_spill] sm:$0xff] }
 0x1a2   :  { %v992_v62 = vadd.f32 %v3421_v26, %v764_v19  ;;  %v993_v32 = vadd.f32 %v3424_v36, %v765_v15  ;;  %v1189_v50 = vmin.f32 %v1188_v33, %v5408_v29  ;;  %v1210_v49 = vmin.f32 %v1209_v30, %v3402_v22  ;;  %v5416_v33 = vld [vmem:[#allocation77_spill] sm:$0xff]  ;;  %v5454_v29 = vld [vmem:[#allocation26_spill] sm:$0xff] }
 0x1a3   :  { %v1231_v8 = vmin.f32 %v1230_v4, %v3405_v14  ;;  %v1252_v31 = vmin.f32 %v1251_v3, %v5409_v61  ;;  %v1054_v43 = vadd.f32 %v990_v59, %v5410_v55  ;;  %v1055_v35 = vadd.f32 %v991_v38, %v5410_v55  ;;  %v5417_v4 = vld [vmem:[#allocation79_spill] sm:$0xff]  ;;  %v5418_v59 = vld [vmem:[#allocation80_spill] sm:$0xff]  ;;  %v388_v38 = vpop.permute.xlu1 %387  ;;  %v5452_v14 = vld [vmem:[#allocation78_spill] sm:$0xff] }
 0x1a4   :  { %v1056_v23 = vadd.f32 %v992_v62, %v5410_v55  ;;  %v1057_v44 = vadd.f32 %v993_v32, %v5410_v55  ;;  %v478_v26 = vmul.f32 %v5331_v10, %v380_v11  ;;  %v479_v36 = vmul.f32 %v5332_v17, %v380_v11  ;;  %v5453_v22 = vld [vmem:[#allocation25_spill] sm:$0xff] }
 0x1a5   :  { %v480_v56 = vmul.f32 %v2619_v47, %v380_v11  ;;  %v481_v13 = vmul.f32 %v2621_v48, %v380_v11  ;;  %v3659_v34 = vadd.f32 %v1054_v43, %v2862_v39  ;;  %v3662_v54 = vadd.f32 %v1055_v35, %v2864_v7  ;;  %v5419_v35 = vld [vmem:[#allocation29_spill] sm:$0xff] }
 0x1a6   :  { %v3665_v63 = vadd.f32 %v1056_v23, %v2866_v41  ;;  %v3668_v19 = vadd.f32 %v1057_v44, %v2868_v58  ;;  %v542_v15 = vadd.f32 %v478_v26, %v5415_v45  ;;  %v543_v30 = vadd.f32 %v479_v36, %v5416_v33  ;;  %v5420_v44 = vld [vmem:[#allocation30_spill] sm:$0xff]  ;;  %v5422_v36 = vld [vmem:[#allocation111_spill] sm:$0xff] }
 0x1a7   :  { %5411 = vst [vmem:[#allocation35_spill] sm:$0xff] %v3659_v34  ;;  %5412 = vst [vmem:[#allocation36_spill] sm:$0xff] %v3662_v54  ;;  %v544_v3 = vadd.f32 %v480_v56, %v5417_v4  ;;  %v545_v11 = vadd.f32 %v481_v13, %v5418_v59  ;;  %v1190_v62 = vmin.f32 %v1189_v50, %v3659_v34  ;;  %v5421_v26 = vld [vmem:[#allocation110_spill] sm:$0xff]  ;;  %v5423_v4 = vld [vmem:[#allocation40_spill] sm:$0xff] }
 0x1a8   :  { %5413 = vst [vmem:[#allocation37_spill] sm:$0xff] %v3665_v63  ;;  %5414 = vst [vmem:[#allocation39_spill] sm:$0xff] %v3668_v19  ;;  %v1211_v32 = vmin.f32 %v1210_v49, %v3662_v54  ;;  %v1232_v55 = vmin.f32 %v1231_v8, %v3665_v63  ;;  %v1253_v43 = vmin.f32 %v1252_v31, %v3668_v19  ;;  %v5424_v59 = vld [vmem:[#allocation89_spill] sm:$0xff]  ;;  %v5425_v19 = vld [vmem:[#allocation12_spill] sm:$0xff] }
 0x1a9   :  { %v770_v23 = vadd.f32 %v5419_v35, %v542_v15  ;;  %v771_v61 = vadd.f32 %v5420_v44, %v543_v30  ;;  %v772_v45 = vadd.f32 %v5421_v26, %v544_v3  ;;  %v773_v33 = vadd.f32 %v5422_v36, %v545_v11  ;;  %v5426_v35 = vld [vmem:[#allocation91_spill] sm:$0xff]  ;;  %v5427_v44 = vld [vmem:[#allocation24_spill] sm:$0xff]  ;;  %v392_v26 = vpop.permute.xlu1 %391 }
 0x1aa   :  { %v1191_v56 = vmin.f32 %v1190_v62, %v3503_v60  ;;  %v1212_v13 = vmin.f32 %v1211_v32, %v3506_v16  ;;  %v1233_v50 = vmin.f32 %v1232_v55, %v3509_v1  ;;  %v1254_v49 = vmin.f32 %v1253_v43, %v3512_v37  ;;  %v5429_v36 = vld [vmem:[#allocation56_spill] sm:$0xff]  ;;  %v5450_v60 = vld [vmem:[#allocation83_spill] sm:$0xff] }
 0x1ab   :  { %v998_v8 = vadd.f32 %v5423_v4, %v770_v23  ;;  %v999_v31 = vadd.f32 %v5424_v59, %v771_v61  ;;  %v1000_v15 = vadd.f32 %v5425_v19, %v772_v45  ;;  %v1001_v30 = vadd.f32 %v5426_v35, %v773_v33  ;;  %v5428_v19 = vld [vmem:[#allocation55_spill] sm:$0xff]  ;;  %v5430_v4 = vld [vmem:[#allocation57_spill] sm:$0xff]  ;;  %v5431_v35 = vld [vmem:[#allocation58_spill] sm:$0xff] }
 0x1ac   :  { %v486_v3 = vmul.f32 %v5331_v10, %v388_v38  ;;  %v487_v11 = vmul.f32 %v5332_v17, %v388_v38  ;;  %v488_v62 = vmul.f32 %v2619_v47, %v388_v38  ;;  %v489_v32 = vmul.f32 %v2621_v48, %v388_v38  ;;  %v5451_v54 = vld [vmem:[#allocation84_spill] sm:$0xff] }
 0x1ad   :  { %v1062_v55 = vadd.f32 %v998_v8, %v5427_v44  ;;  %v1063_v43 = vadd.f32 %v999_v31, %v5427_v44  ;;  %v1064_v23 = vadd.f32 %v1000_v15, %v5427_v44  ;;  %v1065_v61 = vadd.f32 %v1001_v30, %v5427_v44  ;;  %v5436_v15 = vld [vmem:[#allocation112_spill] sm:$0xff]  ;;  %v5438_v44 = vld [vmem:[#allocation114_spill] sm:$0xff] }
 0x1ae   :  { %v550_v45 = vadd.f32 %v486_v3, %v5428_v19  ;;  %v551_v33 = vadd.f32 %v487_v11, %v5429_v36  ;;  %v552_v59 = vadd.f32 %v488_v62, %v5430_v4  ;;  %v553_v37 = vadd.f32 %v489_v32, %v5431_v35  ;;  %v5437_v3 = vld [vmem:[#allocation113_spill] sm:$0xff]  ;;  %v5439_v19 = vld [vmem:[#allocation115_spill] sm:$0xff]  ;;  %v5443_v35 = vld [vmem:[#allocation104_spill] sm:$0xff] }
 0x1af   :  { %v3703_v1 = vadd.f32 %v1062_v55, %v2862_v39  ;;  %v3706_v38 = vadd.f32 %v1063_v43, %v2864_v7  ;;  %v3709_v8 = vadd.f32 %v1064_v23, %v2866_v41  ;;  %v3712_v31 = vadd.f32 %v1065_v61, %v2868_v58  ;;  %v5440_v36 = vld [vmem:[#allocation99_spill] sm:$0xff] }
 0x1b0   :  { %v778_v30 = vadd.f32 %v5436_v15, %v550_v45  ;;  %v779_v11 = vadd.f32 %v5437_v3, %v551_v33  ;;  %v780_v62 = vadd.f32 %v5438_v44, %v552_v59  ;;  %v781_v32 = vadd.f32 %v5439_v19, %v553_v37  ;;  %v5441_v45 = vld [vmem:[#allocation53_spill] sm:$0xff]  ;;  %v5442_v33 = vld [vmem:[#allocation54_spill] sm:$0xff] }
 0x1b1   :  { %5432 = vst [vmem:[#allocation45_spill] sm:$0xff] %v3703_v1  ;;  %5433 = vst [vmem:[#allocation92_spill] sm:$0xff] %v3706_v38  ;;  %v3719_v55 = vmin.f32 %v1191_v56, %v3703_v1  ;;  %v3722_v43 = vmin.f32 %v1212_v13, %v3706_v38  ;;  %v3725_v23 = vmin.f32 %v1233_v50, %v3709_v8  ;;  %v5444_v15 = vld [vmem:[#allocation105_spill] sm:$0xff]  ;;  %v5445_v19 = vld [vmem:[#allocation90_spill] sm:$0xff] }
 0x1b2   :  { %5434 = vst [vmem:[#allocation41_spill] sm:$0xff] %v3709_v8  ;;  %5435 = vst [vmem:[#allocation11_spill] sm:$0xff] %v3712_v31  ;;  %v3728_v61 = vmin.f32 %v1254_v49, %v3712_v31  ;;  %v944_v4 = vmul.f32 %v5441_v45, %v5440_v36  ;;  %v945_v59 = vmul.f32 %v5442_v33, %v5440_v36  ;;  %v396_v49 = vpop.permute.xlu1 %395  ;;  %v5446_v31 = vld [vmem:[#allocation33_spill] sm:$0xff]  ;;  %v5447_v38 = vld [vmem:[#allocation34_spill] sm:$0xff] }
 0x1b3   :  { %v1006_v37 = vadd.f32 %v5443_v35, %v778_v30  ;;  %v1007_v56 = vadd.f32 %v5444_v15, %v779_v11  ;;  %v490_v3 = vmul.f32 %v5331_v10, %v392_v26  ;;  %v491_v13 = vmul.f32 %v5332_v17, %v392_v26  ;;  %v5448_v30 = vld [vmem:[#allocation81_spill] sm:$0xff]  ;;  %v5449_v11 = vld [vmem:[#allocation82_spill] sm:$0xff] }
 0x1b4   :  { %v492_v50 = vmul.f32 %v2619_v47, %v392_v26  ;;  %v493_v44 = vmul.f32 %v2621_v48, %v392_v26  ;;  %v720_v8 = vmul.f32 %v5446_v31, %v5445_v19  ;;  %v721_v1 = vmul.f32 %v5447_v38, %v5445_v19 }
 0x1b5   :  { %v1008_v36 = vadd.f32 %v944_v4, %v780_v62  ;;  %v1009_v16 = vadd.f32 %v945_v59, %v781_v32  ;;  %v554_v35 = vadd.f32 %v490_v3, %v5448_v30  ;;  %v555_v15 = vadd.f32 %v491_v13, %v5449_v11  ;;  %v5456_v62 = vld [vmem:[#allocation28_spill] sm:$0xff]  ;;  %v848_v4 = vpop.permute.xlu0 %847  ;;  %v5457_v59 = vld [vmem:[#allocation102_spill] sm:$0xff]  ;;  %v5458_v13 = vld [vmem:[#allocation103_spill] sm:$0xff] }
 0x1b6   :  { %v556_v63 = vadd.f32 %v492_v50, %v5450_v60  ;;  %v557_v34 = vadd.f32 %v493_v44, %v5451_v54  ;;  %v330_v26 = vmul.f32 %v5453_v22, %v5452_v14  ;;  %v331_v5 = vmul.f32 %v5454_v29, %v5452_v14  ;;  %v5459_v54 = vld [vmem:[#allocation43_spill] sm:$0xff]  ;;  %v5460_v30 = vld [vmem:[#allocation44_spill] sm:$0xff] }
 0x1b7   :  { %v332_v27 = vmul.f32 %v5455_v24, %v5452_v14  ;;  %v333_v32 = vmul.f32 %v5456_v62, %v5452_v14  ;;  %v782_v3 = vadd.f32 %v5457_v59, %v554_v35  ;;  %v783_v19 = vadd.f32 %v5458_v13, %v555_v15  ;;  %v400_v62 = vpop.permute.xlu1 %399  ;;  %v5462_v15 = vld [vmem:[#allocation67_spill] sm:$0xff] }
 0x1b8   :  { %v784_v60 = vadd.f32 %v720_v8, %v556_v63  ;;  %v785_v50 = vadd.f32 %v721_v1, %v557_v34  ;;  %v946_v44 = vmul.f32 %v5459_v54, %v848_v4  ;;  %v947_v22 = vmul.f32 %v5460_v30, %v848_v4  ;;  %v5463_v59 = vld [vmem:[#allocation31_spill] sm:$0xff] }
 0x1b9   :  { %v948_v11 = vmul.f32 %v5441_v45, %v848_v4  ;;  %v949_v29 = vmul.f32 %v5442_v33, %v848_v4  ;;  %v1070_v24 = vadd.f32 %v1006_v37, %v5461_v6  ;;  %v1071_v12 = vadd.f32 %v1007_v56, %v5461_v6  ;;  %v5464_v37 = vld [vmem:[#allocation32_spill] sm:$0xff] }
 0x1ba   :  { %v1072_v14 = vadd.f32 %v1008_v36, %v5461_v6  ;;  %v1073_v35 = vadd.f32 %v1009_v16, %v5461_v6  ;;  %v494_v63 = vmul.f32 %v5331_v10, %v396_v49  ;;  %v495_v1 = vmul.f32 %v5332_v17, %v396_v49 }
 0x1bb   :  { %v496_v34 = vmul.f32 %v2619_v47, %v396_v49  ;;  %v497_v8 = vmul.f32 %v2621_v48, %v396_v49  ;;  %v726_v4 = vmul.f32 %v5463_v59, %v5462_v15  ;;  %v727_v13 = vmul.f32 %v5464_v37, %v5462_v15 }
 0x1bc   :  { %v1010_v56 = vadd.f32 %v946_v44, %v782_v3  ;;  %v1011_v25 = vadd.f32 %v947_v22, %v783_v19  ;;  %v3776_v16 = vmul.f32 %v5446_v31, %v5462_v15  ;;  %v3780_v6 = vmul.f32 %v5447_v38, %v5462_v15  ;;  %v5467_v15 = vld [vmem:[#allocation14_spill] sm:$0xff] }
 0x1bd   :  { %v1012_v36 = vadd.f32 %v948_v11, %v784_v60  ;;  %v1013_v46 = vadd.f32 %v949_v29, %v785_v50  ;;  %v3783_v49 = vadd.f32 %v1070_v24, %v2862_v39  ;;  %v3786_v28 = vadd.f32 %v1071_v12, %v2864_v7  ;;  %v852_v50 = vpop.permute.xlu0 %851  ;;  %v624_v29 = vpop.permute.xlu1 %623 }
 0x1be   :  { %v3789_v52 = vadd.f32 %v1072_v14, %v2866_v41  ;;  %v3792_v3 = vadd.f32 %v1073_v35, %v2868_v58  ;;  %v558_v19 = vadd.f32 %v494_v63, %v330_v26  ;;  %v559_v44 = vadd.f32 %v495_v1, %v331_v5  ;;  %v5469_v63 = vld [vmem:[#allocation86_spill] sm:$0xff] }
 0x1bf   :  { %5465 = vst [vmem:[#allocation15_spill] sm:$0xff] %v3783_v49  ;;  %5466 = vst [vmem:[#allocation42_spill] sm:$0xff] %v3786_v28  ;;  %v560_v22 = vadd.f32 %v496_v34, %v332_v27  ;;  %v561_v9 = vadd.f32 %v497_v8, %v333_v32  ;;  %v1074_v42 = vadd.f32 %v1010_v56, %v5467_v15  ;;  %v5468_v32 = vld [vmem:[#allocation85_spill] sm:$0xff] }
 0x1c0   :  { %v1075_v60 = vadd.f32 %v1011_v25, %v5467_v15  ;;  %v498_v11 = vmul.f32 %v5331_v10, %v400_v62  ;;  %v499_v12 = vmul.f32 %v5332_v17, %v400_v62  ;;  %v1076_v24 = vadd.f32 %v1012_v36, %v5467_v15 }
 0x1c1   :  { %v1077_v14 = vadd.f32 %v1013_v46, %v5467_v15  ;;  %v950_v35 = vmul.f32 %v5459_v54, %v852_v50  ;;  %v951_v5 = vmul.f32 %v5460_v30, %v852_v50  ;;  %v952_v27 = vmul.f32 %v5441_v45, %v852_v50 }
 0x1c2   :  { %v953_v26 = vmul.f32 %v5442_v33, %v852_v50  ;;  %v562_v25 = vadd.f32 %v498_v11, %v5468_v32  ;;  %v563_v1 = vadd.f32 %v499_v12, %v5469_v63  ;;  %v722_v10 = vmul.f32 %v5463_v59, %v624_v29  ;;  %v856_v63 = vpop.permute.xlu0 %855 }
 0x1c3   :  { %v723_v17 = vmul.f32 %v5464_v37, %v624_v29  ;;  %v724_v34 = vmul.f32 %v5446_v31, %v624_v29  ;;  %v725_v46 = vmul.f32 %v5447_v38, %v624_v29  ;;  %v500_v8 = vmul.f32 %v2619_v47, %v400_v62  ;;  %v5472_v37 = vld [vmem:[#allocation93_spill] sm:$0xff]  ;;  %v5476_v29 = vld [vmem:[#allocation87_spill] sm:$0xff] }
 0x1c4   :  { %v501_v56 = vmul.f32 %v2621_v48, %v400_v62  ;;  %v790_v36 = vadd.f32 %v726_v4, %v562_v25  ;;  %v791_v15 = vadd.f32 %v727_v13, %v563_v1  ;;  %v786_v20 = vadd.f32 %v722_v10, %v558_v19  ;;  %v5474_v19 = vld [vmem:[#allocation95_spill] sm:$0xff] }
 0x1c5   :  { %v787_v50 = vadd.f32 %v723_v17, %v559_v44  ;;  %v788_v40 = vadd.f32 %v724_v34, %v560_v22  ;;  %v789_v11 = vadd.f32 %v725_v46, %v561_v9  ;;  %v3813_v12 = vadd.f32 %v1074_v42, %v2862_v39  ;;  %v5473_v9 = vld [vmem:[#allocation94_spill] sm:$0xff]  ;;  %v5475_v22 = vld [vmem:[#allocation96_spill] sm:$0xff] }
 0x1c6   :  { %v3816_v59 = vadd.f32 %v1075_v60, %v2864_v7  ;;  %v3819_v31 = vadd.f32 %v1076_v24, %v2866_v41  ;;  %v3822_v38 = vadd.f32 %v1077_v14, %v2868_v58  ;;  %v1014_v47 = vadd.f32 %v950_v35, %v786_v20  ;;  %v5477_v14 = vld [vmem:[#allocation88_spill] sm:$0xff] }
 0x1c7   :  { %5470 = vst [vmem:[#allocation13_spill] sm:$0xff] %v3813_v12  ;;  %v1015_v48 = vadd.f32 %v951_v5, %v787_v50  ;;  %v1016_v62 = vadd.f32 %v952_v27, %v788_v40  ;;  %v1017_v4 = vadd.f32 %v953_v26, %v789_v11  ;;  %v1193_v13 = vmin.f32 %v3719_v55, %v5472_v37  ;;  %v5478_v20 = vld [vmem:[#allocation16_spill] sm:$0xff] }
 0x1c8   :  { %5471 = vst [vmem:[#allocation68_spill] sm:$0xff] %v3816_v59  ;;  %v1214_v42 = vmin.f32 %v3722_v43, %v5473_v9  ;;  %v1235_v44 = vmin.f32 %v3725_v23, %v5474_v19  ;;  %v1256_v60 = vmin.f32 %v3728_v61, %v5475_v22  ;;  %v564_v24 = vadd.f32 %v500_v8, %v5476_v29  ;;  %v102_v29 = vpop.xlane.xlu1 %101 }
 0x1c9   :  { %v565_v32 = vadd.f32 %v501_v56, %v5477_v14  ;;  %v1078_v35 = vadd.f32 %v1014_v47, %v5478_v20  ;;  %v1079_v40 = vadd.f32 %v1015_v48, %v5478_v20  ;;  %v1194_v5 = vmin.f32 %v1193_v13, %v3783_v49 }
 0x1ca   :  { %v1215_v55 = vmin.f32 %v1214_v42, %v3786_v28  ;;  %v1236_v43 = vmin.f32 %v1235_v44, %v3789_v52  ;;  %v1257_v27 = vmin.f32 %v1256_v60, %v3792_v3  ;;  %v1080_v23 = vadd.f32 %v1016_v62, %v5478_v20 }
 0x1cb   :  { %v1081_v61 = vadd.f32 %v1017_v4, %v5478_v20  ;;  %v3843_v26 = vadd.f32 %v1078_v35, %v2862_v39  ;;  %v3846_v25 = vadd.f32 %v1079_v40, %v2864_v7  ;;  %v1195_v1 = vmin.f32 %v1194_v5, %v3813_v12 }
 0x1cc   :  { %v1216_v10 = vmin.f32 %v1215_v55, %v3816_v59  ;;  %v1237_v17 = vmin.f32 %v1236_v43, %v3819_v31  ;;  %v1258_v34 = vmin.f32 %v1257_v27, %v3822_v38  ;;  %v792_v46 = vadd.f32 %v3776_v16, %v564_v24 }
 0x1cd   :  { %5479 = vst [vmem:[#allocation69_spill] sm:$0xff] %v3843_v26  ;;  %5480 = vst [vmem:[#allocation70_spill] sm:$0xff] %v3846_v25  ;;  %v793_v8 = vadd.f32 %v3780_v6, %v565_v32  ;;  %v1196_v56 = vmin.f32 %v1195_v1, %v3843_v26  ;;  %v5153_v11 = vmov 0.0   ;;  %v954_v47 = vmul.f32 %v5459_v54, %v856_v63 }
 0x1ce   :  { %v1217_v50 = vmin.f32 %v1216_v10, %v3846_v25  ;;  %1735 = vmatprep.mubr.f32.mxu0 %v5153_v11  ;;  %v955_v48 = vmul.f32 %v5460_v30, %v856_v63  ;;  %v956_v62 = vmul.f32 %v5441_v45, %v856_v63  ;;  %v957_v4 = vmul.f32 %v5442_v33, %v856_v63 }
 0x1cf   :  { %1806 = vmatprep.mubr.f32.mxu1 %v5153_v11  ;;  %v3863_v16 = vadd.f32 %v1080_v23, %v2866_v41  ;;  %v3866_v6 = vadd.f32 %v1081_v61, %v2868_v58  ;;  %v1018_v13 = vadd.f32 %v954_v47, %v790_v36  ;;  %v5513_v11 = vld [vmem:[#allocation126_spill] sm:$0xff] }
 0x1d0   :  { %v1019_v42 = vadd.f32 %v955_v48, %v791_v15  ;;  %v1020_v44 = vadd.f32 %v956_v62, %v792_v46  ;;  %v1021_v60 = vadd.f32 %v957_v4, %v793_v8 }
 0x1d1   :  { %v1082_v54 = vadd.f32 %v1018_v13, %v102_v29  ;;  %v1238_v45 = vmin.f32 %v1237_v17, %v3863_v16  ;;  %v1259_v33 = vmin.f32 %v1258_v34, %v3866_v6 }
 0x1d2   :  { %v1083_v24 = vadd.f32 %v1019_v42, %v102_v29  ;;  %v1084_v30 = vadd.f32 %v1020_v44, %v102_v29  ;;  %v1085_v14 = vadd.f32 %v1021_v60, %v102_v29  ;;  %v5485_v60 = vld [vmem:[#allocation20_spill] sm:$0xff] }
 0x1d3   :  { %v3871_v32 = vadd.f32 %v1082_v54, %v2862_v39  ;;  %v1153_v29 = vadd.s32 16, %v5485_v60  ;;  %v1154_v54 = vadd.s32 24, %v5485_v60  ;;  %v1162_v37 = vadd.s32 88, %v5485_v60 }
 0x1d4   :  { %v3874_v20 = vadd.f32 %v1083_v24, %v2864_v7  ;;  %v3877_v36 = vadd.f32 %v1084_v30, %v2866_v41  ;;  %v3880_v15 = vadd.f32 %v1085_v14, %v2868_v58  ;;  %v5486_v24 = vld [vmem:[#allocation9_spill] sm:$0xff]  ;;  %v5487_v30 = vld [vmem:[#allocation47_spill] sm:$0xff]  ;;  %v3901_v14 = vadd.s32 32, %v5485_v60 }
 0x1d5   :  { %5481 = vst [vmem:[#allocation71_spill] sm:$0xff] %v3871_v32  ;;  %v1197_v35 = vmin.f32 %v1196_v56, %v3871_v32  ;;  %v4006_v49 = vcvt.s32.f32 %v1153_v29  ;;  %v4008_v28 = vcvt.s32.f32 %v1154_v54  ;;  %v1152_v29 = vadd.s32 8, %v5485_v60 }
 0x1d6   :  { %5482 = vst [vmem:[#allocation97_spill] sm:$0xff] %v3874_v20  ;;  %5483 = vst [vmem:[#allocation98_spill] sm:$0xff] %v3877_v36  ;;  %v1218_v40 = vmin.f32 %v1217_v50, %v3874_v20  ;;  %v1239_v5 = vmin.f32 %v1238_v45, %v3877_v36  ;;  %v1260_v55 = vmin.f32 %v1259_v33, %v3880_v15  ;;  %v3904_v45 = vadd.s32 40, %v5485_v60  ;;  %v5488_v33 = vld [vmem:[#allocation50_spill] sm:$0xff] }
 0x1d7   :  { %5484 = vst [vmem:[#allocation100_spill] sm:$0xff] %v3880_v15  ;;  %v1198_v43 = vrot.slane %v1197_v35, 4  ;;  %v1157_v54 = vadd.s32 48, %v5485_v60  ;;  %v4027_v59 = vcvt.s32.f32 %v3901_v14  ;;  %v1161_v20 = vadd.s32 80, %v5485_v60 }
 0x1d8   :  { %v1219_v39 = vrot.slane %v1218_v40, 4  ;;  %v1240_v27 = vrot.slane %v1239_v5, 4  ;;  %v1261_v23 = vrot.slane %v1260_v55, 4 }
 0x1d9   :  { %v1199_v7 = vmin.f32 %v1197_v35, %v1198_v43  ;;  %v5489_v35 = vld [vmem:[#allocation10_spill] sm:$0xff]  ;;  %v5493_v43 = vld [vmem:[#allocation61_spill] sm:$0xff] }
 0x1da   :  { %v1220_v61 = vmin.f32 %v1218_v40, %v1219_v39  ;;  %v1241_v63 = vmin.f32 %v1239_v5, %v1240_v27  ;;  %v1262_v41 = vmin.f32 %v1260_v55, %v1261_v23  ;;  %v5490_v40 = vld [vmem:[#allocation46_spill] sm:$0xff]  ;;  %v5491_v5 = vld [vmem:[#allocation59_spill] sm:$0xff]  ;;  %v5492_v55 = vld [vmem:[#allocation60_spill] sm:$0xff] }
 0x1db   :  { %v1200_v1 = vrot.slane %v1199_v7, 2  ;;  %v5494_v39 = vld [vmem:[#allocation62_spill] sm:$0xff]  ;;  %v5495_v27 = vld [vmem:[#allocation120_spill] sm:$0xff]  ;;  %v5496_v23 = vld [vmem:[#allocation121_spill] sm:$0xff] }
 0x1dc   :  { %v1221_v10 = vrot.slane %v1220_v61, 2  ;;  %v1242_v58 = vrot.slane %v1241_v63, 2  ;;  %v1263_v17 = vrot.slane %v1262_v41, 2 }
 0x1dd   :  { %v1201_v34 = vmin.f32 %v1199_v7, %v1200_v1  ;;  %v5497_v7 = vld [vmem:[#allocation122_spill] sm:$0xff]  ;;  %v5501_v1 = vld [vmem:[#allocation65_spill] sm:$0xff] }
 0x1de   :  { %v1222_v46 = vmin.f32 %v1220_v61, %v1221_v10  ;;  %v1243_v8 = vmin.f32 %v1241_v63, %v1242_v58  ;;  %v1264_v56 = vmin.f32 %v1262_v41, %v1263_v17  ;;  %v5498_v61 = vld [vmem:[#allocation123_spill] sm:$0xff]  ;;  %v5502_v10 = vld [vmem:[#allocation66_spill] sm:$0xff]  ;;  %v5517_v58 = vld [vmem:[#allocation41_spill] sm:$0xff]  ;;  %v4041_v17 = vcvt.s32.f32 %v3904_v45 }
 0x1df   :  { %v1202_v50 = vrot.slane %v1201_v34, 1  ;;  %v1165_v63 = vadd.s32 112, %v5485_v60  ;;  %v4054_v45 = vcvt.s32.f32 %v1157_v54 }
 0x1e0   :  { %v1223_v47 = vrot.slane %v1222_v46, 1  ;;  %v1244_v48 = vrot.slane %v1243_v8, 1  ;;  %v1265_v62 = vrot.slane %v1264_v56, 1 }
 0x1e1   :  { %v3886_v4 = vmin.f32 %v1201_v34, %v1202_v50  ;;  %v5505_v34 = vld [vmem:[#allocation23_spill] sm:$0xff]  ;;  %v5509_v50 = vld [vmem:[#allocation37_spill] sm:$0xff] }
 0x1e2   :  { %v3888_v13 = vmin.f32 %v1222_v46, %v1223_v47  ;;  %v3890_v42 = vmin.f32 %v1243_v8, %v1244_v48  ;;  %v3892_v44 = vmin.f32 %v1264_v56, %v1265_v62  ;;  %v5506_v46 = vld [vmem:[#allocation124_spill] sm:$0xff]  ;;  %v5510_v47 = vld [vmem:[#allocation39_spill] sm:$0xff]  ;;  %v1163_v56 = vadd.s32 96, %v5485_v60 }
 0x1e3   :  { %v5514_v8 = vld [vmem:[#allocation127_spill] sm:$0xff]  ;;  %vm1323_vm10 = vcmp.eq.f32.partialorder %v3843_v26, %v3886_v4  ;;  %vm1327_vm15 = vcmp.eq.f32.partialorder %v3871_v32, %v3886_v4  ;;  %v1158_v26 = vadd.s32 56, %v5485_v60  ;;  %v1160_v32 = vadd.s32 72, %v5485_v60 }
 0x1e4   :  { %vm1277_vm8 = vcmp.eq.f32.partialorder %v3561_v18, %v3890_v42  ;;  %vm1278_vm9 = vcmp.eq.f32.partialorder %v3564_v51, %v3892_v44  ;;  %vm1281_vm12 = vcmp.eq.f32.partialorder %v5380_v21, %v3890_v42  ;;  %vm1282_vm13 = vcmp.eq.f32.partialorder %v5490_v40, %v3892_v44  ;;  %v5518_v48 = vld [vmem:[#allocation11_spill] sm:$0xff] }
 0x1e5   :  { %vm1285_vm0 = vcmp.eq.f32.partialorder %v5493_v43, %v3890_v42  ;;  %vm1286_vm1 = vcmp.eq.f32.partialorder %v5494_v39, %v3892_v44  ;;  %vm1289_vm7 = vcmp.eq.f32.partialorder %v5497_v7, %v3890_v42  ;;  %vm1290_vm14 = vcmp.eq.f32.partialorder %v5498_v61, %v3892_v44 }
 0x1e6   :  { %vm1293_vm5 = vcmp.eq.f32.partialorder %v5501_v1, %v3890_v42  ;;  %vm1317_vm4 = vcmp.eq.f32.partialorder %v3789_v52, %v3890_v42  ;;  %vm1324_vm3 = vcmp.eq.f32.partialorder %v3846_v25, %v3888_v13  ;;  %vm1329_vm2 = vcmp.eq.f32.partialorder %v3877_v36, %v3890_v42 }
 0x1e7   :  { %vm1330_vm11 = vcmp.eq.f32.partialorder %v3880_v15, %v3892_v44  ;;  %v1159_v25 = vadd.s32 64, %v5485_v60  ;;  %v1341_v12 = vsel %vm1277_vm8, %v4006_v49, 128.0  ;;  %v1342_v9 = vsel %vm1278_vm9, %v4006_v49, 128.0 }
 0x1e8   :  { %v1345_v14 = vsel %vm1281_vm12, %v4008_v28, 128.0  ;;  %v1346_v18 = vsel %vm1282_vm13, %v4008_v28, 128.0  ;;  %v1164_v51 = vadd.s32 104, %v5485_v60  ;;  %v1349_v21 = vsel %vm1285_vm0, %v4027_v59, 128.0 }
 0x1e9   :  { %v1438_v62 = vmin.f32 %v1345_v14, %v1341_v12  ;;  %v1459_v41 = vmin.f32 %v1346_v18, %v1342_v9  ;;  %v1350_v40 = vsel %vm1286_vm1, %v4027_v59, 128.0  ;;  %v1166_v15 = vadd.s32 120, %v5485_v60 }
 0x1ea   :  { %v4066_v36 = vcvt.s32.f32 %v5485_v60  ;;  %v4068_v14 = vcvt.s32.f32 %v1152_v29  ;;  %v4070_v54 = vcvt.s32.f32 %v1158_v26  ;;  %v1353_v43 = vsel %vm1289_vm7, %v4041_v17, 128.0 }
 0x1eb   :  { %v1439_v12 = vmin.f32 %v1438_v62, %v1349_v21  ;;  %v1460_v9 = vmin.f32 %v1459_v41, %v1350_v40  ;;  %v1354_v39 = vsel %vm1290_vm14, %v4041_v17, 128.0  ;;  %v4080_v18 = vcvt.s32.f32 %v1159_v25 }
 0x1ec   :  { %v4082_v60 = vcvt.s32.f32 %v1160_v32  ;;  %v4084_v29 = vcvt.s32.f32 %v1161_v20  ;;  %v4086_v26 = vcvt.s32.f32 %v1162_v37  ;;  %v1357_v7 = vsel %vm1293_vm5, %v4054_v45, 128.0 }
 0x1ed   :  { %v1440_v62 = vmin.f32 %v1439_v12, %v1353_v43  ;;  %v1461_v41 = vmin.f32 %v1460_v9, %v1354_v39  ;;  %vm5519_vm7 = vcmp.eq.f32.partialorder %v5502_v10, %v3892_v44  ;;  %v4096_v25 = vcvt.s32.f32 %v1163_v56  ;;  %v5522_v56 = vld [vmem:[#allocation48_spill] sm:$0xff] }
 0x1ee   :  { %v1358_v61 = vsel %vm5519_vm7, %v4054_v45, 128.0  ;;  %v4098_v32 = vcvt.s32.f32 %v1164_v51  ;;  %v4100_v20 = vcvt.s32.f32 %v1165_v63  ;;  %v4102_v37 = vcvt.s32.f32 %v1166_v15  ;;  %v5523_v51 = vld [vmem:[#allocation49_spill] sm:$0xff]  ;;  %v5524_v15 = vld [vmem:[#allocation51_spill] sm:$0xff]  ;;  %v5525_v9 = vld [vmem:[#allocation52_spill] sm:$0xff] }
 0x1ef   :  { %v1441_v21 = vmin.f32 %v1440_v62, %v1357_v7  ;;  %v1462_v40 = vmin.f32 %v1461_v41, %v1358_v61  ;;  %vm5520_vm8 = vcmp.eq.f32.partialorder %v5505_v34, %v3890_v42  ;;  %vm5521_vm5 = vcmp.eq.f32.partialorder %v5506_v46, %v3892_v44 }
 0x1f0   :  { %v1361_v1 = vsel %vm5520_vm8, %v4070_v54, 128.0  ;;  %v1362_v10 = vsel %vm5521_vm5, %v4070_v54, 128.0  ;;  %vm1269_vm9 = vcmp.eq.f32.partialorder %v5522_v56, %v3890_v42  ;;  %vm1270_vm12 = vcmp.eq.f32.partialorder %v5523_v51, %v3892_v44 }
 0x1f1   :  { %v1442_v63 = vmin.f32 %v1441_v21, %v1361_v1  ;;  %v1463_v12 = vmin.f32 %v1462_v40, %v1362_v10  ;;  %vm1273_vm13 = vcmp.eq.f32.partialorder %v5524_v15, %v3890_v42  ;;  %vm1274_vm14 = vcmp.eq.f32.partialorder %v5525_v9, %v3892_v44 }
 0x1f2   :  { %vm5526_vm0 = vcmp.eq.f32.partialorder %v5509_v50, %v3890_v42  ;;  %vm5527_vm1 = vcmp.eq.f32.partialorder %v5510_v47, %v3892_v44  ;;  %vm1325_vm7 = vcmp.eq.f32.partialorder %v3863_v16, %v3890_v42  ;;  %vm1326_vm8 = vcmp.eq.f32.partialorder %v3866_v6, %v3892_v44 }
 0x1f3   :  { %v1365_v34 = vsel %vm5526_vm0, %v4080_v18, 128.0  ;;  %v1366_v46 = vsel %vm5527_vm1, %v4080_v18, 128.0  ;;  %vm5528_vm5 = vcmp.eq.f32.partialorder %v5486_v24, %v3886_v4  ;;  %vm5529_vm0 = vcmp.eq.f32.partialorder %v5487_v30, %v3888_v13 }
 0x1f4   :  { %v1443_v43 = vmin.f32 %v1442_v63, %v1365_v34  ;;  %v1464_v39 = vmin.f32 %v1463_v12, %v1366_v46  ;;  %v1331_v62 = vsel %vm5528_vm5, %v4066_v36, 128.0  ;;  %v1332_v50 = vsel %vm5529_vm0, %v4066_v36, 128.0 }
 0x1f5   :  { %vm5530_vm1 = vcmp.eq.f32.partialorder %v5513_v11, %v3890_v42  ;;  %vm5531_vm6 = vcmp.eq.f32.partialorder %v5514_v8, %v3892_v44  ;;  %v1333_v24 = vsel %vm1269_vm9, %v4066_v36, 128.0  ;;  %v1334_v30 = vsel %vm1270_vm12, %v4066_v36, 128.0 }
 0x1f6   :  { %v1369_v47 = vsel %vm5530_vm1, %v4082_v60, 128.0  ;;  %v1370_v41 = vsel %vm5531_vm6, %v4082_v60, 128.0  ;;  %vm5532_vm5 = vcmp.eq.f32.partialorder %v5488_v33, %v3886_v4  ;;  %vm5533_vm6 = vcmp.eq.f32.partialorder %v5489_v35, %v3888_v13 }
 0x1f7   :  { %v1444_v7 = vmin.f32 %v1443_v43, %v1369_v47  ;;  %v1465_v61 = vmin.f32 %v1464_v39, %v1370_v41  ;;  %v1335_v11 = vsel %vm5532_vm5, %v4068_v14, 128.0  ;;  %v1336_v8 = vsel %vm5533_vm6, %v4068_v14, 128.0 }
 0x1f8   :  { %vm5534_vm9 = vcmp.eq.f32.partialorder %v5517_v58, %v3890_v42  ;;  %vm5535_vm12 = vcmp.eq.f32.partialorder %v5518_v48, %v3892_v44  ;;  %v1337_v33 = vsel %vm1273_vm13, %v4068_v14, 128.0  ;;  %v1338_v35 = vsel %vm1274_vm14, %v4068_v14, 128.0 }
 0x1f9   :  { %v1373_v21 = vsel %vm5534_vm9, %v4084_v29, 128.0  ;;  %v1374_v40 = vsel %vm5535_vm12, %v4084_v29, 128.0  ;;  %vm5536_vm0 = vcmp.eq.f32.partialorder %v3555_v0, %v3886_v4  ;;  %vm5537_vm1 = vcmp.eq.f32.partialorder %v3558_v2, %v3888_v13 }
 0x1fa   :  { %v1445_v1 = vmin.f32 %v1444_v7, %v1373_v21  ;;  %v1466_v10 = vmin.f32 %v1465_v61, %v1374_v40  ;;  %v1339_v58 = vsel %vm5536_vm0, %v4006_v49, 128.0  ;;  %v1340_v48 = vsel %vm5537_vm1, %v4006_v49, 128.0 }
 0x1fb   :  { %vm5538_vm13 = vcmp.eq.f32.partialorder %v5474_v19, %v3890_v42  ;;  %vm5539_vm14 = vcmp.eq.f32.partialorder %v5475_v22, %v3892_v44  ;;  %v1395_v15 = vmin.f32 %v1331_v62, %v1335_v11  ;;  %v1416_v0 = vmin.f32 %v1332_v50, %v1336_v8 }
 0x1fc   :  { %v1377_v56 = vsel %vm5538_vm13, %v4086_v26, 128.0  ;;  %v1378_v51 = vsel %vm5539_vm14, %v4086_v26, 128.0  ;;  %vm5540_vm5 = vcmp.eq.f32.partialorder %v3341_v57, %v3886_v4  ;;  %vm5541_vm6 = vcmp.eq.f32.partialorder %v5379_v53, %v3888_v13 }
 0x1fd   :  { %v1446_v63 = vmin.f32 %v1445_v1, %v1377_v56  ;;  %v1467_v12 = vmin.f32 %v1466_v10, %v1378_v51  ;;  %v1343_v2 = vsel %vm5540_vm5, %v4008_v28, 128.0  ;;  %v1344_v19 = vsel %vm5541_vm6, %v4008_v28, 128.0  ;;  %v5551_v56 = vld [vmem:[#allocation63_spill] sm:$0xff] }
 0x1fe   :  { %v1381_v22 = vsel %vm1317_vm4, %v4096_v25, 128.0  ;;  %vm5542_vm9 = vcmp.eq.f32.partialorder %v3792_v3, %v3892_v44  ;;  %v1396_v43 = vmin.f32 %v1395_v15, %v1339_v58  ;;  %v1417_v57 = vmin.f32 %v1416_v0, %v1340_v48 }
 0x1ff   :  { %v1382_v9 = vsel %vm5542_vm9, %v4096_v25, 128.0  ;;  %v1447_v34 = vmin.f32 %v1446_v63, %v1381_v22  ;;  %vm5543_vm12 = vcmp.eq.f32.partialorder %v5491_v5, %v3886_v4  ;;  %vm5544_vm0 = vcmp.eq.f32.partialorder %v5492_v55, %v3888_v13  ;;  %v5553_v63 = vld [vmem:[#allocation64_spill] sm:$0xff] }
 0x200   :  { %v1468_v46 = vmin.f32 %v1467_v12, %v1382_v9  ;;  %v1347_v53 = vsel %vm5543_vm12, %v4027_v59, 128.0  ;;  %v1348_v52 = vsel %vm5544_vm0, %v4027_v59, 128.0  ;;  %vm5545_vm4 = vcmp.eq.f32.partialorder %v3819_v31, %v3890_v42 }
 0x201   :  { %v1385_v3 = vsel %vm5545_vm4, %v4098_v32, 128.0  ;;  %vm5546_vm1 = vcmp.eq.f32.partialorder %v3822_v38, %v3892_v44  ;;  %v1397_v47 = vmin.f32 %v1396_v43, %v1343_v2  ;;  %v1418_v5 = vmin.f32 %v1417_v57, %v1344_v19  ;;  %v5561_v43 = vld [vmem:[#allocation36_spill] sm:$0xff] }
 0x202   :  { %v1386_v39 = vsel %vm5546_vm1, %v4098_v32, 128.0  ;;  %v1448_v62 = vmin.f32 %v1447_v34, %v1385_v3  ;;  %vm5547_vm13 = vcmp.eq.f32.partialorder %v5495_v27, %v3886_v4  ;;  %vm5548_vm14 = vcmp.eq.f32.partialorder %v5496_v23, %v3888_v13  ;;  %v5559_v34 = vld [vmem:[#allocation35_spill] sm:$0xff] }
 0x203   :  { %v1469_v50 = vmin.f32 %v1468_v46, %v1386_v39  ;;  %v1351_v55 = vsel %vm5547_vm13, %v4041_v17, 128.0  ;;  %v1352_v31 = vsel %vm5548_vm14, %v4041_v17, 128.0  ;;  %v1389_v38 = vsel %vm1325_vm7, %v4100_v20, 128.0 }
 0x204   :  { %v1390_v41 = vsel %vm1326_vm8, %v4100_v20, 128.0  ;;  %v1449_v7 = vmin.f32 %v1448_v62, %v1389_v38  ;;  %v1398_v11 = vmin.f32 %v1397_v47, %v1347_v53  ;;  %v1419_v27 = vmin.f32 %v1418_v5, %v1348_v52  ;;  %v5563_v62 = vld [vmem:[#allocation21_spill] sm:$0xff] }
 0x205   :  { %v1470_v61 = vmin.f32 %v1469_v50, %v1390_v41  ;;  %v1393_v23 = vsel %vm1329_vm2, %v4102_v37, 128.0  ;;  %v1394_v16 = vsel %vm1330_vm11, %v4102_v37, 128.0  ;;  %v1437_v40 = vmin.f32 %v1333_v24, %v1337_v33  ;;  %v5555_v24 = vld [vmem:[#allocation18_spill] sm:$0xff]  ;;  %v5565_v47 = vld [vmem:[#allocation125_spill] sm:$0xff] }
 0x206   :  { %v1458_v1 = vmin.f32 %v1334_v30, %v1338_v35  ;;  %v1450_v10 = vmin.f32 %v1449_v7, %v1393_v23  ;;  %v1399_v6 = vmin.f32 %v1398_v11, %v1351_v55  ;;  %v1420_v48 = vmin.f32 %v1419_v27, %v1352_v31  ;;  %v5557_v33 = vld [vmem:[#allocation22_spill] sm:$0xff]  ;;  %v5567_v7 = vld [vmem:[#allocation45_spill] sm:$0xff]  ;;  %v5569_v11 = vld [vmem:[#allocation92_spill] sm:$0xff] }
 0x207   :  { %v1471_v58 = vmin.f32 %v1470_v61, %v1394_v16  ;;  %vm5552_vm7 = vcmp.eq.f32.partialorder %v5551_v56, %v3886_v4  ;;  %vm5554_vm2 = vcmp.eq.f32.partialorder %v5553_v63, %v3888_v13  ;;  %vm5556_vm11 = vcmp.eq.f32.partialorder %v5555_v24, %v3886_v4  ;;  %v5575_v63 = vld [vmem:[#allocation15_spill] sm:$0xff] }
 0x208   :  { %v1355_v51 = vsel %vm5552_vm7, %v4054_v45, 128.0  ;;  %v1356_v42 = vsel %vm5554_vm2, %v4054_v45, 128.0  ;;  %v1451_v44 = vmin.f32 %v1450_v10, %v1437_v40  ;;  %v1359_v30 = vsel %vm5556_vm11, %v4070_v54, 128.0  ;;  %v5571_v40 = vld [vmem:[#allocation93_spill] sm:$0xff]  ;;  %v5573_v10 = vld [vmem:[#allocation94_spill] sm:$0xff] }
 0x209   :  { %v1400_v12 = vmin.f32 %v1399_v6, %v1355_v51  ;;  %v1421_v15 = vmin.f32 %v1420_v48, %v1356_v42  ;;  %v1472_v0 = vmin.f32 %v1471_v58, %v1458_v1  ;;  %vm5558_vm8 = vcmp.eq.f32.partialorder %v5557_v33, %v3888_v13  ;;  %v5579_v33 = vld [vmem:[#allocation13_spill] sm:$0xff] }
 0x20a   :  { %v1360_v35 = vsel %vm5558_vm8, %v4070_v54, 128.0  ;;  %v1452_v22 = vrot.slane %v1451_v44, 4  ;;  %vm5560_vm5 = vcmp.eq.f32.partialorder %v5559_v34, %v3886_v4  ;;  %vm5562_vm6 = vcmp.eq.f32.partialorder %v5561_v43, %v3888_v13 }
 0x20b   :  { %v1401_v2 = vmin.f32 %v1400_v12, %v1359_v30  ;;  %v1422_v19 = vmin.f32 %v1421_v15, %v1360_v35  ;;  %v1473_v9 = vrot.slane %v1472_v0, 4  ;;  %v1363_v46 = vsel %vm5560_vm5, %v4080_v18, 128.0  ;;  %v5577_v12 = vld [vmem:[#allocation42_spill] sm:$0xff] }
 0x20c   :  { %v1364_v57 = vsel %vm5562_vm6, %v4080_v18, 128.0  ;;  %v1453_v3 = vmin.f32 %v1451_v44, %v1452_v22  ;;  %vm5564_vm9 = vcmp.eq.f32.partialorder %v5563_v62, %v3886_v4  ;;  %vm5566_vm12 = vcmp.eq.f32.partialorder %v5565_v47, %v3888_v13 }
 0x20d   :  { %v1402_v53 = vmin.f32 %v1401_v2, %v1363_v46  ;;  %v1423_v52 = vmin.f32 %v1422_v19, %v1364_v57  ;;  %v1474_v39 = vmin.f32 %v1472_v0, %v1473_v9  ;;  %v1367_v50 = vsel %vm5564_vm9, %v4082_v60, 128.0  ;;  %v5581_v2 = vld [vmem:[#allocation68_spill] sm:$0xff] }
 0x20e   :  { %v1368_v5 = vsel %vm5566_vm12, %v4082_v60, 128.0  ;;  %v1454_v38 = vrot.slane %v1453_v3, 2  ;;  %vm5568_vm0 = vcmp.eq.f32.partialorder %v5567_v7, %v3886_v4  ;;  %vm5570_vm4 = vcmp.eq.f32.partialorder %v5569_v11, %v3888_v13 }
 0x20f   :  { %v1403_v55 = vmin.f32 %v1402_v53, %v1367_v50  ;;  %v1424_v31 = vmin.f32 %v1423_v52, %v1368_v5  ;;  %v1475_v41 = vrot.slane %v1474_v39, 2  ;;  %v1371_v61 = vsel %vm5568_vm0, %v4084_v29, 128.0 }
 0x210   :  { %v1372_v27 = vsel %vm5570_vm4, %v4084_v29, 128.0  ;;  %v1455_v21 = vmin.f32 %v1453_v3, %v1454_v38  ;;  %vm5572_vm1 = vcmp.eq.f32.partialorder %v5571_v40, %v3886_v4  ;;  %vm5574_vm13 = vcmp.eq.f32.partialorder %v5573_v10, %v3888_v13  ;;  %v5586_v3 = vld [vmem:[#allocation97_spill] sm:$0xff] }
 0x211   :  { %v1404_v8 = vmin.f32 %v1403_v55, %v1371_v61  ;;  %v1425_v23 = vmin.f32 %v1424_v31, %v1372_v27  ;;  %v1476_v16 = vmin.f32 %v1474_v39, %v1475_v41  ;;  %v1375_v1 = vsel %vm5572_vm1, %v4086_v26, 128.0 }
 0x212   :  { %v1376_v58 = vsel %vm5574_vm13, %v4086_v26, 128.0  ;;  %v1456_v56 = vrot.slane %v1455_v21, 1  ;;  %vm5576_vm14 = vcmp.eq.f32.partialorder %v5575_v63, %v3886_v4  ;;  %vm5578_vm7 = vcmp.eq.f32.partialorder %v5577_v12, %v3888_v13 }
 0x213   :  { %v1405_v6 = vmin.f32 %v1404_v8, %v1375_v1  ;;  %v1426_v48 = vmin.f32 %v1425_v23, %v1376_v58  ;;  %v1477_v51 = vrot.slane %v1476_v16, 1  ;;  %v1379_v42 = vsel %vm5576_vm14, %v4096_v25, 128.0 }
 0x214   :  { %v1380_v15 = vsel %vm5578_vm7, %v4096_v25, 128.0  ;;  %v4308_v24 = vmin.f32 %v1455_v21, %v1456_v56  ;;  %vm5580_vm2 = vcmp.eq.f32.partialorder %v5579_v33, %v3886_v4  ;;  %vm5582_vm11 = vcmp.eq.f32.partialorder %v5581_v2, %v3888_v13 }
 0x215   :  { %v1406_v44 = vmin.f32 %v1405_v6, %v1379_v42  ;;  %v1427_v0 = vmin.f32 %v1426_v48, %v1380_v15  ;;  %v4310_v30 = vmin.f32 %v1476_v16, %v1477_v51  ;;  %v1383_v35 = vsel %vm5580_vm2, %v4098_v32, 128.0 }
 0x216   :  { %v1384_v19 = vsel %vm5582_vm11, %v4098_v32, 128.0  ;;  %v1387_v9 = vsel %vm1323_vm10, %v4100_v20, 128.0  ;;  %vm1541_vm5 = vcmp.eq.f32.partialorder %v4102_v37, %v4308_v24  ;;  %v1388_v57 = vsel %vm1324_vm3, %v4100_v20, 128.0 }
 0x217   :  { %v1407_v34 = vmin.f32 %v1406_v44, %v1383_v35  ;;  %v1428_v46 = vmin.f32 %v1427_v0, %v1384_v19  ;;  %vm1542_vm8 = vcmp.eq.f32.partialorder %v4102_v37, %v4310_v30  ;;  %v1391_v52 = vsel %vm1327_vm15, %v4102_v37, 128.0 }
 0x218   :  { %vm5587_vm10 = vcmp.eq.f32.partialorder %v5586_v3, %v3888_v13  ;;  %v2334_v62 = vmov 1.0   ;;  %vm5168_vm6 = vcmp.eq.f32.partialorder %v4100_v20, %v4310_v30  ;;  %vm1534_vm3 = vcmp.eq.f32.partialorder %v4098_v32, %v4310_v30 }
 0x219   :  { %v1392_v39 = vsel %vm5587_vm10, %v4102_v37, 128.0  ;;  %2202 = vmatprep.subr.msk.mxu1 %vm1542_vm8, %v2334_v62  ;;  %v1408_v50 = vmin.f32 %v1407_v34, %v1387_v9  ;;  %v1429_v47 = vmin.f32 %v1428_v46, %v1388_v57  ;;  %vm1533_vm15 = vcmp.eq.f32.partialorder %v4098_v32, %v4308_v24 }
 0x21a   :  { %2203 = vmatpush1.msk.msra.mxu1 %vm1541_vm5, %v2334_v62  ;;  %v5588_v4 = vmov 0.0   ;;  %vm5169_vm9 = vcmp.eq.f32.partialorder %v4100_v20, %v4308_v24  ;;  %vm5178_vm12 = vcmp.eq.f32.partialorder %v4068_v14, %v4308_v24  ;;  %vm5179_vm0 = vcmp.eq.f32.partialorder %v4068_v14, %v4310_v30 }
 0x21b   :  { %v4349_v5 = vsel %vm1542_vm8, 1.0, %v5588_v4  ;;  %v4352_v13 = vsel %vm1541_vm5, 1.0, %v5588_v4  ;;  %2204 = vmatprep.subr.msk.mxu1 %vm5168_vm6, %v2334_v62  ;;  %v4361_v55 = vsel %vm1534_vm3, 1.0, %v5588_v4  ;;  %v1409_v31 = vmin.f32 %v1408_v50, %v1391_v52 }
 0x21c   :  { %v1430_v38 = vmin.f32 %v1429_v47, %v1392_v39  ;;  %2205 = vmatpush1.msk.msra.mxu1 %vm5169_vm9, %v2334_v62  ;;  %v4376_v41 = vsel %vm1533_vm15, 1.0, %v5588_v4  ;;  %vm5170_vm4 = vcmp.eq.f32.partialorder %v4096_v25, %v4310_v30  ;;  %vm5176_vm1 = vcmp.eq.f32.partialorder %v4066_v36, %v4308_v24 }
 0x21d   :  { %2206 = vmatprep.subr.msk.mxu1 %vm1534_vm3, %v2334_v62  ;;  %vm5177_vm13 = vcmp.eq.f32.partialorder %v4066_v36, %v4310_v30  ;;  %v1410_v7 = vrot.slane %v1409_v31, 4  ;;  %vm5172_vm14 = vcmp.eq.f32.partialorder %v4096_v25, %v4308_v24  ;;  %v4394_v11 = vsel %vm5178_vm12, 1.0, %v5588_v4 }
 0x21e   :  { %v1431_v61 = vrot.slane %v1430_v38, 4  ;;  %2207 = vmatpush1.msk.msra.mxu1 %vm1533_vm15, %v2334_v62  ;;  %v4404_v27 = vsel %vm5179_vm0, 1.0, %v5588_v4  ;;  %v4410_v8 = vsel %vm5176_vm1, 1.0, %v5588_v4  ;;  %v4416_v23 = vsel %vm5177_vm13, 1.0, %v5588_v4 }
 0x21f   :  { %2208 = vmatprep.subr.msk.mxu1 %vm5170_vm4, %v2334_v62  ;;  %vm1526_vm7 = vcmp.eq.f32.partialorder %v4086_v26, %v4310_v30  ;;  %v1411_v21 = vmin.f32 %v1409_v31, %v1410_v7  ;;  %vm1525_vm2 = vcmp.eq.f32.partialorder %v4086_v26, %v4308_v24  ;;  %vm5171_vm11 = vcmp.eq.f32.partialorder %v4084_v29, %v4310_v30 }
 0x220   :  { %v1432_v16 = vmin.f32 %v1430_v38, %v1431_v61  ;;  %2209 = vmatpush1.msk.msra.mxu1 %vm5172_vm14, %v2334_v62  ;;  %vm5173_vm8 = vcmp.eq.f32.partialorder %v4084_v29, %v4308_v24  ;;  %vm5180_vm5 = vcmp.eq.f32.partialorder %v4006_v49, %v4308_v24  ;;  %vm1490_vm10 = vcmp.eq.f32.partialorder %v4006_v49, %v4310_v30 }
 0x221   :  { %2210 = vmatprep.subr.msk.mxu1 %vm1526_vm7, %v2334_v62  ;;  %vm1509_vm3 = vcmp.eq.f32.partialorder %v4070_v54, %v4308_v24  ;;  %v1412_v40 = vrot.slane %v1411_v21, 2  ;;  %v4438_v10 = vsel %vm1526_vm7, 1.0, %v5588_v4  ;;  %vm1510_vm15 = vcmp.eq.f32.partialorder %v4070_v54, %v4310_v30 }
 0x222   :  { %v1433_v1 = vrot.slane %v1432_v16, 2  ;;  %2211 = vmatpush1.msk.msra.mxu1 %vm1525_vm2, %v2334_v62  ;;  %v4444_v58 = vsel %vm1525_vm2, 1.0, %v5588_v4  ;;  %v4454_v6 = vsel %vm5180_vm5, 1.0, %v5588_v4  ;;  %vm1518_vm7 = vcmp.eq.f32.partialorder %v4082_v60, %v4310_v30 }
 0x223   :  { %2212 = vmatprep.subr.msk.mxu1 %vm5171_vm11, %v2334_v62  ;;  %vm1517_vm6 = vcmp.eq.f32.partialorder %v4082_v60, %v4308_v24  ;;  %v1413_v48 = vmin.f32 %v1411_v21, %v1412_v40  ;;  %v4468_v51 = vsel %vm1490_vm10, 1.0, %v5588_v4  ;;  %v4474_v63 = vsel %vm1509_vm3, 1.0, %v5588_v4 }
 0x224   :  { %v1434_v56 = vmin.f32 %v1432_v16, %v1433_v1  ;;  %2213 = vmatpush1.msk.msra.mxu1 %vm5173_vm8, %v2334_v62  ;;  %v4480_v42 = vsel %vm1510_vm15, 1.0, %v5588_v4  ;;  %v4483_v12 = vsel %vm1518_vm7, 1.0, %v5588_v4  ;;  %v4487_v15 = vsel %vm1517_vm6, 1.0, %v5588_v4 }
 0x225   :  { %2214 = vmatprep.subr.msk.mxu1 %vm1518_vm7, %v2334_v62  ;;  %vm1493_vm2 = vcmp.eq.f32.partialorder %v4008_v28, %v4308_v24  ;;  %v1414_v44 = vrot.slane %v1413_v48, 1  ;;  %vm5174_vm9 = vcmp.eq.f32.partialorder %v4080_v18, %v4310_v30  ;;  %vm1494_vm4 = vcmp.eq.f32.partialorder %v4008_v28, %v4310_v30 }
 0x226   :  { %v1435_v0 = vrot.slane %v1434_v56, 1  ;;  %2215 = vmatpush1.msk.msra.mxu1 %vm1517_vm6, %v2334_v62  ;;  %vm5175_vm7 = vcmp.eq.f32.partialorder %v4080_v18, %v4308_v24  ;;  %vm1505_vm11 = vcmp.eq.f32.partialorder %v4054_v45, %v4308_v24  ;;  %vm1497_vm6 = vcmp.eq.f32.partialorder %v4027_v59, %v4308_v24 }
 0x227   :  { %2216 = vmatprep.subr.msk.mxu1 %vm5174_vm9, %v2334_v62  ;;  %vm1498_vm14 = vcmp.eq.f32.partialorder %v4027_v59, %v4310_v30  ;;  %v4508_v33 = vmin.f32 %v1413_v48, %v1414_v44  ;;  %v4520_v2 = vsel %vm1493_vm2, 1.0, %v5588_v4  ;;  %vm1506_vm8 = vcmp.eq.f32.partialorder %v4054_v45, %v4310_v30 }
 0x228   :  { %v4510_v35 = vmin.f32 %v1434_v56, %v1435_v0  ;;  %2217 = vmatpush1.msk.msra.mxu1 %vm5175_vm7, %v2334_v62  ;;  %v4528_v19 = vsel %vm1494_vm4, 1.0, %v5588_v4  ;;  %v4538_v22 = vsel %vm1497_vm6, 1.0, %v5588_v4  ;;  %v4544_v9 = vsel %vm1498_vm14, 1.0, %v5588_v4 }
 0x229   :  { %2218 = vmatprep.subr.msk.mxu1 %vm1510_vm15, %v2334_v62  ;;  %vm1502_vm9 = vcmp.eq.f32.partialorder %v4041_v17, %v4310_v30  ;;  %vm1539_vm15 = vcmp.eq.f32.partialorder %v4102_v37, %v4508_v33  ;;  %vm1501_vm1 = vcmp.eq.f32.partialorder %v4041_v17, %v4308_v24  ;;  %v4562_v34 = vsel %vm1505_vm11, 1.0, %v5588_v4 }
 0x22a   :  { %vm1540_vm7 = vcmp.eq.f32.partialorder %v4102_v37, %v4510_v35  ;;  %2219 = vmatpush1.msk.msra.mxu1 %vm1509_vm3, %v2334_v62  ;;  %v2166_v37 = vsel %vm1539_vm15, 1.0, %v5588_v4  ;;  %vm1536_vm13 = vcmp.eq.f32.partialorder %v4100_v20, %v4510_v35  ;;  %v4577_v43 = vsel %vm1506_vm8, 1.0, %v5588_v4 }
 0x22b   :  { %v2167_v46 = vsel %vm1540_vm7, 1.0, %v5588_v4  ;;  %2170 = vmatprep.subr.msk.mxu0 %vm1540_vm7, %v2334_v62  ;;  %2220 = vmatprep.subr.msk.mxu1 %vm1506_vm8, %v2334_v62  ;;  %vm1535_vm3 = vcmp.eq.f32.partialorder %v4100_v20, %v4508_v33  ;;  %vm1532_vm7 = vcmp.eq.f32.partialorder %v4098_v32, %v4510_v35  ;;  %vm1531_vm12 = vcmp.eq.f32.partialorder %v4098_v32, %v4508_v33 }
 0x22c   :  { %2171 = vmatpush1.msk.msra.mxu0 %vm1539_vm15, %v2334_v62  ;;  %v1931_v57 = vadd.f32 %v2167_v46, %v2166_v37  ;;  %v2159_v53 = vsel %vm1532_vm7, 1.0, %v5588_v4  ;;  %v2158_v52 = vsel %vm1531_vm12, 1.0, %v5588_v4  ;;  %vm1528_vm8 = vcmp.eq.f32.partialorder %v4096_v25, %v4510_v35  ;;  %2221 = vmatpush1.msk.msra.mxu1 %vm1505_vm11, %v2334_v62 }
 0x22d   :  { %2172 = vmatprep.subr.msk.mxu0 %vm1536_vm13, %v2334_v62  ;;  %vm1527_vm15 = vcmp.eq.f32.partialorder %v4096_v25, %v4508_v33  ;;  %v4604_v39 = vsel %vm1536_vm13, 1.0, %v5588_v4  ;;  %v1921_v50 = vadd.f32 %v2159_v53, %v2158_v52  ;;  %vm1483_vm0 = vcmp.eq.f32.partialorder %v4068_v14, %v4508_v33  ;;  %2222 = vmatprep.subr.msk.mxu1 %vm1502_vm9, %v2334_v62 }
 0x22e   :  { %v4601_v3 = vadd.f32 %v4352_v13, %v1931_v57  ;;  %2173 = vmatpush1.msk.msra.mxu0 %vm1535_vm3, %v2334_v62  ;;  %vm1484_vm13 = vcmp.eq.f32.partialorder %v4068_v14, %v4510_v35  ;;  %v2110_v47 = vsel %vm1483_vm0, 1.0, %v5588_v4  ;;  %vm5181_vm11 = vcmp.eq.f32.partialorder %v4066_v36, %v4508_v33  ;;  %2223 = vmatpush1.msk.msra.mxu1 %vm1501_vm1, %v2334_v62 }
 0x22f   :  { %2174 = vmatprep.subr.msk.mxu0 %vm1532_vm7, %v2334_v62  ;;  %vm5182_vm5 = vcmp.eq.f32.partialorder %v4066_v36, %v4510_v35  ;;  %v4636_v13 = vadd.f32 %v4376_v41, %v1921_v50  ;;  %v2111_v31 = vsel %vm1484_vm13, 1.0, %v5588_v4  ;;  %v2106_v38 = vsel %vm5181_vm11, 1.0, %v5588_v4  ;;  %2224 = vmatprep.subr.msk.mxu1 %vm1498_vm14, %v2334_v62 }
 0x230   :  { %2175 = vmatpush1.msk.msra.mxu0 %vm1531_vm12, %v2334_v62  ;;  %v2107_v7 = vsel %vm5182_vm5, 1.0, %v5588_v4  ;;  %v1861_v32 = vadd.f32 %v2111_v31, %v2110_v47  ;;  %vm1524_vm12 = vcmp.eq.f32.partialorder %v4086_v26, %v4510_v35  ;;  %vm1523_vm7 = vcmp.eq.f32.partialorder %v4086_v26, %v4508_v33  ;;  %2225 = vmatpush1.msk.msra.mxu1 %vm1497_vm6, %v2334_v62 }
 0x231   :  { %2176 = vmatprep.subr.msk.mxu0 %vm1528_vm8, %v2334_v62  ;;  %v1856_v41 = vadd.f32 %v2107_v7, %v2106_v38  ;;  %v2151_v61 = vsel %vm1524_vm12, 1.0, %v5588_v4  ;;  %v2150_v21 = vsel %vm1523_vm7, 1.0, %v5588_v4  ;;  %vm1520_vm14 = vcmp.eq.f32.partialorder %v4084_v29, %v4510_v35  ;;  %2226 = vmatprep.subr.msk.mxu1 %vm1494_vm4, %v2334_v62 }
 0x232   :  { %2177 = vmatpush1.msk.msra.mxu0 %vm1527_vm15, %v2334_v62  ;;  %vm1519_vm11 = vcmp.eq.f32.partialorder %v4084_v29, %v4508_v33  ;;  %v4680_v26 = vsel %vm1535_vm3, 1.0, %v5588_v4  ;;  %v1862_v16 = vadd.f32 %v4394_v11, %v1861_v32  ;;  %v1911_v1 = vadd.f32 %v2151_v61, %v2150_v21  ;;  %2227 = vmatpush1.msk.msra.mxu1 %vm1493_vm2, %v2334_v62 }
 0x233   :  { %v1857_v40 = vadd.f32 %v4410_v8, %v1856_v41  ;;  %2178 = vmatprep.subr.msk.mxu0 %vm1524_vm12, %v2334_v62  ;;  %v4693_v48 = vsel %vm1528_vm8, 1.0, %v5588_v4  ;;  %vm1487_vm6 = vcmp.eq.f32.partialorder %v4006_v49, %v4508_v33  ;;  %vm1488_vm3 = vcmp.eq.f32.partialorder %v4006_v49, %v4510_v35  ;;  %2228 = vmatprep.subr.msk.mxu1 %vm1490_vm10, %v2334_v62 }
 0x234   :  { %2179 = vmatpush1.msk.msra.mxu0 %vm1523_vm7, %v2334_v62  ;;  %vm1507_vm12 = vcmp.eq.f32.partialorder %v4070_v54, %v4508_v33  ;;  %v1863_v11 = vadd.f32 %v4404_v27, %v1862_v16  ;;  %v1912_v56 = vadd.f32 %v4444_v58, %v1911_v1  ;;  %v2114_v44 = vsel %vm1487_vm6, 1.0, %v5588_v4 }
 0x235   :  { %v1858_v8 = vadd.f32 %v4416_v23, %v1857_v40  ;;  %2180 = vmatprep.subr.msk.mxu0 %vm1520_vm14, %v2334_v62  ;;  %v2115_v27 = vsel %vm1488_vm3, 1.0, %v5588_v4  ;;  %vm1508_vm4 = vcmp.eq.f32.partialorder %v4070_v54, %v4510_v35  ;;  %v2134_v23 = vsel %vm1507_vm12, 1.0, %v5588_v4 }
 0x236   :  { %2181 = vmatpush1.msk.msra.mxu0 %vm1519_vm11, %v2334_v62  ;;  %vm1516_vm10 = vcmp.eq.f32.partialorder %v4082_v60, %v4510_v35  ;;  %vm5589_vm2 = vcmp.eq.f32.partialorder %v4006_v49, %v4308_v24  ;;  %1864 = vadd.xlane.f32.xlu1 %v1863_v11  ;;  %v1866_v58 = vadd.f32 %v2115_v27, %v2114_v44  ;;  %v2135_v0 = vsel %vm1508_vm4, 1.0, %v5588_v4 }
 0x237   :  { %2229 = vmatpush1.msk.msra.mxu1 %vm5589_vm2, %v2334_v62  ;;  %1859 = vadd.xlane.f32.xlu0 %v1858_v8  ;;  %v2143_v46 = vsel %vm1516_vm10, 1.0, %v5588_v4  ;;  %vm1515_vm8 = vcmp.eq.f32.partialorder %v4082_v60, %v4508_v33  ;;  %v4752_v37 = vsel %vm1520_vm14, 1.0, %v5588_v4  ;;  %v1891_v57 = vadd.f32 %v2135_v0, %v2134_v23 }
 0x238   :  { %2182 = vmatprep.subr.msk.mxu0 %vm1516_vm10, %v2334_v62  ;;  %v2142_v53 = vsel %vm1515_vm8, 1.0, %v5588_v4  ;;  %vm1512_vm7 = vcmp.eq.f32.partialorder %v4080_v18, %v4510_v35  ;;  %vm5590_vm2 = vcmp.eq.f32.partialorder %v4068_v14, %v4310_v30  ;;  %v1867_v60 = vadd.f32 %v4454_v6, %v1866_v58 }
 0x239   :  { %2230 = vmatprep.subr.msk.mxu1 %vm5590_vm2, %v2334_v62  ;;  %2183 = vmatpush1.msk.msra.mxu0 %vm1515_vm8, %v2334_v62  ;;  %v1901_v52 = vadd.f32 %v2143_v46, %v2142_v53  ;;  %v2139_v50 = vsel %vm1512_vm7, 1.0, %v5588_v4  ;;  %vm1511_vm14 = vcmp.eq.f32.partialorder %v4080_v18, %v4508_v33  ;;  %vm5591_vm10 = vcmp.eq.f32.partialorder %v4068_v14, %v4308_v24 }
 0x23a   :  { %2231 = vmatpush1.msk.msra.mxu1 %vm5591_vm10, %v2334_v62  ;;  %v1892_v47 = vadd.f32 %v4474_v63, %v1891_v57  ;;  %2184 = vmatprep.subr.msk.mxu0 %vm1512_vm7, %v2334_v62  ;;  %vm1491_vm2 = vcmp.eq.f32.partialorder %v4008_v28, %v4508_v33  ;;  %vm1492_vm8 = vcmp.eq.f32.partialorder %v4008_v28, %v4510_v35  ;;  %v2128_v27 = vsel %vm1501_vm1, 1.0, %v5588_v4 }
 0x23b   :  { %vm1504_vm5 = vcmp.eq.f32.partialorder %v4054_v45, %v4510_v35  ;;  %v1868_v6 = vadd.f32 %v4468_v51, %v1867_v60  ;;  %v1902_v31 = vadd.f32 %v4487_v15, %v1901_v52  ;;  %2185 = vmatpush1.msk.msra.mxu0 %vm1511_vm14, %v2334_v62  ;;  %v2118_v63 = vsel %vm1491_vm2, 1.0, %v5588_v4 }
 0x23c   :  { %v2119_v38 = vsel %vm1492_vm8, 1.0, %v5588_v4  ;;  %vm5592_vm7 = vcmp.eq.f32.partialorder %v4066_v36, %v4310_v30  ;;  %v1893_v51 = vadd.f32 %v4480_v42, %v1892_v47  ;;  %2186 = vmatprep.subr.msk.mxu0 %vm1508_vm4, %v2334_v62  ;;  %v2131_v7 = vsel %vm1504_vm5, 1.0, %v5588_v4  ;;  %v4815_v42 = vld [vmem:[%s5015_s2] sm:$0xf]  ;;  %s2336_s2 = smov [#allocation2]  }
 0x23d   :  { %2232 = vmatprep.subr.msk.mxu1 %vm5592_vm7, %v2334_v62  ;;  %v1871_v15 = vadd.f32 %v2119_v38, %v2118_v63  ;;  %vm1503_vm10 = vcmp.eq.f32.partialorder %v4054_v45, %v4508_v33  ;;  %vm5593_vm7 = vcmp.eq.f32.partialorder %v4066_v36, %v4308_v24  ;;  %1869 = vadd.xlane.f32.xlu1 %v1868_v6  ;;  %v2335_v60 = vmov 1966171168   ;;  %s2071_s29 = sshll.u32 %s2336_s2, 4  ;;  %s2072_s29 = int_to_ptr.vmem [resolvable:$true] %s2071_s29 }
 0x23e   :  { %2233 = vmatpush1.msk.msra.mxu1 %vm5593_vm7, %v2334_v62  ;;  %v1903_v32 = vadd.f32 %v4483_v12, %v1902_v31  ;;  %2187 = vmatpush1.msk.msra.mxu0 %vm1507_vm12, %v2334_v62  ;;  %v2130_v41 = vsel %vm1503_vm10, 1.0, %v5588_v4  ;;  %vm1495_vm4 = vcmp.eq.f32.partialorder %v4027_v59, %v4508_v33  ;;  %vm1496_vm7 = vcmp.eq.f32.partialorder %v4027_v59, %v4510_v35  ;;  %s2265_s30 = scalar_lea.vmem %s2072_s29, 64  ;;  %p2270_p1 = scmp.lt.s32.totalorder %s2072_s29, %s2072_s29 }
 0x23f   :  { %1894 = vadd.xlane.f32.xlu0 %v1893_v51  ;;  %v1872_v61 = vadd.f32 %v4520_v2, %v1871_v15  ;;  %2188 = vmatprep.subr.msk.mxu0 %vm1504_vm5, %v2334_v62  ;;  %v2122_v54 = vsel %vm1495_vm4, 1.0, %v5588_v4  ;;  %v2123_v12 = vsel %vm1496_vm7, 1.0, %v5588_v4  ;;  %v1913_v21 = vadd.f32 %v4438_v10, %v1912_v56  ;;  %p2266_p0 = scmp.ne.s32.totalorder %s2072_s29, %s2265_s30  ;;  %p2271_p2 = scmp.lt.s32.totalorder %s2265_s30, %s2265_s30 }
 0x240   :  { %v2138_v2 = vsel %vm1511_vm14, 1.0, %v5588_v4  ;;  %2189 = vmatpush1.msk.msra.mxu0 %vm1503_vm10, %v2334_v62  ;;  %v1876_v16 = vadd.f32 %v2123_v12, %v2122_v54  ;;  %vm1500_vm5 = vcmp.eq.f32.partialorder %v4041_v17, %v4510_v35  ;;  %vm1499_vm12 = vcmp.eq.f32.partialorder %v4041_v17, %v4508_v33  ;;  %1807 = vmatmul.mubr.f32.vlgmr.msra.gmra.mxu1 %v4815_v42 }
 0x241   :  { %v2146_v10 = vsel %vm1519_vm11, 1.0, %v5588_v4  ;;  %v1873_v40 = vadd.f32 %v4528_v19, %v1872_v61  ;;  %v2127_v1 = vsel %vm1500_vm5, 1.0, %v5588_v4  ;;  %2190 = vmatprep.subr.msk.mxu0 %vm1500_vm5, %v2334_v62  ;;  %v2126_v45 = vsel %vm1499_vm12, 1.0, %v5588_v4  ;;  %p2272_p3 = por %p2271_p2, %p2270_p1 }
 0x242   :  { %v1877_v11 = vadd.f32 %v4538_v22, %v1876_v16  ;;  %2191 = vmatpush1.msk.msra.mxu0 %vm1499_vm12, %v2334_v62  ;;  %v1881_v8 = vadd.f32 %v2127_v1, %v2126_v45  ;;  %v1923_v56 = vadd.f32 %v4361_v55, %v4636_v13  ;;  %v1886_v44 = vadd.f32 %v2131_v7, %v2130_v41 }
 0x243   :  { %v2154_v19 = vsel %vm1527_vm15, 1.0, %v5588_v4  ;;  %1874 = vadd.xlane.f32.xlu1 %v1873_v40  ;;  %1904 = vadd.xlane.f32.xlu0 %v1903_v32  ;;  %v1933_v22 = vadd.f32 %v4349_v5, %v4601_v3  ;;  %v1896_v23 = vadd.f32 %v2139_v50, %v2138_v2  ;;  %vm5594_vm15 = vcmp.eq.f32.partialorder %v4080_v18, %v4308_v24  ;;  %v5603_v32 = vld [vmem:[#allocation20_spill] sm:$0xff]  ;;  %p2273_p4 = pnand %p2272_p3, %p2266_p0 }
 0x244   :  { %v1878_v58 = vadd.f32 %v4544_v9, %v1877_v11  ;;  %2192 = vmatprep.subr.msk.mxu0 %vm1496_vm7, %v2334_v62  ;;  %v1882_v55 = vadd.f32 %v2128_v27, %v1881_v8  ;;  %v1887_v13 = vadd.f32 %v4562_v34, %v1886_v44  ;;  %v2140_v0 = vsel %vm5594_vm15, 1.0, %v5588_v4 }
 0x245   :  { %2193 = vmatpush1.msk.msra.mxu0 %vm1495_vm4, %v2334_v62  ;;  %v2129_v5 = vsel %vm1502_vm9, 1.0, %v5588_v4  ;;  %vm5595_vm1 = vcmp.eq.f32.partialorder %v4080_v18, %v4310_v30  ;;  %v1897_v34 = vadd.f32 %v2140_v0, %v1896_v23  ;;  %v1906_v3 = vadd.f32 %v4752_v37, %v2146_v10 }
 0x246   :  { %v2141_v9 = vsel %vm5595_vm1, 1.0, %v5588_v4  ;;  %v1883_v46 = vadd.f32 %v2129_v5, %v1882_v55  ;;  %2194 = vmatprep.subr.msk.mxu0 %vm1492_vm8, %v2334_v62  ;;  %v1888_v59 = vadd.f32 %v4577_v43, %v1887_v13  ;;  %vm5596_vm9 = vcmp.eq.f32.partialorder %v4084_v29, %v4308_v24 }
 0x247   :  { %v2148_v17 = vsel %vm5596_vm9, 1.0, %v5588_v4  ;;  %v1916_v57 = vadd.f32 %v4693_v48, %v2154_v19  ;;  %1879 = vadd.xlane.f32.xlu1 %v1878_v58  ;;  %1914 = vadd.xlane.f32.xlu0 %v1913_v21  ;;  %v1898_v18 = vadd.f32 %v2141_v9, %v1897_v34  ;;  %vm5597_vm11 = vcmp.eq.f32.partialorder %v4096_v25, %v4308_v24 }
 0x248   :  { %v1907_v53 = vadd.f32 %v2148_v17, %v1906_v3  ;;  %v2156_v37 = vsel %vm5597_vm11, 1.0, %v5588_v4  ;;  %v1820_v52 = vunpack.c.l.s4 %v2335_v60  ;;  %2195 = vmatpush1.msk.msra.mxu0 %vm1491_vm2, %v2334_v62  ;;  %vm5598_vm14 = vcmp.eq.f32.partialorder %v4084_v29, %v4310_v30 }
 0x249   :  { %v2149_v43 = vsel %vm5598_vm14, 1.0, %v5588_v4  ;;  %v1917_v48 = vadd.f32 %v2156_v37, %v1916_v57  ;;  %v1926_v50 = vadd.f32 %v4604_v39, %v4680_v26  ;;  %2196 = vmatprep.subr.msk.mxu0 %vm1488_vm3, %v2334_v62  ;;  %vm5599_vm8 = vcmp.eq.f32.partialorder %v4096_v25, %v4310_v30 }
 0x24a   :  { %v1908_v47 = vadd.f32 %v2149_v43, %v1907_v53  ;;  %v2157_v28 = vsel %vm5599_vm8, 1.0, %v5588_v4  ;;  %vm5600_vm2 = vcmp.eq.f32.partialorder %v4100_v20, %v4308_v24  ;;  %v2234_v6 = vtrunc.f32 %v4508_v33  ;;  %2197 = vmatpush1.msk.msra.mxu0 %vm1487_vm6, %v2334_v62 }
 0x24b   :  { %v2164_v29 = vsel %vm5600_vm2, 1.0, %v5588_v4  ;;  %v1918_v39 = vadd.f32 %v2157_v28, %v1917_v48  ;;  %1884 = vadd.xlane.f32.xlu1 %v1883_v46  ;;  %1924 = vadd.xlane.f32.xlu0 %v1923_v56  ;;  %vm5601_vm3 = vcmp.eq.f32.partialorder %v4100_v20, %v4310_v30  ;;  %v2236_v31 = vtrunc.f32 %v4510_v35 }
 0x24c   :  { %v1927_v26 = vadd.f32 %v2164_v29, %v1926_v50  ;;  %v2165_v25 = vsel %vm5601_vm3, 1.0, %v5588_v4  ;;  %v1821_v63 = vunpack.c.0.s8 %v1820_v52  ;;  %2198 = vmatprep.subr.msk.mxu0 %vm1484_vm13, %v2334_v62  ;;  %v2235_v49 = vcvt.f32.s32 %v2234_v6 }
 0x24d   :  { %v2238_v51 = vtrunc.f32 %v4308_v24  ;;  %2199 = vmatpush1.msk.msra.mxu0 %vm1483_vm0, %v2334_v62  ;;  %v2237_v15 = vcvt.f32.s32 %v2236_v31  ;;  %v2240_v20 = vtrunc.f32 %v4310_v30  ;;  %vm5602_vm6 = vcmp.eq.f32.partialorder %v4066_v36, %v4510_v35 }
 0x24e   :  { %v1928_v38 = vadd.f32 %v2165_v25, %v1927_v26  ;;  %2200 = vmatprep.subr.msk.mxu0 %vm5602_vm6, %v2334_v62  ;;  %v1824_v41 = vsub.s32 %v1821_v63, %v5603_v32  ;;  %vm5604_vm13 = vcmp.eq.f32.partialorder %v4066_v36, %v4508_v33  ;;  %v5605_v54 = vlaneseq }
 0x24f   :  { %v2239_v4 = vcvt.f32.s32 %v2238_v51  ;;  %1889 = vadd.xlane.f32.xlu1 %v1888_v59  ;;  %1934 = vadd.xlane.f32.xlu0 %v1933_v22  ;;  %v2241_v7 = vcvt.f32.s32 %v2240_v20  ;;  %v1817_v14 = vcombine.low %v2235_v49, %v2237_v15 }
 0x250   :  { %2201 = vmatpush1.msk.msra.mxu0 %vm5604_vm13, %v2334_v62  ;;  %vm1843_vm0 = vcmp.lt.s32.totalorder %v5605_v54, 512 }
 0x251   :  { %1736 = vmatmul.mubr.f32.vlgmr.msra.gmra.mxu0 %v4815_v42  ;;  %v1818_v24 = vcombine.low %v2239_v4, %v2241_v7  ;;  %v1825_v30 = vrot.slane %v1817_v14, %v1824_v41 }
 0x253   :  { %1899 = vadd.xlane.f32.xlu1 %v1898_v18  ;;  %v1832_v61 = vrot.slane %v1818_v24, %v1824_v41 }
 0x255   :  { %v1833_v35 = vcombine.low %v1825_v30, %v1832_v61 }
 0x257   :  { %1909 = vadd.xlane.f32.xlu1 %v1908_v47  ;;  %v1840_v12 = vrot.slane %v1833_v35, %v1824_v41 }
 0x259   :  { %1845 = vst.msk [vmem:[#allocation2] sm:$0xf] %vm1843_vm0, %v1840_v12 }
 0x25b   :  { %1919 = vadd.xlane.f32.xlu1 %v1918_v39 }
 0x25f   :  { %1929 = vadd.xlane.f32.xlu1 %v1928_v38 }
 0x260   :  { %2276 = shalt.err (!%p2273_p4)
}
 0x261   :  { %2074 = dma.vmem_to_hbm [thread:$0]  %s2072_s29, 64, %s5016_s3, [#allocation3]   ;;  %v4973_v62 = vand.u32 127, %v5605_v54  ;;  %vm1963_vm10 = vcmask 130112   ;;  %vm1970_vm4 = vcmask 195712   ;;  %vm1977_vm7 = vcmask 261312  }
 0x262   :  { %vm1984_vm5 = vcmask 326912   ;;  %vm1991_vm12 = vcmask 392512   ;;  %vm1998_vm15 = vcmask 458112   ;;  %vm2005_vm1 = vcmask 523712   ;;  %s2337_s3 = smov [#allocation4]   ;;  %s2338_s9 = smov [#allocation6]  }
 0x263   :  { %v1958_v21 = vadd.s32 4294967288, %v4973_v62  ;;  %v1965_v2 = vadd.s32 4294967280, %v4973_v62  ;;  %v1972_v16 = vadd.s32 4294967272, %v4973_v62  ;;  %v1979_v40 = vadd.s32 4294967264, %v4973_v62  ;;  %s2081_s8 = sshll.u32 %s2337_s3, 4  ;;  %s2091_s10 = sshll.u32 %s2338_s9, 4  ;;  %s2082_s8 = int_to_ptr.vmem [resolvable:$true] %s2081_s8  ;;  %s2092_s10 = int_to_ptr.vmem [resolvable:$true] %s2091_s10 }
 0x264   :  { %v1956_v45 = vsub.s32 %v4973_v62, %v5603_v32  ;;  %v1986_v11 = vadd.s32 4294967256, %v4973_v62  ;;  %v1993_v22 = vadd.s32 4294967248, %v4973_v62  ;;  %v2000_v0 = vadd.s32 4294967240, %v4973_v62  ;;  %s2285_s11 = scalar_lea.vmem %s2082_s8, 256  ;;  %p2290_p6 = scmp.lt.s32.totalorder %s2082_s8, %s2082_s8 }
 0x265   :  { %v1961_v1 = vsub.s32 %v1958_v21, %v5603_v32  ;;  %v1968_v8 = vsub.s32 %v1965_v2, %v5603_v32  ;;  %v1975_v44 = vsub.s32 %v1972_v16, %v5603_v32  ;;  %v1982_v27 = vsub.s32 %v1979_v40, %v5603_v32  ;;  %p2286_p5 = scmp.ne.s32.totalorder %s2082_s8, %s2285_s11  ;;  %p2291_p7 = scmp.lt.s32.totalorder %s2285_s11, %s2285_s11 }
 0x266   :  { %v1989_v55 = vsub.s32 %v1986_v11, %v5603_v32  ;;  %v1996_v46 = vsub.s32 %v1993_v22, %v5603_v32  ;;  %v2007_v59 = vadd.s32 4294967232, %v4973_v62  ;;  %v2003_v53 = vsub.s32 %v2000_v0, %v5603_v32 }
 0x267   :  { %v2014_v60 = vadd.s32 4294967224, %v4973_v62  ;;  %v2021_v47 = vadd.s32 4294967216, %v4973_v62  ;;  %v2028_v25 = vadd.s32 4294967208, %v4973_v62  ;;  %vm2012_vm9 = vcmask 589312   ;;  %p2292_p8 = por %p2291_p7, %p2290_p6 }
 0x268   :  { %v2010_v50 = vsub.s32 %v2007_v59, %v5603_v32  ;;  %v2035_v49 = vadd.s32 4294967200, %v4973_v62  ;;  %vm2019_vm11 = vcmask 654912   ;;  %v2042_v7 = vadd.s32 4294967192, %v4973_v62 }
 0x269   :  { %v2017_v26 = vsub.s32 %v2014_v60, %v5603_v32  ;;  %v2024_v38 = vsub.s32 %v2021_v47, %v5603_v32  ;;  %v2031_v4 = vsub.s32 %v2028_v25, %v5603_v32  ;;  %vm2026_vm14 = vcmask 720512   ;;  %p2293_p9 = pnand %p2292_p8, %p2286_p5 }
 0x26a   :  { %v2038_v30 = vsub.s32 %v2035_v49, %v5603_v32  ;;  %v2049_v61 = vadd.s32 4294967184, %v4973_v62  ;;  %v2056_v35 = vadd.s32 4294967176, %v4973_v62  ;;  %vm2033_vm8 = vcmask 786112  }
 0x26b   :  { %vm2040_vm2 = vcmask 851712   ;;  %vm2047_vm3 = vcmask 917312   ;;  %vm2054_vm6 = vcmask 982912   ;;  %vm2061_vm13 = vcmask 1048512  }
 0x26c   :  { %v2052_v2 = vsub.s32 %v2049_v61, %v5603_v32  ;;  %v2059_v16 = vsub.s32 %v2056_v35, %v5603_v32 }
 0x2bf   :  { %v1865_v36 = vpop.xlane.xlu1 %1864 }
 0x2c0   :  { %v1860_v42 = vpop.xlane.xlu0 %1859  ;;  %v1962_v23 = vrot.slane %v1865_v36, %v1961_v1 }
 0x2c1   :  { %v1957_v58 = vrot.slane %v1860_v42, %v1956_v45 }
 0x2c3   :  { %v1964_v17 = vsel %vm1963_vm10, %v1962_v23, %v1957_v58 }
 0x2c6   :  { %v1870_v33 = vpop.xlane.xlu1 %1869 }
 0x2c7   :  { %v1969_v13 = vrot.slane %v1870_v33, %v1968_v8  ;;  %v2045_v33 = vsub.s32 %v2042_v7, %v5603_v32 }
 0x2c8   :  { %v1895_v56 = vpop.xlane.xlu0 %1894 }
 0x2c9   :  { %v1971_v18 = vsel %vm1970_vm4, %v1969_v13, %v1964_v17  ;;  %v2004_v39 = vrot.slane %v1895_v56, %v2003_v53 }
 0x2cc   :  { %v1875_v10 = vpop.xlane.xlu1 %1874  ;;  %v1905_v34 = vpop.xlane.xlu0 %1904 }
 0x2cd   :  { %v1976_v5 = vrot.slane %v1875_v10, %v1975_v44  ;;  %v2018_v20 = vrot.slane %v1905_v34, %v2017_v26 }
 0x2cf   :  { %v1978_v37 = vsel %vm1977_vm7, %v1976_v5, %v1971_v18 }
 0x2d0   :  { %v1880_v19 = vpop.xlane.xlu1 %1879  ;;  %v1915_v29 = vpop.xlane.xlu0 %1914 }
 0x2d1   :  { %v1983_v3 = vrot.slane %v1880_v19, %v1982_v27  ;;  %v2032_v36 = vrot.slane %v1915_v29, %v2031_v4 }
 0x2d3   :  { %v1985_v43 = vsel %vm1984_vm5, %v1983_v3, %v1978_v37 }
 0x2d4   :  { %v1885_v9 = vpop.xlane.xlu1 %1884  ;;  %v1925_v14 = vpop.xlane.xlu0 %1924 }
 0x2d5   :  { %v1990_v57 = vrot.slane %v1885_v9, %v1989_v55  ;;  %v2046_v45 = vrot.slane %v1925_v14, %v2045_v33 }
 0x2d7   :  { %v1992_v28 = vsel %vm1991_vm12, %v1990_v57, %v1985_v43 }
 0x2d8   :  { %v1890_v52 = vpop.xlane.xlu1 %1889  ;;  %v1935_v40 = vpop.xlane.xlu0 %1934 }
 0x2d9   :  { %v1997_v48 = vrot.slane %v1890_v52, %v1996_v46  ;;  %v2060_v8 = vrot.slane %v1935_v40, %v2059_v16 }
 0x2db   :  { %v1999_v6 = vsel %vm1998_vm15, %v1997_v48, %v1992_v28 }
 0x2dc   :  { %v1900_v31 = vpop.xlane.xlu1 %1899  ;;  %v2006_v51 = vsel %vm2005_vm1, %v2004_v39, %v1999_v6 }
 0x2dd   :  { %v2011_v63 = vrot.slane %v1900_v31, %v2010_v50 }
 0x2df   :  { %v2013_v15 = vsel %vm2012_vm9, %v2011_v63, %v2006_v51 }
 0x2e0   :  { %v1910_v41 = vpop.xlane.xlu1 %1909  ;;  %v2020_v54 = vsel %vm2019_vm11, %v2018_v20, %v2013_v15 }
 0x2e1   :  { %v2025_v24 = vrot.slane %v1910_v41, %v2024_v38 }
 0x2e3   :  { %v2027_v12 = vsel %vm2026_vm14, %v2025_v24, %v2020_v54 }
 0x2e4   :  { %v1920_v42 = vpop.xlane.xlu1 %1919  ;;  %v2034_v10 = vsel %vm2033_vm8, %v2032_v36, %v2027_v12 }
 0x2e5   :  { %v2039_v21 = vrot.slane %v1920_v42, %v2038_v30 }
 0x2e7   :  { %v2041_v1 = vsel %vm2040_vm2, %v2039_v21, %v2034_v10 }
 0x2e8   :  { %v1930_v11 = vpop.xlane.xlu1 %1929  ;;  %v2048_v56 = vsel %vm2047_vm3, %v2046_v45, %v2041_v1 }
 0x2e9   :  { %v2053_v62 = vrot.slane %v1930_v11, %v2052_v2 }
 0x2eb   :  { %v2055_v44 = vsel %vm2054_vm6, %v2053_v62, %v2048_v56 }
 0x2ec   :  { %v2062_v19 = vsel %vm2061_vm13, %v2060_v8, %v2055_v44 }
 0x2ed   :  { %2064 = vst [vmem:[#allocation6] sm:$0x1] %v2062_v19 }
 0x300   :  { %v1808_v27 = vpop.f32.mrf.mxu1 }
 0x302   :  { %v1810_v22 = vpop.f32.mrf.mxu1 }
 0x303   :  { %v1851_v23 = vcombine.low %v1808_v27, %v1810_v22 }
 0x305   :  { %1855 = vst [vmem:[#allocation4 + $0x8] sm:$0xff] %v1851_v23 }
 0x311   :  { %v1737_v58 = vpop.f32.mrf.mxu0 }
 0x313   :  { %v1739_v32 = vpop.f32.mrf.mxu0 }
 0x314   :  { %v1850_v55 = vcombine.low %v1737_v58, %v1739_v32 }
 0x316   :  { %1854 = vst [vmem:[#allocation4] sm:$0xff] %v1850_v55 }
 0x317   :  { %2296 = shalt.err (!%p2293_p9)
}
 0x318   :  { %2084 = dma.vmem_to_hbm [thread:$0]  %s2082_s8, 256, %s5017_s4, [#allocation5]  }
 0x319   :  { %s2305_s14 = scalar_lea.vmem %s2092_s10, 16  ;;  %s2309_s15 = scalar_lea.vmem %s2092_s10, 32 }
 0x31a   :  { %p2306_p10 = scmp.ne.s32.totalorder %s2092_s10, %s2305_s14  ;;  %p2310_p11 = scmp.lt.s32.totalorder %s2092_s10, %s2092_s10 }
 0x31b   :  { %p2311_p12 = scmp.lt.s32.totalorder %s2309_s15, %s2305_s14 }
 0x31d   :  { %p2312_p13 = por %p2311_p12, %p2310_p11 }
 0x31f   :  { %p2313_p0 = pnand %p2312_p13, %p2306_p10 }
 0x321   :  { %2316 = shalt.err (!%p2313_p0)
}
 0x322   :  { %2094 = dma.vmem_to_hbm [thread:$0]  %s2092_s10, 16, %s5018_s5, [#allocation5]  }
 0x323   :  { %2325 = dma.done.wait [#allocation3], 64  }
 0x324   :  { %2326 = vsyncadd [#allocation3], 4294967232 }
 0x325   :  { %2327 = dma.done.wait [#allocation5], 272  }
 0x326   :  { %2328 = vsyncadd [#allocation5], 4294967024 }
 0x327   :  { %2104 = vsyncpa [#allocation3], 1 }
 0x328   :  { %2105 = vsyncpa [#allocation5], 1 }

</bundles_post_ra>
